<compile_context>
chip_gen: v6e
topology: v6e:2x2x1
jax: 0.10.0
libtpu: 0.0.40
codegen_flags: <defaults>
</compile_context>

<pallas_src>
import jax
import jax.numpy as jnp
from jax.experimental import pallas as pl
from jax.experimental.pallas import tpu as pltpu

# ---------------- fixed architecture (hard-coded in the reference) ------------
FC_DIMS = [784, 512, 256, 128, 64, 32, 10]
LAYER_CONFIGS = [(4, 2), (2, 2), (2, 2), (2, 2), (2, 2), (2, 4)]   # (in_groups, out_groups)
ROUTER_OUT = [8, 4, 4, 4, 4, 8]
N_LAYERS = 6
OUT_PAD = 128            # lane-dense padding of the final 10-wide output
TEMPERATURE = 1.0


def _round_up(v, m):
    return ((v + m - 1) // m) * m


def _group_bounds(dim, n):
    # contiguous equal slabs, last group extends to `dim` (matches the torch helpers)
    gs = dim // n
    return [(i * gs, (i + 1) * gs if i < n - 1 else dim) for i in range(n)]


# ------------------------------ fused kernel ----------------------------------
def _layerwise_pathway_kernel(
        x_ref,
        ws1, b1, wr1, br1,
        ws2, b2, wr2, br2,
        ws3, b3, wr3, br3, m3,
        ws4, b4, m4,
        ws5, b5, m5,
        ws6, b6, m6,
        o_ref):
    f32 = jnp.float32
    bf16 = jnp.bfloat16

    def softmax(s):                       # f32, tiny lane width (4 or 8)
        m = jnp.max(s, axis=-1, keepdims=True)
        e = jnp.exp(s - m)
        return e / jnp.sum(e, axis=-1, keepdims=True)

    def gelu(v):                          # exact erf GELU (torch F.gelu default), f32
        return 0.5 * v * (1.0 + jax.lax.erf(v * 0.7071067811865476))

    # ----- layer 1: 4 spatial regions (K=196 each) -> 512, out halves at 256 -----
    xb = [x_ref[i].astype(bf16) for i in range(4)]
    sc = jnp.dot(xb[0], wr1[0], preferred_element_type=f32)
    for i in range(1, 4):
        sc = sc + jnp.dot(xb[i], wr1[i], preferred_element_type=f32)
    pw = softmax(sc + br1[...])
    bias = b1[...]
    acc0 = None
    acc1 = None
    for i in range(4):
        part = jnp.dot(xb[i], ws1[i], preferred_element_type=f32) + bias   # (TB,512)
        c0 = part[:, :256] * pw[:, 2 * i:2 * i + 1]
        c1 = part[:, 256:] * pw[:, 2 * i + 1:2 * i + 2]
        acc0 = c0 if acc0 is None else acc0 + c0
        acc1 = c1 if acc1 is None else acc1 + c1
    g = [gelu(acc0).astype(bf16), gelu(acc1).astype(bf16)]   # two (TB,256) slabs

    # ----- layer 2: real-K (256) per-group matmuls, out halves at 128 -----
    sc = (jnp.dot(g[0], wr2[0], preferred_element_type=f32)
          + jnp.dot(g[1], wr2[1], preferred_element_type=f32))
    pw = softmax(sc + br2[...])
    bias = b2[...]
    acc0 = None
    acc1 = None
    for i in range(2):
        part = jnp.dot(g[i], ws2[i], preferred_element_type=f32) + bias    # (TB,256)
        c0 = part[:, :128] * pw[:, 2 * i:2 * i + 1]
        c1 = part[:, 128:] * pw[:, 2 * i + 1:2 * i + 2]
        acc0 = c0 if acc0 is None else acc0 + c0
        acc1 = c1 if acc1 is None else acc1 + c1
    g = [gelu(acc0).astype(bf16), gelu(acc1).astype(bf16)]   # two (TB,128) slabs

    # ----- layer 3: real-K (128) per-group matmuls, out groups at 64 (mask combine) -----
    sc = (jnp.dot(g[0], wr3[0], preferred_element_type=f32)
          + jnp.dot(g[1], wr3[1], preferred_element_type=f32))
    pw = softmax(sc + br3[...])
    bias = b3[...]
    mk = m3[...]                                             # (2,128) 0/1 masks
    out = None
    for i in range(2):
        part = jnp.dot(g[i], ws3[i], preferred_element_type=f32) + bias    # (TB,128)
        r = mk[0:1, :] * pw[:, 2 * i:2 * i + 1] + mk[1:2, :] * pw[:, 2 * i + 1:2 * i + 2]
        c = part * r
        out = c if out is None else out + c
    h = gelu(out).astype(bf16)                               # (TB,128)

    # ----- layers 4-6: one merged matmul each (group blocks padded to 128 + folded router) -----
    def fused(hq, ws_ref, b_ref, m_ref, n_in_grp, n_out_grp, last):
        part = jnp.dot(hq, ws_ref[...], preferred_element_type=f32) + b_ref[...]
        n_r = n_in_grp * n_out_grp
        pw_l = softmax(part[:, n_in_grp * 128:n_in_grp * 128 + n_r])
        mk_l = m_ref[...]
        acc = None
        for i in range(n_in_grp):
            r = None
            for j in range(n_out_grp):
                t = mk_l[j:j + 1, :] * pw_l[:, i * n_out_grp + j:i * n_out_grp + j + 1]
                r = t if r is None else r + t
            c = part[:, 128 * i:128 * (i + 1)] * r
            acc = c if acc is None else acc + c
        return acc if last else gelu(acc).astype(bf16)

    h = fused(h, ws4, b4, m4, 2, 2, False)
    h = fused(h, ws5, b5, m5, 2, 2, False)
    o_ref[...] = fused(h, ws6, b6, m6, 2, 4, True)           # (TB,128) f32, cols 10.. are 0


# --------------------------- host-side operand prep ---------------------------
def _prepare_operands(fc_params, router_params, temperature):
    f32, bf16 = jnp.float32, jnp.bfloat16
    ops = []

    def fc_wt(l):
        W, b = fc_params[l]
        Wt = W.T.astype(f32)
        Wt = Wt.at[:, 0].set(0.0)    # output idx 0 is never written (reference filter)
        Wt = Wt.at[0, :].set(0.0)    # input idx 0 dropped from input-group 0
        be = b.astype(f32).at[0].set(0.0)
        return Wt, be

    # ---- layer 1: 4 contiguous 196-pixel regions (pure reshape, no gather) ----
    Wt, be = fc_wt(0)
    Wr, br = router_params[0]
    ops += [Wt.reshape(4, 196, 512).astype(bf16),
            be[None, :],
            (Wr.T.astype(f32) / temperature).reshape(4, 196, 8).astype(bf16),
            (br.astype(f32) / temperature)[None, :]]

    # ---- layer 2: real-K per-group slabs (256 rows), router rows split per group ----
    Wt, be = fc_wt(1)
    Wr, br = router_params[1]
    wrt = Wr.T.astype(f32) / temperature
    ops += [jnp.stack([Wt[:256], Wt[256:]]).astype(bf16),
            be[None, :],
            jnp.stack([wrt[:256], wrt[256:]]).astype(bf16),
            (br.astype(f32) / temperature)[None, :]]

    # ---- layer 3: real-K per-group slabs (128 rows), out-group mask at 64 ----
    Wt, be = fc_wt(2)
    Wr, br = router_params[2]
    wrt = Wr.T.astype(f32) / temperature
    m3 = jnp.zeros((2, 128), f32).at[0, 0:64].set(1.0).at[1, 64:128].set(1.0)
    ops += [jnp.stack([Wt[:128], Wt[128:]]).astype(bf16),
            be[None, :],
            jnp.stack([wrt[:128], wrt[128:]]).astype(bf16),
            (br.astype(f32) / temperature)[None, :],
            m3]

    # ---- layers 4-6: merged 128-wide blocks per input group + folded router block ----
    for l in range(3, N_LAYERS):
        Wt, be = fc_wt(l)
        Wr, br = router_params[l]
        d_in, d_out = FC_DIMS[l], FC_DIMS[l + 1]
        I, J = LAYER_CONFIGS[l]
        gin = d_in // I
        blocks, biases = [], []
        for i in range(I):
            blk = jnp.zeros((128, 128), f32)
            blk = blk.at[i * gin:(i + 1) * gin, :d_out].set(Wt[i * gin:(i + 1) * gin, :])
            blocks.append(blk)
            biases.append(jnp.pad(be, (0, 128 - d_out)))
        n_r = Wr.shape[0]
        rblk = jnp.zeros((128, 128), f32).at[:d_in, :n_r].set(Wr.T.astype(f32) / temperature)
        blocks.append(rblk)
        biases.append(jnp.pad(br.astype(f32) / temperature, (0, 128 - n_r)))
        mask = jnp.zeros((J, 128), f32)
        for j, (s, e) in enumerate(_group_bounds(d_out, J)):
            mask = mask.at[j, s:e].set(1.0)
        ops += [jnp.concatenate(blocks, axis=1).astype(bf16),     # (128, I*128+128)
                jnp.concatenate(biases)[None, :],                  # (1,  I*128+128)
                mask]                                              # (J, 128)
    return ops


def layerwise_pathway_forward(x, fc_params, router_params, temperature=TEMPERATURE):
    B = x.shape[0]
    x_flat = x.reshape(B, -1).astype(jnp.float32)
    assert x_flat.shape[1] == FC_DIMS[0]

    # Batch tile: >=16 rows (bf16 sublane packing), <=256; medium batches are
    # split into >=2 tiles so the "parallel" grid axis feeds both TCs on v7x.
    if B <= 16:
        TB = 16
    elif B <= 512:
        TB = max(16, _round_up((B + 1) // 2, 16))
    else:
        TB = 256
    B_pad = _round_up(B, TB)
    n_tiles = B_pad // TB
    xp = jnp.pad(x_flat, ((0, B_pad - B), (0, 0)))

    reg = FC_DIMS[0] // 4                                            # 196 pixels per region
    x_reg = jnp.transpose(xp.reshape(B_pad, 4, reg), (1, 0, 2))      # (4, B_pad, 196) f32

    ops = _prepare_operands(fc_params, router_params, temperature)

    def _const_map(nd):
        return lambda t: (0,) * nd

    in_specs = [pl.BlockSpec((4, TB, reg), lambda t: (0, t, 0))]
    in_specs += [pl.BlockSpec(a.shape, _const_map(a.ndim)) for a in ops]

    out = pl.pallas_call(
        _layerwise_pathway_kernel,
        grid=(n_tiles,),
        in_specs=in_specs,
        out_specs=pl.BlockSpec((TB, OUT_PAD), lambda t: (t, 0)),
        out_shape=jax.ShapeDtypeStruct((B_pad, OUT_PAD), jnp.float32),
        compiler_params=pltpu.CompilerParams(
            dimension_semantics=("parallel",),
            vmem_limit_bytes=48 * 1024 * 1024),
    )(x_reg, *ops)
    return out[:B, :FC_DIMS[-1]]


# ----------------------- pure-JAX reference (module semantics) ----------------
def reference_forward(x, fc_params, router_params, temperature=TEMPERATURE):
    hp = jax.lax.Precision.HIGHEST
    B = x.shape[0]
    cur = x.reshape(B, -1).astype(jnp.float32)
    for l in range(N_LAYERS):
        W, b = fc_params[l]
        Wr, br = router_params[l]
        d_in, d_out = FC_DIMS[l], FC_DIMS[l + 1]
        I, J = LAYER_CONFIGS[l]
        scores = jnp.dot(cur, Wr.T, precision=hp) + br
        pw = jax.nn.softmax(scores / temperature, axis=-1)
        out = jnp.zeros((B, d_out), jnp.float32)
        in_b, out_b = _group_bounds(d_in, I), _group_bounds(d_out, J)
        for i in range(I):
            in_idx = jnp.array([p for p in range(*in_b[i]) if p > 0])
            for j in range(J):
                out_idx = jnp.array([p for p in range(*out_b[j]) if p > 0])
                w = pw[:, i * J + j][:, None]
                po = jnp.dot(cur[:, in_idx], W[out_idx][:, in_idx].T, precision=hp) + b[out_idx]
                out = out.at[:, out_idx].add(po * w)
        cur = jax.nn.gelu(out, approximate=False) if l < N_LAYERS - 1 else out
    return cur


# ---------------------------------- demo --------------------------------------
def _init_linear(key, fan_in, fan_out):
    kw, kb = jax.random.split(key)
    bound = 1.0 / float(fan_in) ** 0.5
    W = jax.random.uniform(kw, (fan_out, fan_in), jnp.float32, -bound, bound)
    b = jax.random.uniform(kb, (fan_out,), jnp.float32, -bound, bound)
    return W, b


# TODO(synk): training-only bookkeeping (record_activations, pathway_activations
# dict, true_labels) is not implemented; it does not affect the returned tensor.
# The reference's `weights.sum() < 1e-6` pathway skip is replaced by
# unconditional evaluation (zero routing weight => zero contribution).

if __name__ == "__main__":
    key = jax.random.PRNGKey(0)
    k_x, k_p = jax.random.split(key)
    keys = jax.random.split(k_p, 2 * N_LAYERS)

    fc_params = [_init_linear(keys[l], FC_DIMS[l], FC_DIMS[l + 1]) for l in range(N_LAYERS)]
    router_params = [_init_linear(keys[N_LAYERS + l], FC_DIMS[l], ROUTER_OUT[l])
                     for l in range(N_LAYERS)]

    batch = 2
    x = jax.random.normal(k_x, (batch, 1, 28, 28), jnp.float32)    # NCHW like torch

    out = layerwise_pathway_forward(x, fc_params, router_params)
    out = jax.block_until_ready(out)

    assert out.shape == (batch, FC_DIMS[-1]) and out.dtype == jnp.float32
    assert bool(jnp.all(jnp.isfinite(out)))
    assert bool(jnp.all(out[:, 0] == 0.0))          # output idx 0 never written (reference filter)

    ref = reference_forward(x, fc_params, router_params)
    err = float(jnp.max(jnp.abs(out - ref)))
    assert err < 3e-2, f"max abs err {err}"

    print("KERNEL_OK")
</pallas_src>

<mosaic_0001>
module attributes {stable_mosaic.version = 11 : i64} {
  func.func @_layerwise_pathway_kernel(%arg0: i32, %arg1: memref<4x16x196xf32, #tpu.memory_space<vmem>>, %arg2: memref<4x196x512xbf16, #tpu.memory_space<vmem>>, %arg3: memref<1x512xf32, #tpu.memory_space<vmem>>, %arg4: memref<4x196x8xbf16, #tpu.memory_space<vmem>>, %arg5: memref<1x8xf32, #tpu.memory_space<vmem>>, %arg6: memref<2x256x256xbf16, #tpu.memory_space<vmem>>, %arg7: memref<1x256xf32, #tpu.memory_space<vmem>>, %arg8: memref<2x256x4xbf16, #tpu.memory_space<vmem>>, %arg9: memref<1x4xf32, #tpu.memory_space<vmem>>, %arg10: memref<2x128x128xbf16, #tpu.memory_space<vmem>>, %arg11: memref<1x128xf32, #tpu.memory_space<vmem>>, %arg12: memref<2x128x4xbf16, #tpu.memory_space<vmem>>, %arg13: memref<1x4xf32, #tpu.memory_space<vmem>>, %arg14: memref<2x128xf32, #tpu.memory_space<vmem>>, %arg15: memref<128x384xbf16, #tpu.memory_space<vmem>>, %arg16: memref<1x384xf32, #tpu.memory_space<vmem>>, %arg17: memref<2x128xf32, #tpu.memory_space<vmem>>, %arg18: memref<128x384xbf16, #tpu.memory_space<vmem>>, %arg19: memref<1x384xf32, #tpu.memory_space<vmem>>, %arg20: memref<2x128xf32, #tpu.memory_space<vmem>>, %arg21: memref<128x384xbf16, #tpu.memory_space<vmem>>, %arg22: memref<1x384xf32, #tpu.memory_space<vmem>>, %arg23: memref<4x128xf32, #tpu.memory_space<vmem>>, %arg24: memref<16x128xf32, #tpu.memory_space<vmem>>) attributes {dimension_semantics = [#tpu.dimension_semantics<parallel>], iteration_bounds = array<i64: 1>, scalar_prefetch = 0 : i64, scratch_operands = 0 : i64, tpu.core_type = #tpu.core_type<tc>, window_params = [{transform_indices = @transform_0, window_bounds = array<i64: 4, 16, 196>}, {pipeline_mode = #tpu.pipeline_mode<synchronous>, transform_indices = @transform_1, window_bounds = array<i64: 4, 196, 512>}, {pipeline_mode = #tpu.pipeline_mode<synchronous>, transform_indices = @transform_2, window_bounds = array<i64: 1, 512>}, {pipeline_mode = #tpu.pipeline_mode<synchronous>, transform_indices = @transform_3, window_bounds = array<i64: 4, 196, 8>}, {pipeline_mode = #tpu.pipeline_mode<synchronous>, transform_indices = @transform_4, window_bounds = array<i64: 1, 8>}, {pipeline_mode = #tpu.pipeline_mode<synchronous>, transform_indices = @transform_5, window_bounds = array<i64: 2, 256, 256>}, {pipeline_mode = #tpu.pipeline_mode<synchronous>, transform_indices = @transform_6, window_bounds = array<i64: 1, 256>}, {pipeline_mode = #tpu.pipeline_mode<synchronous>, transform_indices = @transform_7, window_bounds = array<i64: 2, 256, 4>}, {pipeline_mode = #tpu.pipeline_mode<synchronous>, transform_indices = @transform_8, window_bounds = array<i64: 1, 4>}, {pipeline_mode = #tpu.pipeline_mode<synchronous>, transform_indices = @transform_9, window_bounds = array<i64: 2, 128, 128>}, {pipeline_mode = #tpu.pipeline_mode<synchronous>, transform_indices = @transform_10, window_bounds = array<i64: 1, 128>}, {pipeline_mode = #tpu.pipeline_mode<synchronous>, transform_indices = @transform_11, window_bounds = array<i64: 2, 128, 4>}, {pipeline_mode = #tpu.pipeline_mode<synchronous>, transform_indices = @transform_12, window_bounds = array<i64: 1, 4>}, {pipeline_mode = #tpu.pipeline_mode<synchronous>, transform_indices = @transform_13, window_bounds = array<i64: 2, 128>}, {pipeline_mode = #tpu.pipeline_mode<synchronous>, transform_indices = @transform_14, window_bounds = array<i64: 128, 384>}, {pipeline_mode = #tpu.pipeline_mode<synchronous>, transform_indices = @transform_15, window_bounds = array<i64: 1, 384>}, {pipeline_mode = #tpu.pipeline_mode<synchronous>, transform_indices = @transform_16, window_bounds = array<i64: 2, 128>}, {pipeline_mode = #tpu.pipeline_mode<synchronous>, transform_indices = @transform_17, window_bounds = array<i64: 128, 384>}, {pipeline_mode = #tpu.pipeline_mode<synchronous>, transform_indices = @transform_18, window_bounds = array<i64: 1, 384>}, {pipeline_mode = #tpu.pipeline_mode<synchronous>, transform_indices = @transform_19, window_bounds = array<i64: 2, 128>}, {pipeline_mode = #tpu.pipeline_mode<synchronous>, transform_indices = @transform_20, window_bounds = array<i64: 128, 384>}, {pipeline_mode = #tpu.pipeline_mode<synchronous>, transform_indices = @transform_21, window_bounds = array<i64: 1, 384>}, {pipeline_mode = #tpu.pipeline_mode<synchronous>, transform_indices = @transform_22, window_bounds = array<i64: 4, 128>}, {transform_indices = @transform_23, window_bounds = array<i64: 16, 128>}]} {
    %c0 = arith.constant 0 : index
    %c0_0 = arith.constant 0 : index
    %c0_1 = arith.constant 0 : index
    %0 = vector.load %arg1[%c0, %c0_0, %c0_1] : memref<4x16x196xf32, #tpu.memory_space<vmem>>, vector<1x16x196xf32>
    %1 = vector.shape_cast %0 : vector<1x16x196xf32> to vector<16x196xf32>
    %2 = arith.truncf %1 : vector<16x196xf32> to vector<16x196xbf16>
    %c1 = arith.constant 1 : index
    %c0_2 = arith.constant 0 : index
    %c0_3 = arith.constant 0 : index
    %3 = vector.load %arg1[%c1, %c0_2, %c0_3] : memref<4x16x196xf32, #tpu.memory_space<vmem>>, vector<1x16x196xf32>
    %4 = vector.shape_cast %3 : vector<1x16x196xf32> to vector<16x196xf32>
    %5 = arith.truncf %4 : vector<16x196xf32> to vector<16x196xbf16>
    %c2 = arith.constant 2 : index
    %c0_4 = arith.constant 0 : index
    %c0_5 = arith.constant 0 : index
    %6 = vector.load %arg1[%c2, %c0_4, %c0_5] : memref<4x16x196xf32, #tpu.memory_space<vmem>>, vector<1x16x196xf32>
    %7 = vector.shape_cast %6 : vector<1x16x196xf32> to vector<16x196xf32>
    %8 = arith.truncf %7 : vector<16x196xf32> to vector<16x196xbf16>
    %c3 = arith.constant 3 : index
    %c0_6 = arith.constant 0 : index
    %c0_7 = arith.constant 0 : index
    %9 = vector.load %arg1[%c3, %c0_6, %c0_7] : memref<4x16x196xf32, #tpu.memory_space<vmem>>, vector<1x16x196xf32>
    %10 = vector.shape_cast %9 : vector<1x16x196xf32> to vector<16x196xf32>
    %11 = arith.truncf %10 : vector<16x196xf32> to vector<16x196xbf16>
    %c0_8 = arith.constant 0 : index
    %c0_9 = arith.constant 0 : index
    %c0_10 = arith.constant 0 : index
    %12 = vector.load %arg4[%c0_8, %c0_9, %c0_10] : memref<4x196x8xbf16, #tpu.memory_space<vmem>>, vector<1x196x8xbf16>
    %13 = vector.shape_cast %12 : vector<1x196x8xbf16> to vector<196x8xbf16>
    %cst = arith.constant dense<0.000000e+00> : vector<16x8xf32>
    %14 = tpu.matmul %2, %13, %cst {dimension_numbers = #tpu.dot_dimension_numbers<[1], [0], [0], [1], [0, 0, 1, 1], [], []>} : vector<16x196xbf16>, vector<196x8xbf16>, vector<16x8xf32> -> vector<16x8xf32>
    %c1_11 = arith.constant 1 : index
    %c0_12 = arith.constant 0 : index
    %c0_13 = arith.constant 0 : index
    %15 = vector.load %arg4[%c1_11, %c0_12, %c0_13] : memref<4x196x8xbf16, #tpu.memory_space<vmem>>, vector<1x196x8xbf16>
    %16 = vector.shape_cast %15 : vector<1x196x8xbf16> to vector<196x8xbf16>
    %cst_14 = arith.constant dense<0.000000e+00> : vector<16x8xf32>
    %17 = tpu.matmul %5, %16, %cst_14 {dimension_numbers = #tpu.dot_dimension_numbers<[1], [0], [0], [1], [0, 0, 1, 1], [], []>} : vector<16x196xbf16>, vector<196x8xbf16>, vector<16x8xf32> -> vector<16x8xf32>
    %18 = arith.addf %14, %17 : vector<16x8xf32>
    %c2_15 = arith.constant 2 : index
    %c0_16 = arith.constant 0 : index
    %c0_17 = arith.constant 0 : index
    %19 = vector.load %arg4[%c2_15, %c0_16, %c0_17] : memref<4x196x8xbf16, #tpu.memory_space<vmem>>, vector<1x196x8xbf16>
    %20 = vector.shape_cast %19 : vector<1x196x8xbf16> to vector<196x8xbf16>
    %cst_18 = arith.constant dense<0.000000e+00> : vector<16x8xf32>
    %21 = tpu.matmul %8, %20, %cst_18 {dimension_numbers = #tpu.dot_dimension_numbers<[1], [0], [0], [1], [0, 0, 1, 1], [], []>} : vector<16x196xbf16>, vector<196x8xbf16>, vector<16x8xf32> -> vector<16x8xf32>
    %22 = arith.addf %18, %21 : vector<16x8xf32>
    %c3_19 = arith.constant 3 : index
    %c0_20 = arith.constant 0 : index
    %c0_21 = arith.constant 0 : index
    %23 = vector.load %arg4[%c3_19, %c0_20, %c0_21] : memref<4x196x8xbf16, #tpu.memory_space<vmem>>, vector<1x196x8xbf16>
    %24 = vector.shape_cast %23 : vector<1x196x8xbf16> to vector<196x8xbf16>
    %cst_22 = arith.constant dense<0.000000e+00> : vector<16x8xf32>
    %25 = tpu.matmul %11, %24, %cst_22 {dimension_numbers = #tpu.dot_dimension_numbers<[1], [0], [0], [1], [0, 0, 1, 1], [], []>} : vector<16x196xbf16>, vector<196x8xbf16>, vector<16x8xf32> -> vector<16x8xf32>
    %26 = arith.addf %22, %25 : vector<16x8xf32>
    %c0_23 = arith.constant 0 : index
    %c0_24 = arith.constant 0 : index
    %27 = vector.load %arg5[%c0_23, %c0_24] : memref<1x8xf32, #tpu.memory_space<vmem>>, vector<1x8xf32>
    %28 = vector.broadcast %27 : vector<1x8xf32> to vector<16x8xf32>
    %29 = arith.addf %26, %28 : vector<16x8xf32>
    %cst_25 = arith.constant dense<0xFF800000> : vector<16xf32>
    %30 = vector.multi_reduction <maximumf>, %29, %cst_25 [1] : vector<16x8xf32> to vector<16xf32>
    %31 = vector.shape_cast %30 : vector<16xf32> to vector<16x1xf32>
    %32 = vector.broadcast %31 : vector<16x1xf32> to vector<16x8xf32>
    %33 = arith.subf %29, %32 : vector<16x8xf32>
    %34 = math.exp %33 : vector<16x8xf32>
    %cst_26 = arith.constant dense<0.000000e+00> : vector<16xf32>
    %35 = vector.multi_reduction <add>, %34, %cst_26 [1] : vector<16x8xf32> to vector<16xf32>
    %36 = vector.shape_cast %35 : vector<16xf32> to vector<16x1xf32>
    %37 = vector.broadcast %36 : vector<16x1xf32> to vector<16x8xf32>
    %38 = arith.divf %34, %37 : vector<16x8xf32>
    %c0_27 = arith.constant 0 : index
    %c0_28 = arith.constant 0 : index
    %39 = vector.load %arg3[%c0_27, %c0_28] : memref<1x512xf32, #tpu.memory_space<vmem>>, vector<1x512xf32>
    %c0_29 = arith.constant 0 : index
    %c0_30 = arith.constant 0 : index
    %c0_31 = arith.constant 0 : index
    %40 = vector.load %arg2[%c0_29, %c0_30, %c0_31] : memref<4x196x512xbf16, #tpu.memory_space<vmem>>, vector<1x196x512xbf16>
    %41 = vector.shape_cast %40 : vector<1x196x512xbf16> to vector<196x512xbf16>
    %cst_32 = arith.constant dense<0.000000e+00> : vector<16x512xf32>
    %42 = tpu.matmul %2, %41, %cst_32 {dimension_numbers = #tpu.dot_dimension_numbers<[1], [0], [0], [1], [0, 0, 1, 1], [], []>} : vector<16x196xbf16>, vector<196x512xbf16>, vector<16x512xf32> -> vector<16x512xf32>
    %43 = vector.broadcast %39 : vector<1x512xf32> to vector<16x512xf32>
    %44 = arith.addf %42, %43 : vector<16x512xf32>
    %45 = vector.extract_strided_slice %44 {offsets = [0, 0], sizes = [16, 256], strides = [1, 1]} : vector<16x512xf32> to vector<16x256xf32>
    %46 = vector.extract_strided_slice %38 {offsets = [0, 0], sizes = [16, 1], strides = [1, 1]} : vector<16x8xf32> to vector<16x1xf32>
    %47 = vector.broadcast %46 : vector<16x1xf32> to vector<16x256xf32>
    %48 = arith.mulf %45, %47 : vector<16x256xf32>
    %49 = vector.extract_strided_slice %44 {offsets = [0, 256], sizes = [16, 256], strides = [1, 1]} : vector<16x512xf32> to vector<16x256xf32>
    %50 = vector.extract_strided_slice %38 {offsets = [0, 1], sizes = [16, 1], strides = [1, 1]} : vector<16x8xf32> to vector<16x1xf32>
    %51 = vector.broadcast %50 : vector<16x1xf32> to vector<16x256xf32>
    %52 = arith.mulf %49, %51 : vector<16x256xf32>
    %c1_33 = arith.constant 1 : index
    %c0_34 = arith.constant 0 : index
    %c0_35 = arith.constant 0 : index
    %53 = vector.load %arg2[%c1_33, %c0_34, %c0_35] : memref<4x196x512xbf16, #tpu.memory_space<vmem>>, vector<1x196x512xbf16>
    %54 = vector.shape_cast %53 : vector<1x196x512xbf16> to vector<196x512xbf16>
    %cst_36 = arith.constant dense<0.000000e+00> : vector<16x512xf32>
    %55 = tpu.matmul %5, %54, %cst_36 {dimension_numbers = #tpu.dot_dimension_numbers<[1], [0], [0], [1], [0, 0, 1, 1], [], []>} : vector<16x196xbf16>, vector<196x512xbf16>, vector<16x512xf32> -> vector<16x512xf32>
    %56 = vector.broadcast %39 : vector<1x512xf32> to vector<16x512xf32>
    %57 = arith.addf %55, %56 : vector<16x512xf32>
    %58 = vector.extract_strided_slice %57 {offsets = [0, 0], sizes = [16, 256], strides = [1, 1]} : vector<16x512xf32> to vector<16x256xf32>
    %59 = vector.extract_strided_slice %38 {offsets = [0, 2], sizes = [16, 1], strides = [1, 1]} : vector<16x8xf32> to vector<16x1xf32>
    %60 = vector.broadcast %59 : vector<16x1xf32> to vector<16x256xf32>
    %61 = arith.mulf %58, %60 : vector<16x256xf32>
    %62 = vector.extract_strided_slice %57 {offsets = [0, 256], sizes = [16, 256], strides = [1, 1]} : vector<16x512xf32> to vector<16x256xf32>
    %63 = vector.extract_strided_slice %38 {offsets = [0, 3], sizes = [16, 1], strides = [1, 1]} : vector<16x8xf32> to vector<16x1xf32>
    %64 = vector.broadcast %63 : vector<16x1xf32> to vector<16x256xf32>
    %65 = arith.mulf %62, %64 : vector<16x256xf32>
    %66 = arith.addf %48, %61 : vector<16x256xf32>
    %67 = arith.addf %52, %65 : vector<16x256xf32>
    %c2_37 = arith.constant 2 : index
    %c0_38 = arith.constant 0 : index
    %c0_39 = arith.constant 0 : index
    %68 = vector.load %arg2[%c2_37, %c0_38, %c0_39] : memref<4x196x512xbf16, #tpu.memory_space<vmem>>, vector<1x196x512xbf16>
    %69 = vector.shape_cast %68 : vector<1x196x512xbf16> to vector<196x512xbf16>
    %cst_40 = arith.constant dense<0.000000e+00> : vector<16x512xf32>
    %70 = tpu.matmul %8, %69, %cst_40 {dimension_numbers = #tpu.dot_dimension_numbers<[1], [0], [0], [1], [0, 0, 1, 1], [], []>} : vector<16x196xbf16>, vector<196x512xbf16>, vector<16x512xf32> -> vector<16x512xf32>
    %71 = vector.broadcast %39 : vector<1x512xf32> to vector<16x512xf32>
    %72 = arith.addf %70, %71 : vector<16x512xf32>
    %73 = vector.extract_strided_slice %72 {offsets = [0, 0], sizes = [16, 256], strides = [1, 1]} : vector<16x512xf32> to vector<16x256xf32>
    %74 = vector.extract_strided_slice %38 {offsets = [0, 4], sizes = [16, 1], strides = [1, 1]} : vector<16x8xf32> to vector<16x1xf32>
    %75 = vector.broadcast %74 : vector<16x1xf32> to vector<16x256xf32>
    %76 = arith.mulf %73, %75 : vector<16x256xf32>
    %77 = vector.extract_strided_slice %72 {offsets = [0, 256], sizes = [16, 256], strides = [1, 1]} : vector<16x512xf32> to vector<16x256xf32>
    %78 = vector.extract_strided_slice %38 {offsets = [0, 5], sizes = [16, 1], strides = [1, 1]} : vector<16x8xf32> to vector<16x1xf32>
    %79 = vector.broadcast %78 : vector<16x1xf32> to vector<16x256xf32>
    %80 = arith.mulf %77, %79 : vector<16x256xf32>
    %81 = arith.addf %66, %76 : vector<16x256xf32>
    %82 = arith.addf %67, %80 : vector<16x256xf32>
    %c3_41 = arith.constant 3 : index
    %c0_42 = arith.constant 0 : index
    %c0_43 = arith.constant 0 : index
    %83 = vector.load %arg2[%c3_41, %c0_42, %c0_43] : memref<4x196x512xbf16, #tpu.memory_space<vmem>>, vector<1x196x512xbf16>
    %84 = vector.shape_cast %83 : vector<1x196x512xbf16> to vector<196x512xbf16>
    %cst_44 = arith.constant dense<0.000000e+00> : vector<16x512xf32>
    %85 = tpu.matmul %11, %84, %cst_44 {dimension_numbers = #tpu.dot_dimension_numbers<[1], [0], [0], [1], [0, 0, 1, 1], [], []>} : vector<16x196xbf16>, vector<196x512xbf16>, vector<16x512xf32> -> vector<16x512xf32>
    %86 = vector.broadcast %39 : vector<1x512xf32> to vector<16x512xf32>
    %87 = arith.addf %85, %86 : vector<16x512xf32>
    %88 = vector.extract_strided_slice %87 {offsets = [0, 0], sizes = [16, 256], strides = [1, 1]} : vector<16x512xf32> to vector<16x256xf32>
    %89 = vector.extract_strided_slice %38 {offsets = [0, 6], sizes = [16, 1], strides = [1, 1]} : vector<16x8xf32> to vector<16x1xf32>
    %90 = vector.broadcast %89 : vector<16x1xf32> to vector<16x256xf32>
    %91 = arith.mulf %88, %90 : vector<16x256xf32>
    %92 = vector.extract_strided_slice %87 {offsets = [0, 256], sizes = [16, 256], strides = [1, 1]} : vector<16x512xf32> to vector<16x256xf32>
    %93 = vector.extract_strided_slice %38 {offsets = [0, 7], sizes = [16, 1], strides = [1, 1]} : vector<16x8xf32> to vector<16x1xf32>
    %94 = vector.broadcast %93 : vector<16x1xf32> to vector<16x256xf32>
    %95 = arith.mulf %92, %94 : vector<16x256xf32>
    %96 = arith.addf %81, %91 : vector<16x256xf32>
    %97 = arith.addf %82, %95 : vector<16x256xf32>
    %cst_45 = arith.constant 5.000000e-01 : f32
    %98 = vector.broadcast %cst_45 : f32 to vector<16x256xf32>
    %99 = arith.mulf %98, %96 : vector<16x256xf32>
    %cst_46 = arith.constant 0.707106769 : f32
    %100 = vector.broadcast %cst_46 : f32 to vector<16x256xf32>
    %101 = arith.mulf %96, %100 : vector<16x256xf32>
    %102 = math.erf %101 : vector<16x256xf32>
    %cst_47 = arith.constant 1.000000e+00 : f32
    %103 = vector.broadcast %cst_47 : f32 to vector<16x256xf32>
    %104 = arith.addf %103, %102 : vector<16x256xf32>
    %105 = arith.mulf %99, %104 : vector<16x256xf32>
    %106 = arith.truncf %105 : vector<16x256xf32> to vector<16x256xbf16>
    %cst_48 = arith.constant 5.000000e-01 : f32
    %107 = vector.broadcast %cst_48 : f32 to vector<16x256xf32>
    %108 = arith.mulf %107, %97 : vector<16x256xf32>
    %cst_49 = arith.constant 0.707106769 : f32
    %109 = vector.broadcast %cst_49 : f32 to vector<16x256xf32>
    %110 = arith.mulf %97, %109 : vector<16x256xf32>
    %111 = math.erf %110 : vector<16x256xf32>
    %cst_50 = arith.constant 1.000000e+00 : f32
    %112 = vector.broadcast %cst_50 : f32 to vector<16x256xf32>
    %113 = arith.addf %112, %111 : vector<16x256xf32>
    %114 = arith.mulf %108, %113 : vector<16x256xf32>
    %115 = arith.truncf %114 : vector<16x256xf32> to vector<16x256xbf16>
    %c0_51 = arith.constant 0 : index
    %c0_52 = arith.constant 0 : index
    %c0_53 = arith.constant 0 : index
    %116 = vector.load %arg8[%c0_51, %c0_52, %c0_53] : memref<2x256x4xbf16, #tpu.memory_space<vmem>>, vector<1x256x4xbf16>
    %117 = vector.shape_cast %116 : vector<1x256x4xbf16> to vector<256x4xbf16>
    %cst_54 = arith.constant dense<0.000000e+00> : vector<16x4xf32>
    %118 = tpu.matmul %106, %117, %cst_54 {dimension_numbers = #tpu.dot_dimension_numbers<[1], [0], [0], [1], [0, 0, 1, 1], [], []>} : vector<16x256xbf16>, vector<256x4xbf16>, vector<16x4xf32> -> vector<16x4xf32>
    %c1_55 = arith.constant 1 : index
    %c0_56 = arith.constant 0 : index
    %c0_57 = arith.constant 0 : index
    %119 = vector.load %arg8[%c1_55, %c0_56, %c0_57] : memref<2x256x4xbf16, #tpu.memory_space<vmem>>, vector<1x256x4xbf16>
    %120 = vector.shape_cast %119 : vector<1x256x4xbf16> to vector<256x4xbf16>
    %cst_58 = arith.constant dense<0.000000e+00> : vector<16x4xf32>
    %121 = tpu.matmul %115, %120, %cst_58 {dimension_numbers = #tpu.dot_dimension_numbers<[1], [0], [0], [1], [0, 0, 1, 1], [], []>} : vector<16x256xbf16>, vector<256x4xbf16>, vector<16x4xf32> -> vector<16x4xf32>
    %122 = arith.addf %118, %121 : vector<16x4xf32>
    %c0_59 = arith.constant 0 : index
    %c0_60 = arith.constant 0 : index
    %123 = vector.load %arg9[%c0_59, %c0_60] : memref<1x4xf32, #tpu.memory_space<vmem>>, vector<1x4xf32>
    %124 = vector.broadcast %123 : vector<1x4xf32> to vector<16x4xf32>
    %125 = arith.addf %122, %124 : vector<16x4xf32>
    %cst_61 = arith.constant dense<0xFF800000> : vector<16xf32>
    %126 = vector.multi_reduction <maximumf>, %125, %cst_61 [1] : vector<16x4xf32> to vector<16xf32>
    %127 = vector.shape_cast %126 : vector<16xf32> to vector<16x1xf32>
    %128 = vector.broadcast %127 : vector<16x1xf32> to vector<16x4xf32>
    %129 = arith.subf %125, %128 : vector<16x4xf32>
    %130 = math.exp %129 : vector<16x4xf32>
    %cst_62 = arith.constant dense<0.000000e+00> : vector<16xf32>
    %131 = vector.multi_reduction <add>, %130, %cst_62 [1] : vector<16x4xf32> to vector<16xf32>
    %132 = vector.shape_cast %131 : vector<16xf32> to vector<16x1xf32>
    %133 = vector.broadcast %132 : vector<16x1xf32> to vector<16x4xf32>
    %134 = arith.divf %130, %133 : vector<16x4xf32>
    %c0_63 = arith.constant 0 : index
    %c0_64 = arith.constant 0 : index
    %135 = vector.load %arg7[%c0_63, %c0_64] : memref<1x256xf32, #tpu.memory_space<vmem>>, vector<1x256xf32>
    %c0_65 = arith.constant 0 : index
    %c0_66 = arith.constant 0 : index
    %c0_67 = arith.constant 0 : index
    %136 = vector.load %arg6[%c0_65, %c0_66, %c0_67] : memref<2x256x256xbf16, #tpu.memory_space<vmem>>, vector<1x256x256xbf16>
    %137 = vector.shape_cast %136 : vector<1x256x256xbf16> to vector<256x256xbf16>
    %cst_68 = arith.constant dense<0.000000e+00> : vector<16x256xf32>
    %138 = tpu.matmul %106, %137, %cst_68 {dimension_numbers = #tpu.dot_dimension_numbers<[1], [0], [0], [1], [0, 0, 1, 1], [], []>} : vector<16x256xbf16>, vector<256x256xbf16>, vector<16x256xf32> -> vector<16x256xf32>
    %139 = vector.broadcast %135 : vector<1x256xf32> to vector<16x256xf32>
    %140 = arith.addf %138, %139 : vector<16x256xf32>
    %141 = vector.extract_strided_slice %140 {offsets = [0, 0], sizes = [16, 128], strides = [1, 1]} : vector<16x256xf32> to vector<16x128xf32>
    %142 = vector.extract_strided_slice %134 {offsets = [0, 0], sizes = [16, 1], strides = [1, 1]} : vector<16x4xf32> to vector<16x1xf32>
    %143 = vector.broadcast %142 : vector<16x1xf32> to vector<16x128xf32>
    %144 = arith.mulf %141, %143 : vector<16x128xf32>
    %145 = vector.extract_strided_slice %140 {offsets = [0, 128], sizes = [16, 128], strides = [1, 1]} : vector<16x256xf32> to vector<16x128xf32>
    %146 = vector.extract_strided_slice %134 {offsets = [0, 1], sizes = [16, 1], strides = [1, 1]} : vector<16x4xf32> to vector<16x1xf32>
    %147 = vector.broadcast %146 : vector<16x1xf32> to vector<16x128xf32>
    %148 = arith.mulf %145, %147 : vector<16x128xf32>
    %c1_69 = arith.constant 1 : index
    %c0_70 = arith.constant 0 : index
    %c0_71 = arith.constant 0 : index
    %149 = vector.load %arg6[%c1_69, %c0_70, %c0_71] : memref<2x256x256xbf16, #tpu.memory_space<vmem>>, vector<1x256x256xbf16>
    %150 = vector.shape_cast %149 : vector<1x256x256xbf16> to vector<256x256xbf16>
    %cst_72 = arith.constant dense<0.000000e+00> : vector<16x256xf32>
    %151 = tpu.matmul %115, %150, %cst_72 {dimension_numbers = #tpu.dot_dimension_numbers<[1], [0], [0], [1], [0, 0, 1, 1], [], []>} : vector<16x256xbf16>, vector<256x256xbf16>, vector<16x256xf32> -> vector<16x256xf32>
    %152 = vector.broadcast %135 : vector<1x256xf32> to vector<16x256xf32>
    %153 = arith.addf %151, %152 : vector<16x256xf32>
    %154 = vector.extract_strided_slice %153 {offsets = [0, 0], sizes = [16, 128], strides = [1, 1]} : vector<16x256xf32> to vector<16x128xf32>
    %155 = vector.extract_strided_slice %134 {offsets = [0, 2], sizes = [16, 1], strides = [1, 1]} : vector<16x4xf32> to vector<16x1xf32>
    %156 = vector.broadcast %155 : vector<16x1xf32> to vector<16x128xf32>
    %157 = arith.mulf %154, %156 : vector<16x128xf32>
    %158 = vector.extract_strided_slice %153 {offsets = [0, 128], sizes = [16, 128], strides = [1, 1]} : vector<16x256xf32> to vector<16x128xf32>
    %159 = vector.extract_strided_slice %134 {offsets = [0, 3], sizes = [16, 1], strides = [1, 1]} : vector<16x4xf32> to vector<16x1xf32>
    %160 = vector.broadcast %159 : vector<16x1xf32> to vector<16x128xf32>
    %161 = arith.mulf %158, %160 : vector<16x128xf32>
    %162 = arith.addf %144, %157 : vector<16x128xf32>
    %163 = arith.addf %148, %161 : vector<16x128xf32>
    %cst_73 = arith.constant 5.000000e-01 : f32
    %164 = vector.broadcast %cst_73 : f32 to vector<16x128xf32>
    %165 = arith.mulf %164, %162 : vector<16x128xf32>
    %cst_74 = arith.constant 0.707106769 : f32
    %166 = vector.broadcast %cst_74 : f32 to vector<16x128xf32>
    %167 = arith.mulf %162, %166 : vector<16x128xf32>
    %168 = math.erf %167 : vector<16x128xf32>
    %cst_75 = arith.constant 1.000000e+00 : f32
    %169 = vector.broadcast %cst_75 : f32 to vector<16x128xf32>
    %170 = arith.addf %169, %168 : vector<16x128xf32>
    %171 = arith.mulf %165, %170 : vector<16x128xf32>
    %172 = arith.truncf %171 : vector<16x128xf32> to vector<16x128xbf16>
    %cst_76 = arith.constant 5.000000e-01 : f32
    %173 = vector.broadcast %cst_76 : f32 to vector<16x128xf32>
    %174 = arith.mulf %173, %163 : vector<16x128xf32>
    %cst_77 = arith.constant 0.707106769 : f32
    %175 = vector.broadcast %cst_77 : f32 to vector<16x128xf32>
    %176 = arith.mulf %163, %175 : vector<16x128xf32>
    %177 = math.erf %176 : vector<16x128xf32>
    %cst_78 = arith.constant 1.000000e+00 : f32
    %178 = vector.broadcast %cst_78 : f32 to vector<16x128xf32>
    %179 = arith.addf %178, %177 : vector<16x128xf32>
    %180 = arith.mulf %174, %179 : vector<16x128xf32>
    %181 = arith.truncf %180 : vector<16x128xf32> to vector<16x128xbf16>
    %c0_79 = arith.constant 0 : index
    %c0_80 = arith.constant 0 : index
    %c0_81 = arith.constant 0 : index
    %182 = vector.load %arg12[%c0_79, %c0_80, %c0_81] : memref<2x128x4xbf16, #tpu.memory_space<vmem>>, vector<1x128x4xbf16>
    %183 = vector.shape_cast %182 : vector<1x128x4xbf16> to vector<128x4xbf16>
    %cst_82 = arith.constant dense<0.000000e+00> : vector<16x4xf32>
    %184 = tpu.matmul %172, %183, %cst_82 {dimension_numbers = #tpu.dot_dimension_numbers<[1], [0], [0], [1], [0, 0, 1, 1], [], []>} : vector<16x128xbf16>, vector<128x4xbf16>, vector<16x4xf32> -> vector<16x4xf32>
    %c1_83 = arith.constant 1 : index
    %c0_84 = arith.constant 0 : index
    %c0_85 = arith.constant 0 : index
    %185 = vector.load %arg12[%c1_83, %c0_84, %c0_85] : memref<2x128x4xbf16, #tpu.memory_space<vmem>>, vector<1x128x4xbf16>
    %186 = vector.shape_cast %185 : vector<1x128x4xbf16> to vector<128x4xbf16>
    %cst_86 = arith.constant dense<0.000000e+00> : vector<16x4xf32>
    %187 = tpu.matmul %181, %186, %cst_86 {dimension_numbers = #tpu.dot_dimension_numbers<[1], [0], [0], [1], [0, 0, 1, 1], [], []>} : vector<16x128xbf16>, vector<128x4xbf16>, vector<16x4xf32> -> vector<16x4xf32>
    %188 = arith.addf %184, %187 : vector<16x4xf32>
    %c0_87 = arith.constant 0 : index
    %c0_88 = arith.constant 0 : index
    %189 = vector.load %arg13[%c0_87, %c0_88] : memref<1x4xf32, #tpu.memory_space<vmem>>, vector<1x4xf32>
    %190 = vector.broadcast %189 : vector<1x4xf32> to vector<16x4xf32>
    %191 = arith.addf %188, %190 : vector<16x4xf32>
    %cst_89 = arith.constant dense<0xFF800000> : vector<16xf32>
    %192 = vector.multi_reduction <maximumf>, %191, %cst_89 [1] : vector<16x4xf32> to vector<16xf32>
    %193 = vector.shape_cast %192 : vector<16xf32> to vector<16x1xf32>
    %194 = vector.broadcast %193 : vector<16x1xf32> to vector<16x4xf32>
    %195 = arith.subf %191, %194 : vector<16x4xf32>
    %196 = math.exp %195 : vector<16x4xf32>
    %cst_90 = arith.constant dense<0.000000e+00> : vector<16xf32>
    %197 = vector.multi_reduction <add>, %196, %cst_90 [1] : vector<16x4xf32> to vector<16xf32>
    %198 = vector.shape_cast %197 : vector<16xf32> to vector<16x1xf32>
    %199 = vector.broadcast %198 : vector<16x1xf32> to vector<16x4xf32>
    %200 = arith.divf %196, %199 : vector<16x4xf32>
    %c0_91 = arith.constant 0 : index
    %c0_92 = arith.constant 0 : index
    %201 = vector.load %arg11[%c0_91, %c0_92] : memref<1x128xf32, #tpu.memory_space<vmem>>, vector<1x128xf32>
    %c0_93 = arith.constant 0 : index
    %c0_94 = arith.constant 0 : index
    %202 = vector.load %arg14[%c0_93, %c0_94] : memref<2x128xf32, #tpu.memory_space<vmem>>, vector<2x128xf32>
    %c0_95 = arith.constant 0 : index
    %c0_96 = arith.constant 0 : index
    %c0_97 = arith.constant 0 : index
    %203 = vector.load %arg10[%c0_95, %c0_96, %c0_97] : memref<2x128x128xbf16, #tpu.memory_space<vmem>>, vector<1x128x128xbf16>
    %204 = vector.shape_cast %203 : vector<1x128x128xbf16> to vector<128x128xbf16>
    %cst_98 = arith.constant dense<0.000000e+00> : vector<16x128xf32>
    %205 = tpu.matmul %172, %204, %cst_98 {dimension_numbers = #tpu.dot_dimension_numbers<[1], [0], [0], [1], [0, 0, 1, 1], [], []>} : vector<16x128xbf16>, vector<128x128xbf16>, vector<16x128xf32> -> vector<16x128xf32>
    %206 = vector.broadcast %201 : vector<1x128xf32> to vector<16x128xf32>
    %207 = arith.addf %205, %206 : vector<16x128xf32>
    %208 = vector.extract_strided_slice %202 {offsets = [0, 0], sizes = [1, 128], strides = [1, 1]} : vector<2x128xf32> to vector<1x128xf32>
    %209 = vector.extract_strided_slice %200 {offsets = [0, 0], sizes = [16, 1], strides = [1, 1]} : vector<16x4xf32> to vector<16x1xf32>
    %210 = vector.broadcast %208 : vector<1x128xf32> to vector<16x128xf32>
    %211 = vector.broadcast %209 : vector<16x1xf32> to vector<16x128xf32>
    %212 = arith.mulf %210, %211 : vector<16x128xf32>
    %213 = vector.extract_strided_slice %202 {offsets = [1, 0], sizes = [1, 128], strides = [1, 1]} : vector<2x128xf32> to vector<1x128xf32>
    %214 = vector.extract_strided_slice %200 {offsets = [0, 1], sizes = [16, 1], strides = [1, 1]} : vector<16x4xf32> to vector<16x1xf32>
    %215 = vector.broadcast %213 : vector<1x128xf32> to vector<16x128xf32>
    %216 = vector.broadcast %214 : vector<16x1xf32> to vector<16x128xf32>
    %217 = arith.mulf %215, %216 : vector<16x128xf32>
    %218 = arith.addf %212, %217 : vector<16x128xf32>
    %219 = arith.mulf %207, %218 : vector<16x128xf32>
    %c1_99 = arith.constant 1 : index
    %c0_100 = arith.constant 0 : index
    %c0_101 = arith.constant 0 : index
    %220 = vector.load %arg10[%c1_99, %c0_100, %c0_101] : memref<2x128x128xbf16, #tpu.memory_space<vmem>>, vector<1x128x128xbf16>
    %221 = vector.shape_cast %220 : vector<1x128x128xbf16> to vector<128x128xbf16>
    %cst_102 = arith.constant dense<0.000000e+00> : vector<16x128xf32>
    %222 = tpu.matmul %181, %221, %cst_102 {dimension_numbers = #tpu.dot_dimension_numbers<[1], [0], [0], [1], [0, 0, 1, 1], [], []>} : vector<16x128xbf16>, vector<128x128xbf16>, vector<16x128xf32> -> vector<16x128xf32>
    %223 = vector.broadcast %201 : vector<1x128xf32> to vector<16x128xf32>
    %224 = arith.addf %222, %223 : vector<16x128xf32>
    %225 = vector.extract_strided_slice %202 {offsets = [0, 0], sizes = [1, 128], strides = [1, 1]} : vector<2x128xf32> to vector<1x128xf32>
    %226 = vector.extract_strided_slice %200 {offsets = [0, 2], sizes = [16, 1], strides = [1, 1]} : vector<16x4xf32> to vector<16x1xf32>
    %227 = vector.broadcast %225 : vector<1x128xf32> to vector<16x128xf32>
    %228 = vector.broadcast %226 : vector<16x1xf32> to vector<16x128xf32>
    %229 = arith.mulf %227, %228 : vector<16x128xf32>
    %230 = vector.extract_strided_slice %202 {offsets = [1, 0], sizes = [1, 128], strides = [1, 1]} : vector<2x128xf32> to vector<1x128xf32>
    %231 = vector.extract_strided_slice %200 {offsets = [0, 3], sizes = [16, 1], strides = [1, 1]} : vector<16x4xf32> to vector<16x1xf32>
    %232 = vector.broadcast %230 : vector<1x128xf32> to vector<16x128xf32>
    %233 = vector.broadcast %231 : vector<16x1xf32> to vector<16x128xf32>
    %234 = arith.mulf %232, %233 : vector<16x128xf32>
    %235 = arith.addf %229, %234 : vector<16x128xf32>
    %236 = arith.mulf %224, %235 : vector<16x128xf32>
    %237 = arith.addf %219, %236 : vector<16x128xf32>
    %cst_103 = arith.constant 5.000000e-01 : f32
    %238 = vector.broadcast %cst_103 : f32 to vector<16x128xf32>
    %239 = arith.mulf %238, %237 : vector<16x128xf32>
    %cst_104 = arith.constant 0.707106769 : f32
    %240 = vector.broadcast %cst_104 : f32 to vector<16x128xf32>
    %241 = arith.mulf %237, %240 : vector<16x128xf32>
    %242 = math.erf %241 : vector<16x128xf32>
    %cst_105 = arith.constant 1.000000e+00 : f32
    %243 = vector.broadcast %cst_105 : f32 to vector<16x128xf32>
    %244 = arith.addf %243, %242 : vector<16x128xf32>
    %245 = arith.mulf %239, %244 : vector<16x128xf32>
    %246 = arith.truncf %245 : vector<16x128xf32> to vector<16x128xbf16>
    %c0_106 = arith.constant 0 : index
    %c0_107 = arith.constant 0 : index
    %247 = vector.load %arg15[%c0_106, %c0_107] : memref<128x384xbf16, #tpu.memory_space<vmem>>, vector<128x384xbf16>
    %cst_108 = arith.constant dense<0.000000e+00> : vector<16x384xf32>
    %248 = tpu.matmul %246, %247, %cst_108 {dimension_numbers = #tpu.dot_dimension_numbers<[1], [0], [0], [1], [0, 0, 1, 1], [], []>} : vector<16x128xbf16>, vector<128x384xbf16>, vector<16x384xf32> -> vector<16x384xf32>
    %c0_109 = arith.constant 0 : index
    %c0_110 = arith.constant 0 : index
    %249 = vector.load %arg16[%c0_109, %c0_110] : memref<1x384xf32, #tpu.memory_space<vmem>>, vector<1x384xf32>
    %250 = vector.broadcast %249 : vector<1x384xf32> to vector<16x384xf32>
    %251 = arith.addf %248, %250 : vector<16x384xf32>
    %252 = vector.extract_strided_slice %251 {offsets = [0, 256], sizes = [16, 4], strides = [1, 1]} : vector<16x384xf32> to vector<16x4xf32>
    %cst_111 = arith.constant dense<0xFF800000> : vector<16xf32>
    %253 = vector.multi_reduction <maximumf>, %252, %cst_111 [1] : vector<16x4xf32> to vector<16xf32>
    %254 = vector.shape_cast %253 : vector<16xf32> to vector<16x1xf32>
    %255 = vector.broadcast %254 : vector<16x1xf32> to vector<16x4xf32>
    %256 = arith.subf %252, %255 : vector<16x4xf32>
    %257 = math.exp %256 : vector<16x4xf32>
    %cst_112 = arith.constant dense<0.000000e+00> : vector<16xf32>
    %258 = vector.multi_reduction <add>, %257, %cst_112 [1] : vector<16x4xf32> to vector<16xf32>
    %259 = vector.shape_cast %258 : vector<16xf32> to vector<16x1xf32>
    %260 = vector.broadcast %259 : vector<16x1xf32> to vector<16x4xf32>
    %261 = arith.divf %257, %260 : vector<16x4xf32>
    %c0_113 = arith.constant 0 : index
    %c0_114 = arith.constant 0 : index
    %262 = vector.load %arg17[%c0_113, %c0_114] : memref<2x128xf32, #tpu.memory_space<vmem>>, vector<2x128xf32>
    %263 = vector.extract_strided_slice %262 {offsets = [0, 0], sizes = [1, 128], strides = [1, 1]} : vector<2x128xf32> to vector<1x128xf32>
    %264 = vector.extract_strided_slice %261 {offsets = [0, 0], sizes = [16, 1], strides = [1, 1]} : vector<16x4xf32> to vector<16x1xf32>
    %265 = vector.broadcast %263 : vector<1x128xf32> to vector<16x128xf32>
    %266 = vector.broadcast %264 : vector<16x1xf32> to vector<16x128xf32>
    %267 = arith.mulf %265, %266 : vector<16x128xf32>
    %268 = vector.extract_strided_slice %262 {offsets = [1, 0], sizes = [1, 128], strides = [1, 1]} : vector<2x128xf32> to vector<1x128xf32>
    %269 = vector.extract_strided_slice %261 {offsets = [0, 1], sizes = [16, 1], strides = [1, 1]} : vector<16x4xf32> to vector<16x1xf32>
    %270 = vector.broadcast %268 : vector<1x128xf32> to vector<16x128xf32>
    %271 = vector.broadcast %269 : vector<16x1xf32> to vector<16x128xf32>
    %272 = arith.mulf %270, %271 : vector<16x128xf32>
    %273 = arith.addf %267, %272 : vector<16x128xf32>
    %274 = vector.extract_strided_slice %251 {offsets = [0, 0], sizes = [16, 128], strides = [1, 1]} : vector<16x384xf32> to vector<16x128xf32>
    %275 = arith.mulf %274, %273 : vector<16x128xf32>
    %276 = vector.extract_strided_slice %262 {offsets = [0, 0], sizes = [1, 128], strides = [1, 1]} : vector<2x128xf32> to vector<1x128xf32>
    %277 = vector.extract_strided_slice %261 {offsets = [0, 2], sizes = [16, 1], strides = [1, 1]} : vector<16x4xf32> to vector<16x1xf32>
    %278 = vector.broadcast %276 : vector<1x128xf32> to vector<16x128xf32>
    %279 = vector.broadcast %277 : vector<16x1xf32> to vector<16x128xf32>
    %280 = arith.mulf %278, %279 : vector<16x128xf32>
    %281 = vector.extract_strided_slice %262 {offsets = [1, 0], sizes = [1, 128], strides = [1, 1]} : vector<2x128xf32> to vector<1x128xf32>
    %282 = vector.extract_strided_slice %261 {offsets = [0, 3], sizes = [16, 1], strides = [1, 1]} : vector<16x4xf32> to vector<16x1xf32>
    %283 = vector.broadcast %281 : vector<1x128xf32> to vector<16x128xf32>
    %284 = vector.broadcast %282 : vector<16x1xf32> to vector<16x128xf32>
    %285 = arith.mulf %283, %284 : vector<16x128xf32>
    %286 = arith.addf %280, %285 : vector<16x128xf32>
    %287 = vector.extract_strided_slice %251 {offsets = [0, 128], sizes = [16, 128], strides = [1, 1]} : vector<16x384xf32> to vector<16x128xf32>
    %288 = arith.mulf %287, %286 : vector<16x128xf32>
    %289 = arith.addf %275, %288 : vector<16x128xf32>
    %cst_115 = arith.constant 5.000000e-01 : f32
    %290 = vector.broadcast %cst_115 : f32 to vector<16x128xf32>
    %291 = arith.mulf %290, %289 : vector<16x128xf32>
    %cst_116 = arith.constant 0.707106769 : f32
    %292 = vector.broadcast %cst_116 : f32 to vector<16x128xf32>
    %293 = arith.mulf %289, %292 : vector<16x128xf32>
    %294 = math.erf %293 : vector<16x128xf32>
    %cst_117 = arith.constant 1.000000e+00 : f32
    %295 = vector.broadcast %cst_117 : f32 to vector<16x128xf32>
    %296 = arith.addf %295, %294 : vector<16x128xf32>
    %297 = arith.mulf %291, %296 : vector<16x128xf32>
    %298 = arith.truncf %297 : vector<16x128xf32> to vector<16x128xbf16>
    %c0_118 = arith.constant 0 : index
    %c0_119 = arith.constant 0 : index
    %299 = vector.load %arg18[%c0_118, %c0_119] : memref<128x384xbf16, #tpu.memory_space<vmem>>, vector<128x384xbf16>
    %cst_120 = arith.constant dense<0.000000e+00> : vector<16x384xf32>
    %300 = tpu.matmul %298, %299, %cst_120 {dimension_numbers = #tpu.dot_dimension_numbers<[1], [0], [0], [1], [0, 0, 1, 1], [], []>} : vector<16x128xbf16>, vector<128x384xbf16>, vector<16x384xf32> -> vector<16x384xf32>
    %c0_121 = arith.constant 0 : index
    %c0_122 = arith.constant 0 : index
    %301 = vector.load %arg19[%c0_121, %c0_122] : memref<1x384xf32, #tpu.memory_space<vmem>>, vector<1x384xf32>
    %302 = vector.broadcast %301 : vector<1x384xf32> to vector<16x384xf32>
    %303 = arith.addf %300, %302 : vector<16x384xf32>
    %304 = vector.extract_strided_slice %303 {offsets = [0, 256], sizes = [16, 4], strides = [1, 1]} : vector<16x384xf32> to vector<16x4xf32>
    %cst_123 = arith.constant dense<0xFF800000> : vector<16xf32>
    %305 = vector.multi_reduction <maximumf>, %304, %cst_123 [1] : vector<16x4xf32> to vector<16xf32>
    %306 = vector.shape_cast %305 : vector<16xf32> to vector<16x1xf32>
    %307 = vector.broadcast %306 : vector<16x1xf32> to vector<16x4xf32>
    %308 = arith.subf %304, %307 : vector<16x4xf32>
    %309 = math.exp %308 : vector<16x4xf32>
    %cst_124 = arith.constant dense<0.000000e+00> : vector<16xf32>
    %310 = vector.multi_reduction <add>, %309, %cst_124 [1] : vector<16x4xf32> to vector<16xf32>
    %311 = vector.shape_cast %310 : vector<16xf32> to vector<16x1xf32>
    %312 = vector.broadcast %311 : vector<16x1xf32> to vector<16x4xf32>
    %313 = arith.divf %309, %312 : vector<16x4xf32>
    %c0_125 = arith.constant 0 : index
    %c0_126 = arith.constant 0 : index
    %314 = vector.load %arg20[%c0_125, %c0_126] : memref<2x128xf32, #tpu.memory_space<vmem>>, vector<2x128xf32>
    %315 = vector.extract_strided_slice %314 {offsets = [0, 0], sizes = [1, 128], strides = [1, 1]} : vector<2x128xf32> to vector<1x128xf32>
    %316 = vector.extract_strided_slice %313 {offsets = [0, 0], sizes = [16, 1], strides = [1, 1]} : vector<16x4xf32> to vector<16x1xf32>
    %317 = vector.broadcast %315 : vector<1x128xf32> to vector<16x128xf32>
    %318 = vector.broadcast %316 : vector<16x1xf32> to vector<16x128xf32>
    %319 = arith.mulf %317, %318 : vector<16x128xf32>
    %320 = vector.extract_strided_slice %314 {offsets = [1, 0], sizes = [1, 128], strides = [1, 1]} : vector<2x128xf32> to vector<1x128xf32>
    %321 = vector.extract_strided_slice %313 {offsets = [0, 1], sizes = [16, 1], strides = [1, 1]} : vector<16x4xf32> to vector<16x1xf32>
    %322 = vector.broadcast %320 : vector<1x128xf32> to vector<16x128xf32>
    %323 = vector.broadcast %321 : vector<16x1xf32> to vector<16x128xf32>
    %324 = arith.mulf %322, %323 : vector<16x128xf32>
    %325 = arith.addf %319, %324 : vector<16x128xf32>
    %326 = vector.extract_strided_slice %303 {offsets = [0, 0], sizes = [16, 128], strides = [1, 1]} : vector<16x384xf32> to vector<16x128xf32>
    %327 = arith.mulf %326, %325 : vector<16x128xf32>
    %328 = vector.extract_strided_slice %314 {offsets = [0, 0], sizes = [1, 128], strides = [1, 1]} : vector<2x128xf32> to vector<1x128xf32>
    %329 = vector.extract_strided_slice %313 {offsets = [0, 2], sizes = [16, 1], strides = [1, 1]} : vector<16x4xf32> to vector<16x1xf32>
    %330 = vector.broadcast %328 : vector<1x128xf32> to vector<16x128xf32>
    %331 = vector.broadcast %329 : vector<16x1xf32> to vector<16x128xf32>
    %332 = arith.mulf %330, %331 : vector<16x128xf32>
    %333 = vector.extract_strided_slice %314 {offsets = [1, 0], sizes = [1, 128], strides = [1, 1]} : vector<2x128xf32> to vector<1x128xf32>
    %334 = vector.extract_strided_slice %313 {offsets = [0, 3], sizes = [16, 1], strides = [1, 1]} : vector<16x4xf32> to vector<16x1xf32>
    %335 = vector.broadcast %333 : vector<1x128xf32> to vector<16x128xf32>
    %336 = vector.broadcast %334 : vector<16x1xf32> to vector<16x128xf32>
    %337 = arith.mulf %335, %336 : vector<16x128xf32>
    %338 = arith.addf %332, %337 : vector<16x128xf32>
    %339 = vector.extract_strided_slice %303 {offsets = [0, 128], sizes = [16, 128], strides = [1, 1]} : vector<16x384xf32> to vector<16x128xf32>
    %340 = arith.mulf %339, %338 : vector<16x128xf32>
    %341 = arith.addf %327, %340 : vector<16x128xf32>
    %cst_127 = arith.constant 5.000000e-01 : f32
    %342 = vector.broadcast %cst_127 : f32 to vector<16x128xf32>
    %343 = arith.mulf %342, %341 : vector<16x128xf32>
    %cst_128 = arith.constant 0.707106769 : f32
    %344 = vector.broadcast %cst_128 : f32 to vector<16x128xf32>
    %345 = arith.mulf %341, %344 : vector<16x128xf32>
    %346 = math.erf %345 : vector<16x128xf32>
    %cst_129 = arith.constant 1.000000e+00 : f32
    %347 = vector.broadcast %cst_129 : f32 to vector<16x128xf32>
    %348 = arith.addf %347, %346 : vector<16x128xf32>
    %349 = arith.mulf %343, %348 : vector<16x128xf32>
    %350 = arith.truncf %349 : vector<16x128xf32> to vector<16x128xbf16>
    %c0_130 = arith.constant 0 : index
    %c0_131 = arith.constant 0 : index
    %351 = vector.load %arg21[%c0_130, %c0_131] : memref<128x384xbf16, #tpu.memory_space<vmem>>, vector<128x384xbf16>
    %cst_132 = arith.constant dense<0.000000e+00> : vector<16x384xf32>
    %352 = tpu.matmul %350, %351, %cst_132 {dimension_numbers = #tpu.dot_dimension_numbers<[1], [0], [0], [1], [0, 0, 1, 1], [], []>} : vector<16x128xbf16>, vector<128x384xbf16>, vector<16x384xf32> -> vector<16x384xf32>
    %c0_133 = arith.constant 0 : index
    %c0_134 = arith.constant 0 : index
    %353 = vector.load %arg22[%c0_133, %c0_134] : memref<1x384xf32, #tpu.memory_space<vmem>>, vector<1x384xf32>
    %354 = vector.broadcast %353 : vector<1x384xf32> to vector<16x384xf32>
    %355 = arith.addf %352, %354 : vector<16x384xf32>
    %356 = vector.extract_strided_slice %355 {offsets = [0, 256], sizes = [16, 8], strides = [1, 1]} : vector<16x384xf32> to vector<16x8xf32>
    %cst_135 = arith.constant dense<0xFF800000> : vector<16xf32>
    %357 = vector.multi_reduction <maximumf>, %356, %cst_135 [1] : vector<16x8xf32> to vector<16xf32>
    %358 = vector.shape_cast %357 : vector<16xf32> to vector<16x1xf32>
    %359 = vector.broadcast %358 : vector<16x1xf32> to vector<16x8xf32>
    %360 = arith.subf %356, %359 : vector<16x8xf32>
    %361 = math.exp %360 : vector<16x8xf32>
    %cst_136 = arith.constant dense<0.000000e+00> : vector<16xf32>
    %362 = vector.multi_reduction <add>, %361, %cst_136 [1] : vector<16x8xf32> to vector<16xf32>
    %363 = vector.shape_cast %362 : vector<16xf32> to vector<16x1xf32>
    %364 = vector.broadcast %363 : vector<16x1xf32> to vector<16x8xf32>
    %365 = arith.divf %361, %364 : vector<16x8xf32>
    %c0_137 = arith.constant 0 : index
    %c0_138 = arith.constant 0 : index
    %366 = vector.load %arg23[%c0_137, %c0_138] : memref<4x128xf32, #tpu.memory_space<vmem>>, vector<4x128xf32>
    %367 = vector.extract_strided_slice %366 {offsets = [0, 0], sizes = [1, 128], strides = [1, 1]} : vector<4x128xf32> to vector<1x128xf32>
    %368 = vector.extract_strided_slice %365 {offsets = [0, 0], sizes = [16, 1], strides = [1, 1]} : vector<16x8xf32> to vector<16x1xf32>
    %369 = vector.broadcast %367 : vector<1x128xf32> to vector<16x128xf32>
    %370 = vector.broadcast %368 : vector<16x1xf32> to vector<16x128xf32>
    %371 = arith.mulf %369, %370 : vector<16x128xf32>
    %372 = vector.extract_strided_slice %366 {offsets = [1, 0], sizes = [1, 128], strides = [1, 1]} : vector<4x128xf32> to vector<1x128xf32>
    %373 = vector.extract_strided_slice %365 {offsets = [0, 1], sizes = [16, 1], strides = [1, 1]} : vector<16x8xf32> to vector<16x1xf32>
    %374 = vector.broadcast %372 : vector<1x128xf32> to vector<16x128xf32>
    %375 = vector.broadcast %373 : vector<16x1xf32> to vector<16x128xf32>
    %376 = arith.mulf %374, %375 : vector<16x128xf32>
    %377 = arith.addf %371, %376 : vector<16x128xf32>
    %378 = vector.extract_strided_slice %366 {offsets = [2, 0], sizes = [1, 128], strides = [1, 1]} : vector<4x128xf32> to vector<1x128xf32>
    %379 = vector.extract_strided_slice %365 {offsets = [0, 2], sizes = [16, 1], strides = [1, 1]} : vector<16x8xf32> to vector<16x1xf32>
    %380 = vector.broadcast %378 : vector<1x128xf32> to vector<16x128xf32>
    %381 = vector.broadcast %379 : vector<16x1xf32> to vector<16x128xf32>
    %382 = arith.mulf %380, %381 : vector<16x128xf32>
    %383 = arith.addf %377, %382 : vector<16x128xf32>
    %384 = vector.extract_strided_slice %366 {offsets = [3, 0], sizes = [1, 128], strides = [1, 1]} : vector<4x128xf32> to vector<1x128xf32>
    %385 = vector.extract_strided_slice %365 {offsets = [0, 3], sizes = [16, 1], strides = [1, 1]} : vector<16x8xf32> to vector<16x1xf32>
    %386 = vector.broadcast %384 : vector<1x128xf32> to vector<16x128xf32>
    %387 = vector.broadcast %385 : vector<16x1xf32> to vector<16x128xf32>
    %388 = arith.mulf %386, %387 : vector<16x128xf32>
    %389 = arith.addf %383, %388 : vector<16x128xf32>
    %390 = vector.extract_strided_slice %355 {offsets = [0, 0], sizes = [16, 128], strides = [1, 1]} : vector<16x384xf32> to vector<16x128xf32>
    %391 = arith.mulf %390, %389 : vector<16x128xf32>
    %392 = vector.extract_strided_slice %366 {offsets = [0, 0], sizes = [1, 128], strides = [1, 1]} : vector<4x128xf32> to vector<1x128xf32>
    %393 = vector.extract_strided_slice %365 {offsets = [0, 4], sizes = [16, 1], strides = [1, 1]} : vector<16x8xf32> to vector<16x1xf32>
    %394 = vector.broadcast %392 : vector<1x128xf32> to vector<16x128xf32>
    %395 = vector.broadcast %393 : vector<16x1xf32> to vector<16x128xf32>
    %396 = arith.mulf %394, %395 : vector<16x128xf32>
    %397 = vector.extract_strided_slice %366 {offsets = [1, 0], sizes = [1, 128], strides = [1, 1]} : vector<4x128xf32> to vector<1x128xf32>
    %398 = vector.extract_strided_slice %365 {offsets = [0, 5], sizes = [16, 1], strides = [1, 1]} : vector<16x8xf32> to vector<16x1xf32>
    %399 = vector.broadcast %397 : vector<1x128xf32> to vector<16x128xf32>
    %400 = vector.broadcast %398 : vector<16x1xf32> to vector<16x128xf32>
    %401 = arith.mulf %399, %400 : vector<16x128xf32>
    %402 = arith.addf %396, %401 : vector<16x128xf32>
    %403 = vector.extract_strided_slice %366 {offsets = [2, 0], sizes = [1, 128], strides = [1, 1]} : vector<4x128xf32> to vector<1x128xf32>
    %404 = vector.extract_strided_slice %365 {offsets = [0, 6], sizes = [16, 1], strides = [1, 1]} : vector<16x8xf32> to vector<16x1xf32>
    %405 = vector.broadcast %403 : vector<1x128xf32> to vector<16x128xf32>
    %406 = vector.broadcast %404 : vector<16x1xf32> to vector<16x128xf32>
    %407 = arith.mulf %405, %406 : vector<16x128xf32>
    %408 = arith.addf %402, %407 : vector<16x128xf32>
    %409 = vector.extract_strided_slice %366 {offsets = [3, 0], sizes = [1, 128], strides = [1, 1]} : vector<4x128xf32> to vector<1x128xf32>
    %410 = vector.extract_strided_slice %365 {offsets = [0, 7], sizes = [16, 1], strides = [1, 1]} : vector<16x8xf32> to vector<16x1xf32>
    %411 = vector.broadcast %409 : vector<1x128xf32> to vector<16x128xf32>
    %412 = vector.broadcast %410 : vector<16x1xf32> to vector<16x128xf32>
    %413 = arith.mulf %411, %412 : vector<16x128xf32>
    %414 = arith.addf %408, %413 : vector<16x128xf32>
    %415 = vector.extract_strided_slice %355 {offsets = [0, 128], sizes = [16, 128], strides = [1, 1]} : vector<16x384xf32> to vector<16x128xf32>
    %416 = arith.mulf %415, %414 : vector<16x128xf32>
    %417 = arith.addf %391, %416 : vector<16x128xf32>
    %c0_139 = arith.constant 0 : index
    %c0_140 = arith.constant 0 : index
    %418 = vector.load %arg24[%c0_139, %c0_140] : memref<16x128xf32, #tpu.memory_space<vmem>>, vector<16x128xf32>
    tpu.vector_store %arg24[%c0_139, %c0_140], %417 {strides = array<i32>} : memref<16x128xf32, #tpu.memory_space<vmem>>, vector<16x128xf32>,
    return
  }
  func.func @transform_0(%arg0: i32) -> (i32, i32, i32) {
    %c0_i32 = arith.constant 0 : i32
    %c0_i32_0 = arith.constant 0 : i32
    %c0_i32_1 = arith.constant 0 : i32
    return %c0_i32, %arg0, %c0_i32_0 : i32, i32, i32
  }
  func.func @transform_1(%arg0: i32) -> (i32, i32, i32) {
    %c0_i32 = arith.constant 0 : i32
    %c0_i32_0 = arith.constant 0 : i32
    %c0_i32_1 = arith.constant 0 : i32
    %c0_i32_2 = arith.constant 0 : i32
    return %c0_i32, %c0_i32_0, %c0_i32_1 : i32, i32, i32
  }
  func.func @transform_2(%arg0: i32) -> (i32, i32) {
    %c0_i32 = arith.constant 0 : i32
    %c0_i32_0 = arith.constant 0 : i32
    %c0_i32_1 = arith.constant 0 : i32
    return %c0_i32, %c0_i32_0 : i32, i32
  }
  func.func @transform_3(%arg0: i32) -> (i32, i32, i32) {
    %c0_i32 = arith.constant 0 : i32
    %c0_i32_0 = arith.constant 0 : i32
    %c0_i32_1 = arith.constant 0 : i32
    %c0_i32_2 = arith.constant 0 : i32
    return %c0_i32, %c0_i32_0, %c0_i32_1 : i32, i32, i32
  }
  func.func @transform_4(%arg0: i32) -> (i32, i32) {
    %c0_i32 = arith.constant 0 : i32
    %c0_i32_0 = arith.constant 0 : i32
    %c0_i32_1 = arith.constant 0 : i32
    return %c0_i32, %c0_i32_0 : i32, i32
  }
  func.func @transform_5(%arg0: i32) -> (i32, i32, i32) {
    %c0_i32 = arith.constant 0 : i32
    %c0_i32_0 = arith.constant 0 : i32
    %c0_i32_1 = arith.constant 0 : i32
    %c0_i32_2 = arith.constant 0 : i32
    return %c0_i32, %c0_i32_0, %c0_i32_1 : i32, i32, i32
  }
  func.func @transform_6(%arg0: i32) -> (i32, i32) {
    %c0_i32 = arith.constant 0 : i32
    %c0_i32_0 = arith.constant 0 : i32
    %c0_i32_1 = arith.constant 0 : i32
    return %c0_i32, %c0_i32_0 : i32, i32
  }
  func.func @transform_7(%arg0: i32) -> (i32, i32, i32) {
    %c0_i32 = arith.constant 0 : i32
    %c0_i32_0 = arith.constant 0 : i32
    %c0_i32_1 = arith.constant 0 : i32
    %c0_i32_2 = arith.constant 0 : i32
    return %c0_i32, %c0_i32_0, %c0_i32_1 : i32, i32, i32
  }
  func.func @transform_8(%arg0: i32) -> (i32, i32) {
    %c0_i32 = arith.constant 0 : i32
    %c0_i32_0 = arith.constant 0 : i32
    %c0_i32_1 = arith.constant 0 : i32
    return %c0_i32, %c0_i32_0 : i32, i32
  }
  func.func @transform_9(%arg0: i32) -> (i32, i32, i32) {
    %c0_i32 = arith.constant 0 : i32
    %c0_i32_0 = arith.constant 0 : i32
    %c0_i32_1 = arith.constant 0 : i32
    %c0_i32_2 = arith.constant 0 : i32
    return %c0_i32, %c0_i32_0, %c0_i32_1 : i32, i32, i32
  }
  func.func @transform_10(%arg0: i32) -> (i32, i32) {
    %c0_i32 = arith.constant 0 : i32
    %c0_i32_0 = arith.constant 0 : i32
    %c0_i32_1 = arith.constant 0 : i32
    return %c0_i32, %c0_i32_0 : i32, i32
  }
  func.func @transform_11(%arg0: i32) -> (i32, i32, i32) {
    %c0_i32 = arith.constant 0 : i32
    %c0_i32_0 = arith.constant 0 : i32
    %c0_i32_1 = arith.constant 0 : i32
    %c0_i32_2 = arith.constant 0 : i32
    return %c0_i32, %c0_i32_0, %c0_i32_1 : i32, i32, i32
  }
  func.func @transform_12(%arg0: i32) -> (i32, i32) {
    %c0_i32 = arith.constant 0 : i32
    %c0_i32_0 = arith.constant 0 : i32
    %c0_i32_1 = arith.constant 0 : i32
    return %c0_i32, %c0_i32_0 : i32, i32
  }
  func.func @transform_13(%arg0: i32) -> (i32, i32) {
    %c0_i32 = arith.constant 0 : i32
    %c0_i32_0 = arith.constant 0 : i32
    %c0_i32_1 = arith.constant 0 : i32
    return %c0_i32, %c0_i32_0 : i32, i32
  }
  func.func @transform_14(%arg0: i32) -> (i32, i32) {
    %c0_i32 = arith.constant 0 : i32
    %c0_i32_0 = arith.constant 0 : i32
    %c0_i32_1 = arith.constant 0 : i32
    return %c0_i32, %c0_i32_0 : i32, i32
  }
  func.func @transform_15(%arg0: i32) -> (i32, i32) {
    %c0_i32 = arith.constant 0 : i32
    %c0_i32_0 = arith.constant 0 : i32
    %c0_i32_1 = arith.constant 0 : i32
    return %c0_i32, %c0_i32_0 : i32, i32
  }
  func.func @transform_16(%arg0: i32) -> (i32, i32) {
    %c0_i32 = arith.constant 0 : i32
    %c0_i32_0 = arith.constant 0 : i32
    %c0_i32_1 = arith.constant 0 : i32
    return %c0_i32, %c0_i32_0 : i32, i32
  }
  func.func @transform_17(%arg0: i32) -> (i32, i32) {
    %c0_i32 = arith.constant 0 : i32
    %c0_i32_0 = arith.constant 0 : i32
    %c0_i32_1 = arith.constant 0 : i32
    return %c0_i32, %c0_i32_0 : i32, i32
  }
  func.func @transform_18(%arg0: i32) -> (i32, i32) {
    %c0_i32 = arith.constant 0 : i32
    %c0_i32_0 = arith.constant 0 : i32
    %c0_i32_1 = arith.constant 0 : i32
    return %c0_i32, %c0_i32_0 : i32, i32
  }
  func.func @transform_19(%arg0: i32) -> (i32, i32) {
    %c0_i32 = arith.constant 0 : i32
    %c0_i32_0 = arith.constant 0 : i32
    %c0_i32_1 = arith.constant 0 : i32
    return %c0_i32, %c0_i32_0 : i32, i32
  }
  func.func @transform_20(%arg0: i32) -> (i32, i32) {
    %c0_i32 = arith.constant 0 : i32
    %c0_i32_0 = arith.constant 0 : i32
    %c0_i32_1 = arith.constant 0 : i32
    return %c0_i32, %c0_i32_0 : i32, i32
  }
  func.func @transform_21(%arg0: i32) -> (i32, i32) {
    %c0_i32 = arith.constant 0 : i32
    %c0_i32_0 = arith.constant 0 : i32
    %c0_i32_1 = arith.constant 0 : i32
    return %c0_i32, %c0_i32_0 : i32, i32
  }
  func.func @transform_22(%arg0: i32) -> (i32, i32) {
    %c0_i32 = arith.constant 0 : i32
    %c0_i32_0 = arith.constant 0 : i32
    %c0_i32_1 = arith.constant 0 : i32
    return %c0_i32, %c0_i32_0 : i32, i32
  }
  func.func @transform_23(%arg0: i32) -> (i32, i32) {
    %c0_i32 = arith.constant 0 : i32
    %c0_i32_0 = arith.constant 0 : i32
    return %arg0, %c0_i32 : i32, i32
  }
}

</mosaic_0001>

<bundles_post_ra>
// kernel: tpu_custom_call.1
= control target key start
LH: loop header
LB: loop body
LE: loop exit
PB: predicated region body
PF: predicated region fallthrough
CT: control target
= control target key end

     0   :  { %s8980_s0 = inlined_call_operand.vmem [shape: f32[4,16,196], index: 0, kind: input, shape index: {}]   ;;  %s8981_s1 = inlined_call_operand.vmem [shape: bf16[4,196,512], index: 1, kind: input, shape index: {}]   ;;  %s8982_s2 = inlined_call_operand.vmem [shape: f32[1,512], index: 2, kind: input, shape index: {}]   ;;  %s8983_s3 = inlined_call_operand.vmem [shape: bf16[4,196,8], index: 3, kind: input, shape index: {}]   ;;  %s8984_s4 = inlined_call_operand.vmem [shape: f32[1,8], index: 4, kind: input, shape index: {}]   ;;  %s8985_s5 = inlined_call_operand.vmem [shape: bf16[2,256,256], index: 5, kind: input, shape index: {}]   ;;  %s8986_s6 = inlined_call_operand.vmem [shape: f32[1,256], index: 6, kind: input, shape index: {}]   ;;  %s8987_s7 = inlined_call_operand.vmem [shape: bf16[2,256,4], index: 7, kind: input, shape index: {}]   ;;  %s8988_s8 = inlined_call_operand.vmem [shape: f32[1,4], index: 8, kind: input, shape index: {}]   ;;  %s8989_s9 = inlined_call_operand.vmem [shape: bf16[2,128,128], index: 9, kind: input, shape index: {}]   ;;  %s8990_s10 = inlined_call_operand.vmem [shape: f32[1,128], index: 10, kind: input, shape index: {}]   ;;  %s8991_s11 = inlined_call_operand.vmem [shape: bf16[2,128,4], index: 11, kind: input, shape index: {}]   ;;  %s8992_s12 = inlined_call_operand.vmem [shape: f32[1,4], index: 12, kind: input, shape index: {}]   ;;  %s8993_s13 = inlined_call_operand.vmem [shape: f32[2,128], index: 13, kind: input, shape index: {}]   ;;  %s8994_s14 = inlined_call_operand.vmem [shape: bf16[128,384], index: 14, kind: input, shape index: {}]   ;;  %s8995_s15 = inlined_call_operand.vmem [shape: f32[1,384], index: 15, kind: input, shape index: {}]   ;;  %s8996_s16 = inlined_call_operand.vmem [shape: f32[2,128], index: 16, kind: input, shape index: {}]   ;;  %s8997_s17 = inlined_call_operand.vmem [shape: bf16[128,384], index: 17, kind: input, shape index: {}]   ;;  %s8998_s18 = inlined_call_operand.vmem [shape: f32[1,384], index: 18, kind: input, shape index: {}]   ;;  %s8999_s19 = inlined_call_operand.vmem [shape: f32[2,128], index: 19, kind: input, shape index: {}]   ;;  %s9000_s20 = inlined_call_operand.vmem [shape: bf16[128,384], index: 20, kind: input, shape index: {}]   ;;  %s9001_s21 = inlined_call_operand.vmem [shape: f32[1,384], index: 21, kind: input, shape index: {}]   ;;  %s9002_s22 = inlined_call_operand.vmem [shape: f32[4,128], index: 22, kind: input, shape index: {}]   ;;  %s9003_s23 = inlined_call_operand.hbm [shape: f32[16,128], index: 23, kind: output, shape index: {}]  }
   0x1   :  { %9022 = sst [smem:[#allocation5_spill]] %s8980_s0 }
   0x2   :  { %9023 = sst [smem:[#allocation6_spill]] %s8981_s1 }
   0x3   :  { %9024 = sst [smem:[#allocation7_spill]] %s8982_s2 }
   0x4   :  { %9025 = sst [smem:[#allocation8_spill]] %s8983_s3 }
   0x5   :  { %9026 = sst [smem:[#allocation9_spill]] %s8984_s4 }
   0x6   :  { %9027 = sst [smem:[#allocation10_spill]] %s8985_s5 }
   0x7   :  { %9028 = sst [smem:[#allocation11_spill]] %s8986_s6 }
   0x8   :  { %9029 = sst [smem:[#allocation12_spill]] %s8987_s7 }
   0x9   :  { %s9030_s24 = sld [smem:[#allocation8_spill]]  ;;  %v9018_v1 = vmov 0   ;;  %vm229_vm0 = vcmask 556032   ;;  %vm233_vm1 = vcmask 1041408  }
   0xa   :  { %237 = vmatprep.subr.bf16.mxu0 %v9018_v1  ;;  %359 = vmatprep.subr.bf16.mxu1 %v9018_v1  ;;  %s9031_s1 = sld [smem:[#allocation5_spill]] }
   0xb   :  { %6174 = vset.pattern.permute.xlu0 %v9018_v1  ;;  %s9032_s26 = sld [smem:[#allocation6_spill]] }
   0xf   :  { %v6236_v0 = vld [vmem:[%s9030_s24 + $0x9c] sm:$0xff]   ;;  %v6238_v3 = vld [vmem:[%s9030_s24 + $0x94] sm:$0xff]   ;;  %v6240_v5 = vld [vmem:[%s9030_s24 + $0x8c] sm:$0xff]  }
  0x10   :  { %v6237_v2 = vld [vmem:[%s9030_s24 + $0x38] sm:$0xff]   ;;  %238 = vmatpush1.bf16.msra.mxu0 %v6236_v0  ;;  %v6239_v4 = vld [vmem:[%s9030_s24 + $0x30] sm:$0xff]   ;;  %v6241_v6 = vld [vmem:[%s9030_s24 + $0x28] sm:$0xff]  }
  0x11   :  { %360 = vmatpush1.bf16.msra.mxu1 %v6237_v2  ;;  %239 = vmatprep.subr.bf16.mxu0 %v9018_v1  ;;  %v6242_v7 = vld [vmem:[%s9030_s24 + $0x84] sm:$0xff]   ;;  %v6244_v9 = vld [vmem:[%s9030_s24 + $0x7c] sm:$0xff]   ;;  %v6246_v11 = vld [vmem:[%s9030_s24 + $0x74] sm:$0xff]  }
  0x12   :  { %361 = vmatprep.subr.bf16.mxu1 %v9018_v1  ;;  %v6243_v8 = vld [vmem:[%s9030_s24 + $0x20] sm:$0xff]   ;;  %v6245_v10 = vld [vmem:[%s9030_s24 + $0x18] sm:$0xff]   ;;  %v6247_v12 = vld [vmem:[%s9030_s24 + $0x10] sm:$0xff]  }
  0x13   :  { %v6248_v13 = vld [vmem:[%s9030_s24 + $0x6c] sm:$0xff]   ;;  %v6250_v15 = vld [vmem:[%s9030_s24 + $0x64] sm:$0xff]   ;;  %v5100_v17 = vld [vmem:[%s9031_s1 + $0x38] sm:$0xff] }
  0x14   :  { %240 = vmatpush1.bf16.msra.mxu0 %v6238_v3  ;;  %v6249_v14 = vld [vmem:[%s9030_s24 + $0x8] sm:$0xff]   ;;  %v6251_v18 = vld [vmem:[%s9030_s24] sm:$0xff]   ;;  %v79_v21 = vld [vmem:[%s9031_s1 + $0x18] sm:$0xff] }
  0x15   :  { %362 = vmatpush1.bf16.msra.mxu1 %v6239_v4  ;;  %241 = vmatprep.subr.bf16.mxu0 %v9018_v1  ;;  %v5098_v16 = vld [vmem:[%s9031_s1 + $0x28] sm:$0xff]  ;;  %v6252_v22 = vld [vmem:[%s9030_s24 + $0xc4] ss:$0 sps:$4 sm:$0x33]   ;;  %v6254_v27 = vld [vmem:[%s9030_s24 + $0xbc] sm:$0xff]  }
  0x16   :  { %363 = vmatprep.subr.bf16.mxu1 %v9018_v1  ;;  %v7156_v19 = vpack.c.bf16 %v5100_v17, %v5098_v16  ;;  %v77_v20 = vld [vmem:[%s9031_s1 + $0x8] sm:$0xff]  ;;  %v6253_v23 = vld [vmem:[%s9030_s24 + $0x60] ss:$0 sps:$4 sm:$0x33]   ;;  %v235_v25 = vsel %vm233_vm1, %v6252_v22, 0  ;;  %v6255_v28 = vld [vmem:[%s9030_s24 + $0x58] sm:$0xff]  }
  0x17   :  { %v7171_v24 = vpack.c.bf16 %v79_v21, %v77_v20  ;;  %v357_v26 = vsel %vm233_vm1, %v6253_v23, 0  ;;  %v6256_v29 = vld [vmem:[%s9030_s24 + $0xb4] sm:$0xff]   ;;  %v6258_v31 = vld [vmem:[%s9030_s24 + $0xac] sm:$0xff]   ;;  %v6260_v33 = vld [vmem:[%s9030_s24 + $0xa4] sm:$0xff]  }
  0x18   :  { %242 = vmatpush1.bf16.msra.mxu0 %v6240_v5  ;;  %5147 = vmatprep.mubr.msk.bf16.mxu0 %vm229_vm0, %v7156_v19  ;;  %v6257_v30 = vld [vmem:[%s9030_s24 + $0x50] sm:$0xff]   ;;  %v6259_v32 = vld [vmem:[%s9030_s24 + $0x48] sm:$0xff]   ;;  %v6261_v34 = vld [vmem:[%s9030_s24 + $0x40] sm:$0xff]  }
  0x19   :  { %364 = vmatpush1.bf16.msra.mxu1 %v6241_v6  ;;  %243 = vmatprep.subr.bf16.mxu0 %v9018_v1  ;;  %v5097_v35 = vld [vmem:[%s9031_s1 + $0x20] sm:$0xff]  ;;  %v5099_v36 = vld [vmem:[%s9031_s1 + $0x30] sm:$0xff]  ;;  %v5102_v43 = vld [vmem:[%s9031_s1 + $0x48] sm:$0xff] }
  0x1a   :  { %365 = vmatprep.subr.bf16.mxu1 %v9018_v1  ;;  %5161 = vmatprep.mubr.msk.bf16.mxu1 %vm229_vm0, %v7171_v24  ;;  %v76_v37 = vld [vmem:[%s9031_s1] sm:$0xff]  ;;  %v78_v38 = vld [vmem:[%s9031_s1 + $0x10] sm:$0xff]  ;;  %v7226_v39 = vpack.c.bf16 %v5099_v36, %v5097_v35  ;;  %v5104_v44 = vld [vmem:[%s9031_s1 + $0x58] sm:$0xff] }
  0x1b   :  { %v7228_v40 = vpack.c.bf16 %v78_v38, %v76_v37  ;;  %v6262_v41 = vld [vmem:[%s9030_s24 + $0x100] sm:$0xff]   ;;  %v6264_v45 = vld [vmem:[%s9030_s24 + $0xf8] sm:$0xff]   ;;  %v7249_v46 = vpack.c.bf16 %v5104_v44, %v5102_v43  ;;  %v5106_v47 = vld [vmem:[%s9031_s1 + $0x68] sm:$0xff] }
  0x1c   :  { %244 = vmatpush1.bf16.msra.mxu0 %v6242_v7  ;;  %v6263_v42 = vld [vmem:[%s9030_s24 + $0x164] sm:$0xff]   ;;  %v5108_v48 = vld [vmem:[%s9031_s1 + $0x78] sm:$0xff]  ;;  %v6266_v51 = vld [vmem:[%s9030_s24 + $0xf0] sm:$0xff]  }
  0x1d   :  { %366 = vmatpush1.bf16.msra.mxu1 %v6243_v8  ;;  %245 = vmatprep.subr.bf16.mxu0 %v9018_v1  ;;  %v6265_v49 = vld [vmem:[%s9030_s24 + $0x15c] sm:$0xff]   ;;  %v7261_v50 = vpack.c.bf16 %v5108_v48, %v5106_v47  ;;  %v6267_v52 = vld [vmem:[%s9030_s24 + $0x154] sm:$0xff]   ;;  %v6268_v53 = vld [vmem:[%s9030_s24 + $0xe8] sm:$0xff]  }
  0x1e   :  { %367 = vmatprep.subr.bf16.mxu1 %v9018_v1  ;;  %v6269_v54 = vld [vmem:[%s9030_s24 + $0x14c] sm:$0xff]   ;;  %v6270_v55 = vld [vmem:[%s9030_s24 + $0xe0] sm:$0xff]   ;;  %v6272_v57 = vld [vmem:[%s9030_s24 + $0xd8] sm:$0xff]  }
  0x1f   :  { %v6271_v56 = vld [vmem:[%s9030_s24 + $0x144] sm:$0xff]   ;;  %v6273_v58 = vld [vmem:[%s9030_s24 + $0x13c] sm:$0xff]   ;;  %v6274_v59 = vld [vmem:[%s9030_s24 + $0xd0] sm:$0xff]  }
  0x20   :  { %246 = vmatpush1.bf16.msra.mxu0 %v6244_v9  ;;  %v6275_v60 = vld [vmem:[%s9030_s24 + $0x134] sm:$0xff]   ;;  %v6276_v61 = vld [vmem:[%s9030_s24 + $0xc8] sm:$0xff]   ;;  %v6280_v4 = vld [vmem:[%s9030_s24 + $0x120] sm:$0xff]  }
  0x21   :  { %368 = vmatpush1.bf16.msra.mxu1 %v6245_v10  ;;  %247 = vmatprep.subr.bf16.mxu0 %v9018_v1  ;;  %v6277_v62 = vld [vmem:[%s9030_s24 + $0x12c] sm:$0xff]   ;;  %v6278_v63 = vld [vmem:[%s9030_s24 + $0x128] ss:$0 sps:$4 sm:$0x33]   ;;  %v6282_v6 = vld [vmem:[%s9030_s24 + $0x118] sm:$0xff]  }
  0x22   :  { %369 = vmatprep.subr.bf16.mxu1 %v9018_v1  ;;  %v6279_v0 = vld [vmem:[%s9030_s24 + $0x18c] ss:$0 sps:$4 sm:$0x33]   ;;  %v505_v2 = vsel %vm233_vm1, %v6278_v63, 0  ;;  %v6281_v5 = vld [vmem:[%s9030_s24 + $0x184] sm:$0xff]   ;;  %v6283_v7 = vld [vmem:[%s9030_s24 + $0x17c] sm:$0xff]  }
  0x23   :  { %v655_v3 = vsel %vm233_vm1, %v6279_v0, 0  ;;  %v6284_v8 = vld [vmem:[%s9030_s24 + $0x110] sm:$0xff]   ;;  %v6286_v10 = vld [vmem:[%s9030_s24 + $0x108] sm:$0xff]  }
  0x24   :  { %248 = vmatpush1.bf16.msra.mxu0 %v6246_v11  ;;  %v6285_v9 = vld [vmem:[%s9030_s24 + $0x174] sm:$0xff]   ;;  %v5101_v11 = vld [vmem:[%s9031_s1 + $0x40] sm:$0xff]  ;;  %v6296_v23 = vld [vmem:[%s9032_s26 + $0xec] ss:$16 sps:$4 sm:$0xff]  }
  0x25   :  { %370 = vmatpush1.bf16.msra.mxu1 %v6247_v12  ;;  %249 = vmatprep.subr.bf16.mxu0 %v9018_v1  ;;  %v5103_v12 = vld [vmem:[%s9031_s1 + $0x50] sm:$0xff]  ;;  %v6294_v22 = vld [vmem:[%s9032_s26 + $0xe8] ss:$16 sps:$4 sm:$0xff]   ;;  %v6320_v36 = vld [vmem:[%s9032_s26 + $0x6c] ss:$16 sps:$4 sm:$0xff]  }
  0x26   :  { %371 = vmatprep.subr.bf16.mxu1 %v9018_v1  ;;  %v7370_v16 = vpack.c.bf16 %v5103_v12, %v5101_v11  ;;  %v6290_v20 = vld [vmem:[%s9032_s26 + $0xe4] ss:$16 sps:$4 sm:$0xff]   ;;  %v6312_v35 = vld [vmem:[%s9032_s26 + $0x88] ss:$16 sps:$4 sm:$0xff]   ;;  %v6309_v37 = vld [vmem:[%s9032_s26 + $0x60] ss:$16 sps:$4 sm:$0xff]  }
  0x27   :  { %v6293_v21 = vld [vmem:[%s9032_s26 + $0xc4] ss:$16 sps:$4 sm:$0xff]   ;;  %v6315_v43 = vld [vmem:[%s9032_s26 + $0x40] ss:$16 sps:$4 sm:$0xff]   ;;  %v6332_v47 = vld [vmem:[%s9032_s26 + $0x2c] ss:$16 sps:$4 sm:$0xff]  }
  0x28   :  { %250 = vmatpush1.bf16.msra.mxu0 %v6248_v13  ;;  %v6287_v13 = vld [vmem:[%s9030_s24 + $0x16c] sm:$0xff]   ;;  %v6317_v38 = vld [vmem:[%s9032_s26 + $0x44] ss:$16 sps:$4 sm:$0xff]   ;;  %v6358_v12 = vld [vmem:[%s9032_s26 + $0x128] ss:$16 sps:$4 sm:$0xff]  }
  0x29   :  { %372 = vmatpush1.bf16.msra.mxu1 %v6249_v14  ;;  %251 = vmatprep.subr.bf16.mxu0 %v9018_v1  ;;  %v5105_v14 = vld [vmem:[%s9031_s1 + $0x60] sm:$0xff] }
  0x2a   :  { %373 = vmatprep.subr.bf16.mxu1 %v9018_v1  ;;  %v6323_v44 = vld [vmem:[%s9032_s26 + $0x24] ss:$16 sps:$4 sm:$0xff]   ;;  %v6321_v48 = vld [vmem:[%s9032_s26 + $0x20] ss:$16 sps:$4 sm:$0xff]  }
  0x2b   :  { %v6338_v63 = vld [vmem:[%s9032_s26 + $0x160] ss:$16 sps:$4 sm:$0xff]   ;;  %v6357_v11 = vld [vmem:[%s9032_s26 + $0x104] ss:$16 sps:$4 sm:$0xff]  }
  0x2c   :  { %252 = vmatpush1.bf16.msra.mxu0 %v6250_v15  ;;  %v5107_v15 = vld [vmem:[%s9031_s1 + $0x70] sm:$0xff] }
  0x2d   :  { %374 = vmatpush1.bf16.msra.mxu1 %v6251_v18  ;;  %259 = vmatprep.subr.bf16.mxu0 %v9018_v1  ;;  %v7372_v17 = vpack.c.bf16 %v5107_v15, %v5105_v14  ;;  %v6288_v18 = vld [vmem:[%s9032_s26 + $0xe0] ss:$16 sps:$4 sm:$0xff]   ;;  %v6363_v15 = vld [vmem:[%s9032_s26 + $0x274] ss:$16 sps:$4 sm:$0xff]  }
  0x2e   :  { %381 = vmatprep.subr.bf16.mxu1 %v9018_v1  ;;  %v6355_v14 = vld [vmem:[%s9032_s26 + $0x100] ss:$16 sps:$4 sm:$0xff]  }
  0x30   :  { %260 = vmatpush2.bf16.msra.mxu0 %v235_v25  ;;  %v6302_v25 = vld [vmem:[%s9032_s26 + $0xcc] ss:$16 sps:$4 sm:$0xff]  }
  0x31   :  { %382 = vmatpush2.bf16.msra.mxu1 %v357_v26  ;;  %261 = vmatprep.subr.bf16.mxu0 %v9018_v1  ;;  %v6299_v26 = vld [vmem:[%s9032_s26 + $0xa4] ss:$16 sps:$4 sm:$0xff]  }
  0x32   :  { %383 = vmatprep.subr.bf16.mxu1 %v9018_v1 }
  0x34   :  { %262 = vmatpush2.bf16.msra.mxu0 %v6254_v27  ;;  %v6300_v27 = vld [vmem:[%s9032_s26 + $0xc8] ss:$16 sps:$4 sm:$0xff]  }
  0x35   :  { %384 = vmatpush2.bf16.msra.mxu1 %v6255_v28  ;;  %263 = vmatprep.subr.bf16.mxu0 %v9018_v1  ;;  %v6308_v28 = vld [vmem:[%s9032_s26 + $0xac] ss:$16 sps:$4 sm:$0xff]  }
  0x36   :  { %385 = vmatprep.subr.bf16.mxu1 %v9018_v1 }
  0x38   :  { %264 = vmatpush2.bf16.msra.mxu0 %v6256_v29  ;;  %v6297_v29 = vld [vmem:[%s9032_s26 + $0xa0] ss:$16 sps:$4 sm:$0xff]  }
  0x39   :  { %386 = vmatpush2.bf16.msra.mxu1 %v6257_v30  ;;  %265 = vmatprep.subr.bf16.mxu0 %v9018_v1  ;;  %v6305_v30 = vld [vmem:[%s9032_s26 + $0x84] ss:$16 sps:$4 sm:$0xff]  }
  0x3a   :  { %387 = vmatprep.subr.bf16.mxu1 %v9018_v1 }
  0x3c   :  { %266 = vmatpush2.bf16.msra.mxu0 %v6258_v31  ;;  %v6306_v31 = vld [vmem:[%s9032_s26 + $0xa8] ss:$16 sps:$4 sm:$0xff]  }
  0x3d   :  { %388 = vmatpush2.bf16.msra.mxu1 %v6259_v32  ;;  %267 = vmatprep.subr.bf16.mxu0 %v9018_v1  ;;  %v6314_v32 = vld [vmem:[%s9032_s26 + $0x8c] ss:$16 sps:$4 sm:$0xff]  }
  0x3e   :  { %389 = vmatprep.subr.bf16.mxu1 %v9018_v1 }
  0x40   :  { %268 = vmatpush2.bf16.msra.mxu0 %v6260_v33  ;;  %v6303_v33 = vld [vmem:[%s9032_s26 + $0x80] ss:$16 sps:$4 sm:$0xff]  }
  0x41   :  { %390 = vmatpush2.bf16.msra.mxu1 %v6261_v34  ;;  %507 = vmatprep.subr.bf16.mxu0 %v9018_v1  ;;  %v6311_v34 = vld [vmem:[%s9032_s26 + $0x64] ss:$16 sps:$4 sm:$0xff]  }
  0x42   :  { %657 = vmatprep.subr.bf16.mxu1 %v9018_v1 }
  0x43   :  { %270 = vmatmul.mubr.bf16.vlgmr.msra.gmra.mxu0 %v7226_v39 }
  0x44   :  { %392 = vmatmul.mubr.bf16.vlgmr.msra.gmra.mxu1 %v7228_v40  ;;  %508 = vmatpush1.bf16.msra.mxu0 %v6262_v41  ;;  %v6318_v41 = vld [vmem:[%s9032_s26 + $0x68] ss:$16 sps:$4 sm:$0xff]  }
  0x45   :  { %658 = vmatpush1.bf16.msra.mxu1 %v6263_v42  ;;  %509 = vmatprep.subr.bf16.mxu0 %v9018_v1  ;;  %v6326_v42 = vld [vmem:[%s9032_s26 + $0x4c] ss:$16 sps:$4 sm:$0xff]  }
  0x46   :  { %659 = vmatprep.subr.bf16.mxu1 %v9018_v1  ;;  %5200 = vmatprep.mubr.msk.bf16.mxu0 %vm229_vm0, %v7249_v46 }
  0x47   :  { %5239 = vmatprep.mubr.msk.bf16.mxu1 %vm229_vm0, %v7261_v50 }
  0x48   :  { %510 = vmatpush1.bf16.msra.mxu0 %v6264_v45  ;;  %v6324_v45 = vld [vmem:[%s9032_s26 + $0x48] ss:$16 sps:$4 sm:$0xff]  }
  0x49   :  { %660 = vmatpush1.bf16.msra.mxu1 %v6265_v49  ;;  %511 = vmatprep.subr.bf16.mxu0 %v9018_v1  ;;  %v6329_v49 = vld [vmem:[%s9032_s26 + $0x4] ss:$16 sps:$4 sm:$0xff]  }
  0x4a   :  { %661 = vmatprep.subr.bf16.mxu1 %v9018_v1 }
  0x4c   :  { %512 = vmatpush1.bf16.msra.mxu0 %v6266_v51  ;;  %v6330_v51 = vld [vmem:[%s9032_s26 + $0x28] ss:$16 sps:$4 sm:$0xff]  }
  0x4d   :  { %662 = vmatpush1.bf16.msra.mxu1 %v6267_v52  ;;  %513 = vmatprep.subr.bf16.mxu0 %v9018_v1  ;;  %v781_v52 = vld [vmem:[%s9032_s26 + $0x180] sm:$0x33] }
  0x4e   :  { %663 = vmatprep.subr.bf16.mxu1 %v9018_v1 }
  0x50   :  { %514 = vmatpush1.bf16.msra.mxu0 %v6268_v53  ;;  %v6337_v53 = vld [vmem:[%s9032_s26 + $0xc] ss:$16 sps:$4 sm:$0xff]  }
  0x51   :  { %664 = vmatpush1.bf16.msra.mxu1 %v6269_v54  ;;  %515 = vmatprep.subr.bf16.mxu0 %v9018_v1  ;;  %v782_v54 = vld [vmem:[%s9032_s26 + $0x188] sm:$0x33] }
  0x52   :  { %665 = vmatprep.subr.bf16.mxu1 %v9018_v1 }
  0x54   :  { %516 = vmatpush1.bf16.msra.mxu0 %v6270_v55  ;;  %v6327_v55 = vld [vmem:[%s9032_s26] ss:$16 sps:$4 sm:$0xff]  }
  0x55   :  { %666 = vmatpush1.bf16.msra.mxu1 %v6271_v56  ;;  %517 = vmatprep.subr.bf16.mxu0 %v9018_v1  ;;  %v5290_v56 = vcombine.high %v781_v52, %v781_v52 }
  0x56   :  { %667 = vmatprep.subr.bf16.mxu1 %v9018_v1 }
  0x58   :  { %518 = vmatpush1.bf16.msra.mxu0 %v6272_v57  ;;  %v5289_v57 = vcombine.low %v781_v52, %v781_v52 }
  0x59   :  { %668 = vmatpush1.bf16.msra.mxu1 %v6273_v58  ;;  %519 = vmatprep.subr.bf16.mxu0 %v9018_v1  ;;  %v6335_v58 = vld [vmem:[%s9032_s26 + $0x8] ss:$16 sps:$4 sm:$0xff]  }
  0x5a   :  { %669 = vmatprep.subr.bf16.mxu1 %v9018_v1 }
  0x5c   :  { %520 = vmatpush1.bf16.msra.mxu0 %v6274_v59  ;;  %v5292_v59 = vcombine.high %v782_v54, %v782_v54 }
  0x5d   :  { %670 = vmatpush1.bf16.msra.mxu1 %v6275_v60  ;;  %521 = vmatprep.subr.bf16.mxu0 %v9018_v1  ;;  %v5291_v60 = vcombine.low %v782_v54, %v782_v54 }
  0x5e   :  { %671 = vmatprep.subr.bf16.mxu1 %v9018_v1 }
  0x5f   :  { %v1061_v0 = vsel %vm233_vm1, %v5291_v60, 0 }
  0x60   :  { %522 = vmatpush1.bf16.msra.mxu0 %v6276_v61  ;;  %v1055_v61 = vsel %vm233_vm1, %v5289_v57, 0 }
  0x61   :  { %672 = vmatpush1.bf16.msra.mxu1 %v6277_v62  ;;  %529 = vmatprep.subr.bf16.mxu0 %v9018_v1  ;;  %v6340_v62 = vld [vmem:[%s9032_s26 + $0x164] ss:$16 sps:$4 sm:$0xff]  }
  0x62   :  { %679 = vmatprep.subr.bf16.mxu1 %v9018_v1 }
  0x64   :  { %530 = vmatpush2.bf16.msra.mxu0 %v505_v2  ;;  %v6348_v2 = vld [vmem:[%s9032_s26 + $0x16c] ss:$16 sps:$4 sm:$0xff]  }
  0x65   :  { %680 = vmatpush2.bf16.msra.mxu1 %v655_v3  ;;  %531 = vmatprep.subr.bf16.mxu0 %v9018_v1  ;;  %v6345_v3 = vld [vmem:[%s9032_s26 + $0x144] ss:$16 sps:$4 sm:$0xff]  }
  0x66   :  { %681 = vmatprep.subr.bf16.mxu1 %v9018_v1 }
  0x68   :  { %532 = vmatpush2.bf16.msra.mxu0 %v6280_v4  ;;  %v6346_v4 = vld [vmem:[%s9032_s26 + $0x168] ss:$16 sps:$4 sm:$0xff]  }
  0x69   :  { %682 = vmatpush2.bf16.msra.mxu1 %v6281_v5  ;;  %533 = vmatprep.subr.bf16.mxu0 %v9018_v1  ;;  %v6354_v5 = vld [vmem:[%s9032_s26 + $0x14c] ss:$16 sps:$4 sm:$0xff]  }
  0x6a   :  { %683 = vmatprep.subr.bf16.mxu1 %v9018_v1 }
  0x6c   :  { %534 = vmatpush2.bf16.msra.mxu0 %v6282_v6  ;;  %v6343_v6 = vld [vmem:[%s9032_s26 + $0x140] ss:$16 sps:$4 sm:$0xff]  }
  0x6d   :  { %684 = vmatpush2.bf16.msra.mxu1 %v6283_v7  ;;  %535 = vmatprep.subr.bf16.mxu0 %v9018_v1  ;;  %v6351_v7 = vld [vmem:[%s9032_s26 + $0x124] ss:$16 sps:$4 sm:$0xff]  }
  0x6e   :  { %685 = vmatprep.subr.bf16.mxu1 %v9018_v1 }
  0x70   :  { %536 = vmatpush2.bf16.msra.mxu0 %v6284_v8  ;;  %v6352_v8 = vld [vmem:[%s9032_s26 + $0x148] ss:$16 sps:$4 sm:$0xff]  }
  0x71   :  { %686 = vmatpush2.bf16.msra.mxu1 %v6285_v9  ;;  %537 = vmatprep.subr.bf16.mxu0 %v9018_v1  ;;  %v6360_v9 = vld [vmem:[%s9032_s26 + $0x12c] ss:$16 sps:$4 sm:$0xff]  }
  0x72   :  { %687 = vmatprep.subr.bf16.mxu1 %v9018_v1 }
  0x74   :  { %538 = vmatpush2.bf16.msra.mxu0 %v6286_v10  ;;  %v6349_v10 = vld [vmem:[%s9032_s26 + $0x120] ss:$16 sps:$4 sm:$0xff]  }
  0x75   :  { %688 = vmatpush2.bf16.msra.mxu1 %v6287_v13  ;;  %1066 = vmatprep.subr.bf16.mxu0 %v6290_v20  ;;  %v6366_v13 = vld [vmem:[%s9032_s26 + $0x10c] ss:$16 sps:$4 sm:$0xff]  }
  0x76   :  { %1109 = vmatprep.subr.bf16.mxu1 %v6296_v23  ;;  %v6372_v20 = vld [vmem:[%s9032_s26 + $0x27c] ss:$16 sps:$4 sm:$0xff]   ;;  %v6370_v23 = vld [vmem:[%s9032_s26 + $0x278] ss:$16 sps:$4 sm:$0xff]  }
  0x77   :  { %540 = vmatmul.mubr.bf16.vlgmr.msra.gmra.mxu0 %v7370_v16 }
  0x78   :  { %690 = vmatmul.mubr.bf16.vlgmr.msra.gmra.mxu1 %v7372_v17  ;;  %5294 = vmatprep.mubr.msk.bf16.mxu0 %vm229_vm0, %v7171_v24 }
  0x79   :  { %5296 = vmatprep.mubr.msk.bf16.mxu1 %vm229_vm0, %v7171_v24  ;;  %1067 = vmatpush1.bf16.msra.mxu0 %v6288_v18  ;;  %v6291_v24 = vld [vmem:[%s9032_s26 + $0xc0] ss:$16 sps:$4 sm:$0xff]   ;;  %v6364_v18 = vld [vmem:[%s9032_s26 + $0x108] ss:$16 sps:$4 sm:$0xff]  }
  0x7a   :  { %1068 = vmatprep.subr.bf16.mxu0 %v6293_v21  ;;  %1110 = vmatpush1.bf16.msra.mxu1 %v6294_v22  ;;  %v6361_v21 = vld [vmem:[%s9032_s26 + $0x270] ss:$16 sps:$4 sm:$0xff]   ;;  %v6369_v22 = vld [vmem:[%s9032_s26 + $0x254] ss:$16 sps:$4 sm:$0xff]  }
  0x7b   :  { %1111 = vmatprep.subr.bf16.mxu1 %v6302_v25  ;;  %v6367_v25 = vld [vmem:[%s9032_s26 + $0x250] ss:$16 sps:$4 sm:$0xff]  }
  0x7d   :  { %1069 = vmatpush1.bf16.msra.mxu0 %v6291_v24  ;;  %v6378_v24 = vld [vmem:[%s9032_s26 + $0x25c] ss:$16 sps:$4 sm:$0xff]  }
  0x7e   :  { %1070 = vmatprep.subr.bf16.mxu0 %v6299_v26  ;;  %1112 = vmatpush1.bf16.msra.mxu1 %v6300_v27  ;;  %v6375_v26 = vld [vmem:[%s9032_s26 + $0x234] ss:$16 sps:$4 sm:$0xff]   ;;  %v6376_v27 = vld [vmem:[%s9032_s26 + $0x258] ss:$16 sps:$4 sm:$0xff]  }
  0x7f   :  { %1113 = vmatprep.subr.bf16.mxu1 %v6308_v28  ;;  %v6384_v28 = vld [vmem:[%s9032_s26 + $0x23c] ss:$16 sps:$4 sm:$0xff]  }
  0x81   :  { %1071 = vmatpush1.bf16.msra.mxu0 %v6297_v29  ;;  %v6373_v29 = vld [vmem:[%s9032_s26 + $0x230] ss:$16 sps:$4 sm:$0xff]  }
  0x82   :  { %1072 = vmatprep.subr.bf16.mxu0 %v6305_v30  ;;  %1114 = vmatpush1.bf16.msra.mxu1 %v6306_v31  ;;  %v6381_v30 = vld [vmem:[%s9032_s26 + $0x214] ss:$16 sps:$4 sm:$0xff]   ;;  %v6390_v31 = vld [vmem:[%s9032_s26 + $0x21c] ss:$16 sps:$4 sm:$0xff]  }
  0x83   :  { %1115 = vmatprep.subr.bf16.mxu1 %v6314_v32  ;;  %v6379_v32 = vld [vmem:[%s9032_s26 + $0x210] ss:$16 sps:$4 sm:$0xff]  }
  0x85   :  { %1073 = vmatpush1.bf16.msra.mxu0 %v6303_v33  ;;  %v6387_v33 = vld [vmem:[%s9032_s26 + $0x1f4] ss:$16 sps:$4 sm:$0xff]  }
  0x86   :  { %1074 = vmatprep.subr.bf16.mxu0 %v6311_v34  ;;  %1116 = vmatpush1.bf16.msra.mxu1 %v6312_v35  ;;  %v6396_v34 = vld [vmem:[%s9032_s26 + $0x1fc] ss:$16 sps:$4 sm:$0xff]  }
  0x87   :  { %1117 = vmatprep.subr.bf16.mxu1 %v6320_v36 }
  0x89   :  { %1075 = vmatpush1.bf16.msra.mxu0 %v6309_v37  ;;  %v6385_v37 = vld [vmem:[%s9032_s26 + $0x1f0] ss:$16 sps:$4 sm:$0xff]  }
  0x8a   :  { %1076 = vmatprep.subr.bf16.mxu0 %v6317_v38  ;;  %1118 = vmatpush1.bf16.msra.mxu1 %v6318_v41 }
  0x8b   :  { %1119 = vmatprep.subr.bf16.mxu1 %v6326_v42 }
  0x8d   :  { %1077 = vmatpush1.bf16.msra.mxu0 %v6315_v43  ;;  %v6393_v43 = vld [vmem:[%s9032_s26 + $0x1d4] ss:$16 sps:$4 sm:$0xff]  }
  0x8e   :  { %1078 = vmatprep.subr.bf16.mxu0 %v6323_v44  ;;  %1120 = vmatpush1.bf16.msra.mxu1 %v6324_v45  ;;  %v6394_v44 = vld [vmem:[%s9032_s26 + $0x1f8] ss:$16 sps:$4 sm:$0xff]  }
  0x8f   :  { %1121 = vmatprep.subr.bf16.mxu1 %v6332_v47 }
  0x91   :  { %1079 = vmatpush1.bf16.msra.mxu0 %v6321_v48 }
  0x92   :  { %1080 = vmatprep.subr.bf16.mxu0 %v6329_v49  ;;  %1122 = vmatpush1.bf16.msra.mxu1 %v6330_v51 }
  0x93   :  { %1123 = vmatprep.subr.bf16.mxu1 %v6337_v53 }
  0x95   :  { %1081 = vmatpush1.bf16.msra.mxu0 %v6327_v55 }
  0x96   :  { %5293 = vmatprep.subr.msk.bf16.mxu0 %vm233_vm1, %v5290_v56  ;;  %1124 = vmatpush1.bf16.msra.mxu1 %v6335_v58 }
  0x97   :  { %5295 = vmatprep.subr.msk.bf16.mxu1 %vm233_vm1, %v5292_v59 }
  0x99   :  { %1089 = vmatpush2.bf16.msra.mxu0 %v1055_v61 }
  0x9a   :  { %1090 = vmatprep.subr.bf16.mxu0 %v6340_v62  ;;  %1132 = vmatpush2.bf16.msra.mxu1 %v1061_v0 }
  0x9b   :  { %1133 = vmatprep.subr.bf16.mxu1 %v6348_v2 }
  0x9d   :  { %1091 = vmatpush2.bf16.msra.mxu0 %v6338_v63 }
  0x9e   :  { %1092 = vmatprep.subr.bf16.mxu0 %v6345_v3  ;;  %1134 = vmatpush2.bf16.msra.mxu1 %v6346_v4 }
  0x9f   :  { %1135 = vmatprep.subr.bf16.mxu1 %v6354_v5 }
  0xa1   :  { %1093 = vmatpush2.bf16.msra.mxu0 %v6343_v6 }
  0xa2   :  { %1094 = vmatprep.subr.bf16.mxu0 %v6351_v7  ;;  %1136 = vmatpush2.bf16.msra.mxu1 %v6352_v8 }
  0xa3   :  { %1137 = vmatprep.subr.bf16.mxu1 %v6360_v9 }
  0xa5   :  { %1095 = vmatpush2.bf16.msra.mxu0 %v6349_v10 }
  0xa6   :  { %1096 = vmatprep.subr.bf16.mxu0 %v6357_v11  ;;  %1138 = vmatpush2.bf16.msra.mxu1 %v6358_v12 }
  0xa7   :  { %1139 = vmatprep.subr.bf16.mxu1 %v6366_v13 }
  0xa9   :  { %1097 = vmatpush2.bf16.msra.mxu0 %v6355_v14 }
  0xaa   :  { %1491 = vmatprep.subr.bf16.mxu0 %v6363_v15  ;;  %1140 = vmatpush2.bf16.msra.mxu1 %v6364_v18 }
  0xab   :  { %1534 = vmatprep.subr.bf16.mxu1 %v6372_v20 }
  0xac   :  { %1099 = vmatmul.mubr.bf16.vlgmr.msra.gmra.mxu0 %v7228_v40 }
  0xad   :  { %1492 = vmatpush1.bf16.msra.mxu0 %v6361_v21  ;;  %1142 = vmatmul.mubr.bf16.vlgmr.msra.gmra.mxu1 %v7228_v40  ;;  %v6382_v40 = vld [vmem:[%s9032_s26 + $0x238] ss:$16 sps:$4 sm:$0xff]  }
  0xae   :  { %1493 = vmatprep.subr.bf16.mxu0 %v6369_v22  ;;  %1535 = vmatpush1.bf16.msra.mxu1 %v6370_v23 }
  0xaf   :  { %1536 = vmatprep.subr.bf16.mxu1 %v6378_v24  ;;  %5400 = vmatprep.mubr.msk.bf16.mxu0 %vm229_vm0, %v7156_v19 }
  0xb0   :  { %5402 = vmatprep.mubr.msk.bf16.mxu1 %vm229_vm0, %v7156_v19  ;;  %v6388_v19 = vld [vmem:[%s9032_s26 + $0x218] ss:$16 sps:$4 sm:$0xff]  }
  0xb1   :  { %1494 = vmatpush1.bf16.msra.mxu0 %v6367_v25 }
  0xb2   :  { %1495 = vmatprep.subr.bf16.mxu0 %v6375_v26  ;;  %1537 = vmatpush1.bf16.msra.mxu1 %v6376_v27 }
  0xb3   :  { %1538 = vmatprep.subr.bf16.mxu1 %v6384_v28 }
  0xb5   :  { %1496 = vmatpush1.bf16.msra.mxu0 %v6373_v29 }
  0xb6   :  { %1497 = vmatprep.subr.bf16.mxu0 %v6381_v30  ;;  %1539 = vmatpush1.bf16.msra.mxu1 %v6382_v40 }
  0xb7   :  { %1540 = vmatprep.subr.bf16.mxu1 %v6390_v31 }
  0xb9   :  { %1498 = vmatpush1.bf16.msra.mxu0 %v6379_v32 }
  0xba   :  { %1499 = vmatprep.subr.bf16.mxu0 %v6387_v33  ;;  %1541 = vmatpush1.bf16.msra.mxu1 %v6388_v19 }
 0x103   :  { %v7594_v35 = vpop.f32.mrf.mxu0 }
 0x104   :  { %v7596_v36 = vpop.f32.mrf.mxu1 }
 0x105   :  { %v273_v38 = vpop.f32.mrf.mxu0 }
 0x106   :  { %v395_v41 = vpop.f32.mrf.mxu1 }
 0x107   :  { %v7601_v42 = vpop.f32.mrf.mxu0 }
 0x108   :  { %28 = vsyncpa [#allocation3], 0  ;;  %v7609_v45 = vpop.f32.mrf.mxu1  ;;  %1542 = vmatprep.subr.bf16.mxu1 %v6396_v34  ;;  %v6402_v47 = vld [vmem:[%s9032_s26 + $0x1dc] ss:$16 sps:$4 sm:$0xff]   ;;  %1500 = vmatpush1.bf16.msra.mxu0 %v6385_v37  ;;  %v6391_v51 = vld [vmem:[%s9032_s26 + $0x1d0] ss:$16 sps:$4 sm:$0xff]   ;;  %v394_v23 = vadd.f32 %v7596_v36, %v7594_v35 }
 0x109   :  { %v276_v48 = vpop.f32.mrf.mxu0  ;;  %1501 = vmatprep.subr.bf16.mxu0 %v6393_v43  ;;  %1543 = vmatpush1.bf16.msra.mxu1 %v6394_v44  ;;  %v6399_v52 = vld [vmem:[%s9032_s26 + $0x1b4] ss:$16 sps:$4 sm:$0xff]   ;;  %v6400_v53 = vld [vmem:[%s9032_s26 + $0x1d8] ss:$16 sps:$4 sm:$0xff]   ;;  %v6408_v54 = vld [vmem:[%s9032_s26 + $0x1bc] ss:$16 sps:$4 sm:$0xff]   ;;  %v397_v29 = vadd.f32 %v7609_v45, %v7601_v42 }
 0x10a   :  { %v398_v49 = vpop.f32.mrf.mxu1  ;;  %1544 = vmatprep.subr.bf16.mxu1 %v6402_v47  ;;  %v6397_v55 = vld [vmem:[%s9032_s26 + $0x1b0] ss:$16 sps:$4 sm:$0xff]   ;;  %v6405_v56 = vld [vmem:[%s9032_s26 + $0x194] ss:$16 sps:$4 sm:$0xff]   ;;  %v6406_v57 = vld [vmem:[%s9032_s26 + $0x1b8] ss:$16 sps:$4 sm:$0xff]  }
 0x10b   :  { %v5345_v58 = vld [vmem:[%s9032_s26 + $0x310] sm:$0x33]  ;;  %v6413_v59 = vld [vmem:[%s9032_s26 + $0x19c] ss:$16 sps:$4 sm:$0xff]   ;;  %v6411_v0 = vld [vmem:[%s9032_s26 + $0x198] ss:$16 sps:$4 sm:$0xff]  }
 0x10c   :  { %1502 = vmatpush1.bf16.msra.mxu0 %v6391_v51  ;;  %v5346_v60 = vld [vmem:[%s9032_s26 + $0x318] sm:$0x33]  ;;  %v6403_v61 = vld [vmem:[%s9032_s26 + $0x190] ss:$16 sps:$4 sm:$0xff]   ;;  %v5396_v62 = vcombine.high %v5345_v58, %v5345_v58  ;;  %v5395_v63 = vcombine.low %v5345_v58, %v5345_v58  ;;  %v6416_v5 = vld [vmem:[%s9032_s26 + $0x2f4] ss:$16 sps:$4 sm:$0xff]  }
 0x10d   :  { %1503 = vmatprep.subr.bf16.mxu0 %v6399_v52  ;;  %1545 = vmatpush1.bf16.msra.mxu1 %v6400_v53  ;;  %v5398_v2 = vcombine.high %v5346_v60, %v5346_v60  ;;  %v5397_v3 = vcombine.low %v5346_v60, %v5346_v60  ;;  %v6424_v7 = vld [vmem:[%s9032_s26 + $0x2fc] ss:$16 sps:$4 sm:$0xff]   ;;  %v6414_v8 = vld [vmem:[%s9032_s26 + $0x2f0] ss:$16 sps:$4 sm:$0xff]   ;;  %v6421_v9 = vld [vmem:[%s9032_s26 + $0x2d4] ss:$16 sps:$4 sm:$0xff]  }
 0x10e   :  { %1546 = vmatprep.subr.bf16.mxu1 %v6408_v54  ;;  %v1480_v4 = vsel %vm233_vm1, %v5395_v63, 0  ;;  %v6422_v10 = vld [vmem:[%s9032_s26 + $0x2f8] ss:$16 sps:$4 sm:$0xff]   ;;  %v6430_v11 = vld [vmem:[%s9032_s26 + $0x2dc] ss:$16 sps:$4 sm:$0xff]   ;;  %s9033_s2 = sld [smem:[#allocation9_spill]] }
 0x10f   :  { %v1486_v6 = vsel %vm233_vm1, %v5397_v3, 0  ;;  %v6419_v12 = vld [vmem:[%s9032_s26 + $0x2d0] ss:$16 sps:$4 sm:$0xff]   ;;  %v6427_v13 = vld [vmem:[%s9032_s26 + $0x2b4] ss:$16 sps:$4 sm:$0xff]   ;;  %vm709_vm2 = vcmask 64512  }
 0x110   :  { %1504 = vmatpush1.bf16.msra.mxu0 %v6397_v55  ;;  %v6428_v14 = vld [vmem:[%s9032_s26 + $0x2d8] ss:$16 sps:$4 sm:$0xff]   ;;  %v6436_v15 = vld [vmem:[%s9032_s26 + $0x2bc] ss:$16 sps:$4 sm:$0xff]   ;;  %v6425_v18 = vld [vmem:[%s9032_s26 + $0x2b0] ss:$16 sps:$4 sm:$0xff]  }
 0x111   :  { %1505 = vmatprep.subr.bf16.mxu0 %v6405_v56  ;;  %1547 = vmatpush1.bf16.msra.mxu1 %v6406_v57  ;;  %v6433_v20 = vld [vmem:[%s9032_s26 + $0x294] ss:$16 sps:$4 sm:$0xff]   ;;  %v6434_v21 = vld [vmem:[%s9032_s26 + $0x2b8] ss:$16 sps:$4 sm:$0xff]   ;;  %v6431_v22 = vld [vmem:[%s9032_s26 + $0x290] ss:$16 sps:$4 sm:$0xff]  }
 0x112   :  { %1548 = vmatprep.subr.bf16.mxu1 %v6413_v59  ;;  %v6439_v42 = vld [vmem:[%s9032_s26 + $0x404] ss:$16 sps:$4 sm:$0xff]   ;;  %v6437_v43 = vld [vmem:[%s9032_s26 + $0x400] ss:$16 sps:$4 sm:$0xff]   ;;  %v6442_v44 = vld [vmem:[%s9032_s26 + $0x29c] ss:$16 sps:$4 sm:$0xff]  }
 0x113   :  { %v6440_v45 = vld [vmem:[%s9032_s26 + $0x298] ss:$16 sps:$4 sm:$0xff]   ;;  %v6445_v47 = vld [vmem:[%s9032_s26 + $0x3e4] ss:$16 sps:$4 sm:$0xff]   ;;  %v6443_v48 = vld [vmem:[%s9032_s26 + $0x3e0] ss:$16 sps:$4 sm:$0xff]  }
 0x114   :  { %1506 = vmatpush1.bf16.msra.mxu0 %v6403_v61  ;;  %v5240_v28 = vld [vmem:[%s9033_s2] ss:$0 sm:$0xff]  ;;  %v6448_v49 = vld [vmem:[%s9032_s26 + $0x40c] ss:$16 sps:$4 sm:$0xff]   ;;  %v6446_v51 = vld [vmem:[%s9032_s26 + $0x408] ss:$16 sps:$4 sm:$0xff]  }
 0x115   :  { %5399 = vmatprep.subr.msk.bf16.mxu0 %vm233_vm1, %v5396_v62  ;;  %1549 = vmatpush1.bf16.msra.mxu1 %v6411_v0  ;;  %v6449_v52 = vld [vmem:[%s9032_s26 + $0x3c0] ss:$16 sps:$4 sm:$0xff]   ;;  %v6451_v53 = vld [vmem:[%s9032_s26 + $0x3c4] ss:$16 sps:$4 sm:$0xff]   ;;  %v6452_v54 = vld [vmem:[%s9032_s26 + $0x3e8] ss:$16 sps:$4 sm:$0xff]  }
 0x116   :  { %5401 = vmatprep.subr.msk.bf16.mxu1 %vm233_vm1, %v5398_v2  ;;  %v6454_v55 = vld [vmem:[%s9032_s26 + $0x3ec] ss:$16 sps:$4 sm:$0xff]   ;;  %v6455_v57 = vld [vmem:[%s9032_s26 + $0x3a0] ss:$16 sps:$4 sm:$0xff]   ;;  %v6463_v58 = vld [vmem:[%s9032_s26 + $0x384] ss:$16 sps:$4 sm:$0xff]  }
 0x117   :  { %v6460_v56 = vld [vmem:[%s9032_s26 + $0x3cc] ss:$16 sps:$4 sm:$0xff]   ;;  %v6461_v60 = vld [vmem:[%s9032_s26 + $0x380] ss:$16 sps:$4 sm:$0xff]   ;;  %v6464_v61 = vld [vmem:[%s9032_s26 + $0x3a8] ss:$16 sps:$4 sm:$0xff]  }
 0x118   :  { %1514 = vmatpush2.bf16.msra.mxu0 %v1480_v4  ;;  %v6466_v59 = vld [vmem:[%s9032_s26 + $0x3ac] ss:$16 sps:$4 sm:$0xff]   ;;  %v6467_v62 = vld [vmem:[%s9032_s26 + $0x360] ss:$16 sps:$4 sm:$0xff]   ;;  %v6469_v63 = vld [vmem:[%s9032_s26 + $0x364] ss:$16 sps:$4 sm:$0xff]  }
 0x119   :  { %1515 = vmatprep.subr.bf16.mxu0 %v6416_v5  ;;  %1557 = vmatpush2.bf16.msra.mxu1 %v1486_v6  ;;  %v6472_v0 = vld [vmem:[%s9032_s26 + $0x38c] ss:$16 sps:$4 sm:$0xff]   ;;  %v6470_v2 = vld [vmem:[%s9032_s26 + $0x388] ss:$16 sps:$4 sm:$0xff]   ;;  %v6473_v3 = vld [vmem:[%s9032_s26 + $0x340] ss:$16 sps:$4 sm:$0xff]  }
 0x11a   :  { %1558 = vmatprep.subr.bf16.mxu1 %v6424_v7  ;;  %v6475_v4 = vld [vmem:[%s9032_s26 + $0x344] ss:$16 sps:$4 sm:$0xff]   ;;  %v6478_v5 = vld [vmem:[%s9032_s26 + $0x36c] ss:$16 sps:$4 sm:$0xff]   ;;  %v6476_v7 = vld [vmem:[%s9032_s26 + $0x368] ss:$16 sps:$4 sm:$0xff]  }
 0x11b   :  { %v6481_v6 = vld [vmem:[%s9032_s26 + $0x324] ss:$16 sps:$4 sm:$0xff]   ;;  %s9034_s25 = sld [smem:[#allocation12_spill]]  ;;  %vm2863_vm3 = vcmask 31744   ;;  %vm6963_vm4 = vmmov 0  }
 0x11c   :  { %1516 = vmatpush2.bf16.msra.mxu0 %v6414_v8  ;;  %v5451_v8 = vld [vmem:[%s9032_s26 + $0x4a0] sm:$0x33]  ;;  %s9035_s6 = sld [smem:[#allocation10_spill]] }
 0x11d   :  { %1517 = vmatprep.subr.bf16.mxu0 %v6421_v9  ;;  %1559 = vmatpush2.bf16.msra.mxu1 %v6422_v10  ;;  %v6484_v9 = vld [vmem:[%s9032_s26 + $0x34c] ss:$16 sps:$4 sm:$0xff]   ;;  %v6479_v10 = vld [vmem:[%s9032_s26 + $0x320] ss:$16 sps:$4 sm:$0xff]   ;;  %s9038_s30 = sld [smem:[#allocation11_spill]] }
 0x11e   :  { %1560 = vmatprep.subr.bf16.mxu1 %v6430_v11  ;;  %v5502_v11 = vcombine.high %v5451_v8, %v5451_v8 }
 0x120   :  { %1518 = vmatpush2.bf16.msra.mxu0 %v6419_v12  ;;  %v5501_v12 = vcombine.low %v5451_v8, %v5451_v8 }
 0x121   :  { %1519 = vmatprep.subr.bf16.mxu0 %v6427_v13  ;;  %1561 = vmatpush2.bf16.msra.mxu1 %v6428_v14  ;;  %v6482_v13 = vld [vmem:[%s9032_s26 + $0x348] ss:$16 sps:$4 sm:$0xff]   ;;  %v6489_v14 = vld [vmem:[%s9032_s26 + $0x32c] ss:$16 sps:$4 sm:$0xff]  }
 0x122   :  { %1562 = vmatprep.subr.bf16.mxu1 %v6436_v15  ;;  %v5452_v15 = vld [vmem:[%s9032_s26 + $0x4a8] sm:$0x33] }
 0x124   :  { %1520 = vmatpush2.bf16.msra.mxu0 %v6425_v18  ;;  %v1911_v18 = vsel %vm233_vm1, %v5501_v12, 0 }
 0x125   :  { %1521 = vmatprep.subr.bf16.mxu0 %v6433_v20  ;;  %1563 = vmatpush2.bf16.msra.mxu1 %v6434_v21  ;;  %v6492_v20 = vld [vmem:[%s9032_s26 + $0x484] ss:$16 sps:$4 sm:$0xff]   ;;  %v6487_v21 = vld [vmem:[%s9032_s26 + $0x328] ss:$16 sps:$4 sm:$0xff]  }
 0x126   :  { %1564 = vmatprep.subr.bf16.mxu1 %v6442_v44  ;;  %v6516_v44 = vld [vmem:[%s9032_s26 + $0x428] ss:$16 sps:$4 sm:$0xff]  }
 0x128   :  { %1522 = vmatpush2.bf16.msra.mxu0 %v6431_v22  ;;  %v5504_v22 = vcombine.high %v5452_v15, %v5452_v15 }
 0x129   :  { %1922 = vmatprep.subr.bf16.mxu0 %v6439_v42  ;;  %1565 = vmatpush2.bf16.msra.mxu1 %v6440_v45  ;;  %v6513_v42 = vld [vmem:[%s9032_s26 + $0x590] ss:$16 sps:$4 sm:$0xff]   ;;  %v6524_v45 = vld [vmem:[%s9032_s26 + $0x59c] ss:$16 sps:$4 sm:$0xff]  }
 0x12a   :  { %1965 = vmatprep.subr.bf16.mxu1 %v6448_v49  ;;  %v6522_v49 = vld [vmem:[%s9032_s26 + $0x598] ss:$16 sps:$4 sm:$0xff]  }
 0x12b   :  { %1524 = vmatmul.mubr.bf16.vlgmr.msra.gmra.mxu0 %v7226_v39 }
 0x12c   :  { %5506 = vmatprep.mubr.msk.bf16.mxu0 %vm229_vm0, %v7249_v46  ;;  %1923 = vmatpush1.bf16.msra.mxu0 %v6437_v43  ;;  %v6521_v43 = vld [vmem:[%s9032_s26 + $0x574] ss:$16 sps:$4 sm:$0xff]  }
 0x12d   :  { %1924 = vmatprep.subr.bf16.mxu0 %v6445_v47  ;;  %1567 = vmatmul.mubr.bf16.vlgmr.msra.gmra.mxu1 %v7226_v39  ;;  %v6457_v39 = vld [vmem:[%s9032_s26 + $0x3a4] ss:$16 sps:$4 sm:$0xff]   ;;  %v6519_v47 = vld [vmem:[%s9032_s26 + $0x570] ss:$16 sps:$4 sm:$0xff]  }
 0x12e   :  { %1966 = vmatpush1.bf16.msra.mxu1 %v6446_v51  ;;  %5508 = vmatprep.mubr.msk.bf16.mxu1 %vm229_vm0, %v7249_v46  ;;  %v6458_v46 = vld [vmem:[%s9032_s26 + $0x3c8] ss:$16 sps:$4 sm:$0xff]   ;;  %v6530_v51 = vld [vmem:[%s9032_s26 + $0x57c] ss:$16 sps:$4 sm:$0xff]  }
 0x12f   :  { %1967 = vmatprep.subr.bf16.mxu1 %v6454_v55  ;;  %v6536_v55 = vld [vmem:[%s9032_s26 + $0x55c] ss:$16 sps:$4 sm:$0xff]  }
 0x130   :  { %1925 = vmatpush1.bf16.msra.mxu0 %v6443_v48  ;;  %v6527_v48 = vld [vmem:[%s9032_s26 + $0x554] ss:$16 sps:$4 sm:$0xff]  }
 0x131   :  { %1926 = vmatprep.subr.bf16.mxu0 %v6451_v53  ;;  %v6533_v53 = vld [vmem:[%s9032_s26 + $0x534] ss:$16 sps:$4 sm:$0xff]  }
 0x132   :  { %1968 = vmatpush1.bf16.msra.mxu1 %v6452_v54  ;;  %v6528_v54 = vld [vmem:[%s9032_s26 + $0x578] ss:$16 sps:$4 sm:$0xff]  }
 0x133   :  { %1969 = vmatprep.subr.bf16.mxu1 %v6460_v56  ;;  %v6542_v56 = vld [vmem:[%s9032_s26 + $0x53c] ss:$16 sps:$4 sm:$0xff]  }
 0x134   :  { %1927 = vmatpush1.bf16.msra.mxu0 %v6449_v52  ;;  %v6525_v52 = vld [vmem:[%s9032_s26 + $0x550] ss:$16 sps:$4 sm:$0xff]  }
 0x135   :  { %1928 = vmatprep.subr.bf16.mxu0 %v6457_v39  ;;  %v6539_v39 = vld [vmem:[%s9032_s26 + $0x514] ss:$16 sps:$4 sm:$0xff]  }
 0x136   :  { %1970 = vmatpush1.bf16.msra.mxu1 %v6458_v46  ;;  %v6540_v46 = vld [vmem:[%s9032_s26 + $0x538] ss:$16 sps:$4 sm:$0xff]  }
 0x137   :  { %v541_v24 = vpop.f32.mrf.mxu0  ;;  %1971 = vmatprep.subr.bf16.mxu1 %v6466_v59  ;;  %v6548_v59 = vld [vmem:[%s9032_s26 + $0x51c] ss:$16 sps:$4 sm:$0xff]  }
 0x138   :  { %v548_v25 = vadd.f32 %v541_v24, %v394_v23  ;;  %v691_v26 = vpop.f32.mrf.mxu1  ;;  %1929 = vmatpush1.bf16.msra.mxu0 %v6455_v57  ;;  %v5503_v23 = vcombine.low %v5452_v15, %v5452_v15  ;;  %v6490_v24 = vld [vmem:[%s9032_s26 + $0x480] ss:$16 sps:$4 sm:$0xff]  }
 0x139   :  { %v543_v27 = vpop.f32.mrf.mxu0  ;;  %1930 = vmatprep.subr.bf16.mxu0 %v6463_v58  ;;  %v6537_v57 = vld [vmem:[%s9032_s26 + $0x510] ss:$16 sps:$4 sm:$0xff]   ;;  %v6545_v58 = vld [vmem:[%s9032_s26 + $0x4f4] ss:$16 sps:$4 sm:$0xff]  }
 0x13a   :  { %v698_v30 = vadd.f32 %v691_v26, %v548_v25  ;;  %v693_v40 = vpop.f32.mrf.mxu1  ;;  %1972 = vmatpush1.bf16.msra.mxu1 %v6464_v61  ;;  %v6497_v25 = vld [vmem:[%s9032_s26 + $0x464] ss:$16 sps:$4 sm:$0xff]   ;;  %v1917_v26 = vsel %vm233_vm1, %v5503_v23, 0  ;;  %v6500_v27 = vld [vmem:[%s9032_s26 + $0x48c] ss:$16 sps:$4 sm:$0xff]  }
 0x13b   :  { %v544_v31 = vpop.f32.mrf.mxu0  ;;  %1973 = vmatprep.subr.bf16.mxu1 %v6472_v0  ;;  %v6506_v40 = vld [vmem:[%s9032_s26 + $0x46c] ss:$16 sps:$4 sm:$0xff]   ;;  %v6551_v61 = vld [vmem:[%s9032_s26 + $0x4d4] ss:$16 sps:$4 sm:$0xff]   ;;  %v6549_v0 = vld [vmem:[%s9032_s26 + $0x4d0] ss:$16 sps:$4 sm:$0xff]  }
 0x13c   :  { %v549_v32 = vadd.f32 %v544_v31, %v397_v29  ;;  %v694_v33 = vpop.f32.mrf.mxu1  ;;  %v7706_v19 = vadd.f32 %v5240_v28, %v698_v30  ;;  %1931 = vmatpush1.bf16.msra.mxu0 %v6461_v60  ;;  %v6503_v29 = vld [vmem:[%s9032_s26 + $0x444] ss:$16 sps:$4 sm:$0xff]   ;;  %v6498_v30 = vld [vmem:[%s9032_s26 + $0x488] ss:$16 sps:$4 sm:$0xff]   ;;  %v6501_v31 = vld [vmem:[%s9032_s26 + $0x440] ss:$16 sps:$4 sm:$0xff]  }
 0x13d   :  { %v546_v34 = vpop.f32.mrf.mxu0  ;;  %1932 = vmatprep.subr.bf16.mxu0 %v6469_v63  ;;  %v6543_v60 = vld [vmem:[%s9032_s26 + $0x4f0] ss:$16 sps:$4 sm:$0xff]   ;;  %v6554_v63 = vld [vmem:[%s9032_s26 + $0x4fc] ss:$16 sps:$4 sm:$0xff]  }
 0x13e   :  { %v699_v35 = vadd.f32 %v694_v33, %v549_v32  ;;  %v696_v36 = vpop.f32.mrf.mxu1  ;;  %v710_v37 = vsel %vm709_vm2, %v7706_v19, -inf  ;;  %1974 = vmatpush1.bf16.msra.mxu1 %v6470_v2  ;;  %v6509_v32 = vld [vmem:[%s9032_s26 + $0x424] ss:$16 sps:$4 sm:$0xff]   ;;  %v6504_v33 = vld [vmem:[%s9032_s26 + $0x468] ss:$16 sps:$4 sm:$0xff]  }
 0x13f   :  { %711 = vmax.xlane.f32.xlu0 %v710_v37  ;;  %1975 = vmatprep.subr.bf16.mxu1 %v6478_v5  ;;  %v6512_v34 = vld [vmem:[%s9032_s26 + $0x44c] ss:$16 sps:$4 sm:$0xff]   ;;  %v6515_v36 = vld [vmem:[%s9032_s26 + $0x594] ss:$16 sps:$4 sm:$0xff]   ;;  %v6510_v37 = vld [vmem:[%s9032_s26 + $0x448] ss:$16 sps:$4 sm:$0xff]  }
 0x140   :  { %v7710_v38 = vadd.f32 %v5240_v28, %v699_v35  ;;  %1933 = vmatpush1.bf16.msra.mxu0 %v6467_v62  ;;  %v6495_v28 = vld [vmem:[%s9032_s26 + $0x460] ss:$16 sps:$4 sm:$0xff]   ;;  %v6546_v62 = vld [vmem:[%s9032_s26 + $0x518] ss:$16 sps:$4 sm:$0xff]   ;;  %v6557_v2 = vld [vmem:[%s9032_s26 + $0x4b4] ss:$16 sps:$4 sm:$0xff]  }
 0x141   :  { %1934 = vmatprep.subr.bf16.mxu0 %v6475_v4  ;;  %v6507_v35 = vld [vmem:[%s9032_s26 + $0x420] ss:$16 sps:$4 sm:$0xff]   ;;  %v6560_v5 = vld [vmem:[%s9032_s26 + $0x4dc] ss:$16 sps:$4 sm:$0xff]  }
 0x142   :  { %v713_v41 = vsel %vm709_vm2, %v7710_v38, -inf  ;;  %1976 = vmatpush1.bf16.msra.mxu1 %v6476_v7  ;;  %v5557_v4 = vld [vmem:[%s9032_s26 + $0x630] sm:$0x33]  ;;  %v6576_v23 = vld [vmem:[%s9032_s26 + $0x61c] ss:$16 sps:$4 sm:$0xff]  }
 0x143   :  { %714 = vmax.xlane.f32.xlu0 %v713_v41  ;;  %1977 = vmatprep.subr.bf16.mxu1 %v6484_v9  ;;  %v6518_v41 = vld [vmem:[%s9032_s26 + $0x42c] ss:$16 sps:$4 sm:$0xff]   ;;  %v5608_v7 = vcombine.high %v5557_v4, %v5557_v4  ;;  %v5607_v8 = vcombine.low %v5557_v4, %v5557_v4  ;;  %v6558_v9 = vld [vmem:[%s9032_s26 + $0x4d8] ss:$16 sps:$4 sm:$0xff]  }
 0x144   :  { %1935 = vmatpush1.bf16.msra.mxu0 %v6473_v3  ;;  %v6552_v3 = vld [vmem:[%s9032_s26 + $0x4f8] ss:$16 sps:$4 sm:$0xff]  }
 0x145   :  { %1936 = vmatprep.subr.bf16.mxu0 %v6481_v6  ;;  %v6555_v6 = vld [vmem:[%s9032_s26 + $0x4b0] ss:$16 sps:$4 sm:$0xff]   ;;  %v2342_v12 = vsel %vm233_vm1, %v5607_v8, 0  ;;  %v6603_v4 = vld [vmem:[%s9034_s25 + $0xe8] sm:$0xff]  }
 0x146   :  { %1978 = vmatpush1.bf16.msra.mxu1 %v6482_v13  ;;  %v6568_v13 = vld [vmem:[%s9032_s26 + $0x614] ss:$16 sps:$4 sm:$0xff]  }
 0x147   :  { %1979 = vmatprep.subr.bf16.mxu1 %v6489_v14  ;;  %v6563_v14 = vld [vmem:[%s9032_s26 + $0x4b8] ss:$16 sps:$4 sm:$0xff]   ;;  %v6607_v8 = vld [vmem:[%s9034_s25 + $0xe0] sm:$0xff]  }
 0x148   :  { %1937 = vmatpush1.bf16.msra.mxu0 %v6479_v10  ;;  %v6565_v10 = vld [vmem:[%s9032_s26 + $0x4bc] ss:$16 sps:$4 sm:$0xff]  }
 0x149   :  { %5505 = vmatprep.subr.msk.bf16.mxu0 %vm233_vm1, %v5502_v11  ;;  %v5558_v11 = vld [vmem:[%s9032_s26 + $0x638] sm:$0x33] }
 0x14a   :  { %1980 = vmatpush1.bf16.msra.mxu1 %v6487_v21  ;;  %v5610_v15 = vcombine.high %v5558_v11, %v5558_v11  ;;  %v6573_v21 = vld [vmem:[%s9032_s26 + $0x5f4] ss:$16 sps:$4 sm:$0xff]  }
 0x14b   :  { %5507 = vmatprep.subr.msk.bf16.mxu1 %vm233_vm1, %v5504_v22 }
 0x14c   :  { %1945 = vmatpush2.bf16.msra.mxu0 %v1911_v18  ;;  %v5609_v18 = vcombine.low %v5558_v11, %v5558_v11  ;;  %v6610_v11 = vld [vmem:[%s9034_s25 + $0x50] sm:$0xff]  }
 0x14d   :  { %1946 = vmatprep.subr.bf16.mxu0 %v6492_v20  ;;  %v6566_v20 = vld [vmem:[%s9032_s26 + $0x610] ss:$16 sps:$4 sm:$0xff]  }
 0x14e   :  { %1988 = vmatpush2.bf16.msra.mxu1 %v1917_v26  ;;  %v2348_v22 = vsel %vm233_vm1, %v5609_v18, 0  ;;  %v6574_v26 = vld [vmem:[%s9032_s26 + $0x618] ss:$16 sps:$4 sm:$0xff]   ;;  %v6615_v18 = vld [vmem:[%s9034_s25 + $0xd0] sm:$0xff]  }
 0x14f   :  { %1989 = vmatprep.subr.bf16.mxu1 %v6500_v27  ;;  %v6582_v27 = vld [vmem:[%s9032_s26 + $0x5fc] ss:$16 sps:$4 sm:$0xff]  }
 0x150   :  { %1947 = vmatpush2.bf16.msra.mxu0 %v6490_v24  ;;  %v6571_v24 = vld [vmem:[%s9032_s26 + $0x5f0] ss:$16 sps:$4 sm:$0xff]  }
 0x151   :  { %1948 = vmatprep.subr.bf16.mxu0 %v6497_v25  ;;  %v6579_v25 = vld [vmem:[%s9032_s26 + $0x5d4] ss:$16 sps:$4 sm:$0xff]  }
 0x152   :  { %1990 = vmatpush2.bf16.msra.mxu1 %v6498_v30  ;;  %v6580_v30 = vld [vmem:[%s9032_s26 + $0x5f8] ss:$16 sps:$4 sm:$0xff]  }
 0x153   :  { %1991 = vmatprep.subr.bf16.mxu1 %v6506_v40  ;;  %v6588_v40 = vld [vmem:[%s9032_s26 + $0x5dc] ss:$16 sps:$4 sm:$0xff]  }
 0x154   :  { %1949 = vmatpush2.bf16.msra.mxu0 %v6495_v28  ;;  %v6577_v28 = vld [vmem:[%s9032_s26 + $0x5d0] ss:$16 sps:$4 sm:$0xff]  }
 0x155   :  { %1950 = vmatprep.subr.bf16.mxu0 %v6503_v29  ;;  %v6585_v29 = vld [vmem:[%s9032_s26 + $0x5b4] ss:$16 sps:$4 sm:$0xff]  }
 0x156   :  { %1992 = vmatpush2.bf16.msra.mxu1 %v6504_v33  ;;  %v6591_v33 = vld [vmem:[%s9032_s26 + $0x5bc] ss:$16 sps:$4 sm:$0xff]  }
 0x157   :  { %1993 = vmatprep.subr.bf16.mxu1 %v6512_v34  ;;  %v6589_v34 = vld [vmem:[%s9032_s26 + $0x5b8] ss:$16 sps:$4 sm:$0xff]  }
 0x158   :  { %1951 = vmatpush2.bf16.msra.mxu0 %v6501_v31  ;;  %v6583_v31 = vld [vmem:[%s9032_s26 + $0x5b0] ss:$16 sps:$4 sm:$0xff]  }
 0x159   :  { %1952 = vmatprep.subr.bf16.mxu0 %v6509_v32  ;;  %v6586_v32 = vld [vmem:[%s9032_s26 + $0x5d8] ss:$16 sps:$4 sm:$0xff]  }
 0x15a   :  { %1994 = vmatpush2.bf16.msra.mxu1 %v6510_v37 }
 0x15b   :  { %1995 = vmatprep.subr.bf16.mxu1 %v6518_v41 }
 0x15c   :  { %1953 = vmatpush2.bf16.msra.mxu0 %v6507_v35 }
 0x15d   :  { %2353 = vmatprep.subr.bf16.mxu0 %v6515_v36 }
 0x15e   :  { %1996 = vmatpush2.bf16.msra.mxu1 %v6516_v44 }
 0x15f   :  { %1955 = vmatmul.mubr.bf16.vlgmr.msra.gmra.mxu0 %v7370_v16  ;;  %2396 = vmatprep.subr.bf16.mxu1 %v6524_v45 }
 0x160   :  { %2354 = vmatpush1.bf16.msra.mxu0 %v6513_v42  ;;  %5612 = vmatprep.mubr.msk.bf16.mxu0 %vm229_vm0, %v7261_v50 }
 0x161   :  { %2355 = vmatprep.subr.bf16.mxu0 %v6521_v43  ;;  %1998 = vmatmul.mubr.bf16.vlgmr.msra.gmra.mxu1 %v7370_v16  ;;  %v6531_v16 = vld [vmem:[%s9032_s26 + $0x530] ss:$16 sps:$4 sm:$0xff]  }
 0x162   :  { %2397 = vmatpush1.bf16.msra.mxu1 %v6522_v49  ;;  %5614 = vmatprep.mubr.msk.bf16.mxu1 %vm229_vm0, %v7261_v50  ;;  %v6534_v50 = vld [vmem:[%s9032_s26 + $0x558] ss:$16 sps:$4 sm:$0xff]   ;;  %v6955_v49 = vmov 1   ;;  %s9036_s26 = sld [smem:[#allocation7_spill]] }
 0x163   :  { %2398 = vmatprep.subr.bf16.mxu1 %v6530_v51  ;;  %6175 = vset.pattern.permute.xlu1 %v6955_v49 }
 0x164   :  { %2356 = vmatpush1.bf16.msra.mxu0 %v6519_v47 }
 0x165   :  { %2357 = vmatprep.subr.bf16.mxu0 %v6527_v48 }
 0x166   :  { %2399 = vmatpush1.bf16.msra.mxu1 %v6528_v54 }
 0x167   :  { %2400 = vmatprep.subr.bf16.mxu1 %v6536_v55 }
 0x168   :  { %2358 = vmatpush1.bf16.msra.mxu0 %v6525_v52 }
 0x169   :  { %2359 = vmatprep.subr.bf16.mxu0 %v6533_v53  ;;  %v6957_v53 = vmov 2  }
 0x16a   :  { %2401 = vmatpush1.bf16.msra.mxu1 %v6534_v50  ;;  %v9012_v50 = vmov 7  }
 0x16b   :  { %2402 = vmatprep.subr.bf16.mxu1 %v6542_v56  ;;  %v9014_v56 = vmov 5  }
 0x16c   :  { %2360 = vmatpush1.bf16.msra.mxu0 %v6531_v16  ;;  %v9016_v16 = vmov 4  }
 0x16d   :  { %2361 = vmatprep.subr.bf16.mxu0 %v6539_v39  ;;  %v9020_v39 = vmov 3  }
 0x16e   :  { %2403 = vmatpush1.bf16.msra.mxu1 %v6540_v46  ;;  %v6594_v46 = vld [vmem:[%s9034_s25 + $0x70] sm:$0xff]  }
 0x16f   :  { %2404 = vmatprep.subr.bf16.mxu1 %v6548_v59  ;;  %v6595_v59 = vld [vmem:[%s9034_s25 + $0xf8] sm:$0xff]  }
 0x170   :  { %2362 = vmatpush1.bf16.msra.mxu0 %v6537_v57  ;;  %v6592_v57 = vld [vmem:[%s9034_s25 + $0x78] sm:$0xff]  }
 0x171   :  { %2363 = vmatprep.subr.bf16.mxu0 %v6545_v58  ;;  %v6593_v58 = vld [vmem:[%s9034_s25 + $0x38] sm:$0xff]  }
 0x172   :  { %2405 = vmatpush1.bf16.msra.mxu1 %v6546_v62  ;;  %v6598_v62 = vld [vmem:[%s9034_s25 + $0x68] sm:$0xff]  }
 0x173   :  { %2406 = vmatprep.subr.bf16.mxu1 %v6554_v63  ;;  %v6599_v63 = vld [vmem:[%s9034_s25 + $0xf0] sm:$0xff]  }
 0x174   :  { %2364 = vmatpush1.bf16.msra.mxu0 %v6543_v60  ;;  %v6596_v60 = vld [vmem:[%s9034_s25 + $0x30] sm:$0xff]  }
 0x175   :  { %2365 = vmatprep.subr.bf16.mxu0 %v6551_v61  ;;  %v6597_v61 = vld [vmem:[%s9034_s25 + $0xb8] sm:$0xff]  }
 0x176   :  { %2407 = vmatpush1.bf16.msra.mxu1 %v6552_v3  ;;  %v6602_v3 = vld [vmem:[%s9034_s25 + $0x60] sm:$0xff]  }
 0x177   :  { %2408 = vmatprep.subr.bf16.mxu1 %v6560_v5  ;;  %v6604_v5 = vld [vmem:[%s9034_s25 + $0x20] sm:$0xff]  }
 0x178   :  { %2366 = vmatpush1.bf16.msra.mxu0 %v6549_v0  ;;  %v6600_v0 = vld [vmem:[%s9034_s25 + $0x28] sm:$0xff]  }
 0x179   :  { %2367 = vmatprep.subr.bf16.mxu0 %v6557_v2  ;;  %v6601_v2 = vld [vmem:[%s9034_s25 + $0xb0] sm:$0xff]  }
 0x17a   :  { %2409 = vmatpush1.bf16.msra.mxu1 %v6558_v9  ;;  %v6608_v9 = vld [vmem:[%s9034_s25 + $0x18] sm:$0xff]  }
 0x17b   :  { %2410 = vmatprep.subr.bf16.mxu1 %v6565_v10  ;;  %v6609_v10 = vld [vmem:[%s9034_s25 + $0xa0] sm:$0xff]  }
 0x17c   :  { %2368 = vmatpush1.bf16.msra.mxu0 %v6555_v6  ;;  %v6605_v6 = vld [vmem:[%s9034_s25 + $0xa8] sm:$0xff]  }
 0x17d   :  { %5611 = vmatprep.subr.msk.bf16.mxu0 %vm233_vm1, %v5608_v7  ;;  %v6606_v7 = vld [vmem:[%s9034_s25 + $0x58] sm:$0xff]  }
 0x17e   :  { %2411 = vmatpush1.bf16.msra.mxu1 %v6563_v14  ;;  %v6613_v14 = vld [vmem:[%s9034_s25 + $0x98] sm:$0xff]  }
 0x17f   :  { %5613 = vmatprep.subr.msk.bf16.mxu1 %vm233_vm1, %v5610_v15  ;;  %v6614_v15 = vld [vmem:[%s9034_s25 + $0x48] sm:$0xff]  }
 0x180   :  { %2376 = vmatpush2.bf16.msra.mxu0 %v2342_v12  ;;  %v6611_v12 = vld [vmem:[%s9034_s25 + $0xd8] sm:$0xff]  }
 0x181   :  { %2377 = vmatprep.subr.bf16.mxu0 %v6568_v13  ;;  %v6612_v13 = vld [vmem:[%s9034_s25 + $0x10] sm:$0xff]  }
 0x182   :  { %2419 = vmatpush2.bf16.msra.mxu1 %v2348_v22  ;;  %v6618_v22 = vld [vmem:[%s9034_s25 + $0x40] sm:$0xff]  }
 0x183   :  { %2420 = vmatprep.subr.bf16.mxu1 %v6576_v23  ;;  %v6619_v23 = vld [vmem:[%s9034_s25 + $0xc8] sm:$0xff]  }
 0x184   :  { %2378 = vmatpush2.bf16.msra.mxu0 %v6566_v20  ;;  %v6616_v20 = vld [vmem:[%s9034_s25 + $0x8] sm:$0xff]  }
 0x185   :  { %2379 = vmatprep.subr.bf16.mxu0 %v6573_v21  ;;  %v6617_v21 = vld [vmem:[%s9034_s25 + $0x90] sm:$0xff]  }
 0x186   :  { %2421 = vmatpush2.bf16.msra.mxu1 %v6574_v26  ;;  %v6624_v26 = vld [vmem:[%s9035_s6 + $0x174] ss:$8 sps:$4 sm:$0xff]  }
 0x187   :  { %2422 = vmatprep.subr.bf16.mxu1 %v6582_v27  ;;  %v6625_v27 = vld [vmem:[%s9034_s25 + $0xc0] sm:$0xff]  }
 0x188   :  { %2380 = vmatpush2.bf16.msra.mxu0 %v6571_v24  ;;  %v6620_v24 = vld [vmem:[%s9034_s25] sm:$0xff]  }
 0x189   :  { %2381 = vmatprep.subr.bf16.mxu0 %v6579_v25  ;;  %v6621_v25 = vld [vmem:[%s9034_s25 + $0x88] sm:$0xff]  }
 0x18a   :  { %2423 = vmatpush2.bf16.msra.mxu1 %v6580_v30  ;;  %v1143_v30 = vpop.f32.mrf.mxu1 }
 0x18b   :  { %2424 = vmatprep.subr.bf16.mxu1 %v6588_v40  ;;  %v1100_v40 = vpop.f32.mrf.mxu0 }
 0x18c   :  { %2382 = vmatpush2.bf16.msra.mxu0 %v6577_v28  ;;  %v6626_v28 = vld [vmem:[%s9034_s25 + $0x80] sm:$0xff]  }
 0x18d   :  { %2383 = vmatprep.subr.bf16.mxu0 %v6585_v29  ;;  %v6632_v29 = vld [vmem:[%s9035_s6 + $0x74] ss:$8 sps:$4 sm:$0xff]  }
 0x18e   :  { %2425 = vmatpush2.bf16.msra.mxu1 %v6586_v32  ;;  %v1102_v32 = vpop.f32.mrf.mxu0 }
 0x18f   :  { %2426 = vmatprep.subr.bf16.mxu1 %v6591_v33 }
 0x190   :  { %2384 = vmatpush2.bf16.msra.mxu0 %v6583_v31  ;;  %v1145_v31 = vpop.f32.mrf.mxu1 }
 0x191   :  { %5914 = vmatprep.subr.bf16.mxu0 %v6595_v59 }
 0x192   :  { %2427 = vmatpush2.bf16.msra.mxu1 %v6589_v34  ;;  %v1147_v33 = vpop.f32.mrf.mxu1  ;;  %v1104_v34 = vpop.f32.mrf.mxu0 }
 0x193   :  { %2386 = vmatmul.mubr.bf16.vlgmr.msra.gmra.mxu0 %v7372_v17  ;;  %5936 = vmatprep.subr.bf16.mxu1 %v6592_v57 }
 0x194   :  { %5915 = vmatpush3.bf16.msra.mxu0 %v6597_v61 }
 0x195   :  { %2429 = vmatmul.mubr.bf16.vlgmr.msra.gmra.mxu1 %v7372_v17  ;;  %5916 = vmatprep.subr.bf16.mxu0 %v6599_v63 }
 0x196   :  { %5937 = vmatpush3.bf16.msra.mxu1 %v6593_v58 }
 0x197   :  { %5938 = vmatprep.subr.bf16.mxu1 %v6594_v46 }
 0x198   :  { %5917 = vmatpush3.bf16.msra.mxu0 %v6601_v2  ;;  %v732_v2 = vld [vmem:[%s9036_s26] sm:$0xf] }
 0x199   :  { %5918 = vmatprep.subr.bf16.mxu0 %v6603_v4 }
 0x19a   :  { %5939 = vmatpush3.bf16.msra.mxu1 %v6596_v60 }
 0x19b   :  { %5940 = vmatprep.subr.bf16.mxu1 %v6598_v62 }
 0x19c   :  { %5919 = vmatpush3.bf16.msra.mxu0 %v6605_v6 }
 0x19d   :  { %5920 = vmatprep.subr.bf16.mxu0 %v6607_v8 }
 0x19e   :  { %5941 = vmatpush3.bf16.msra.mxu1 %v6600_v0 }
 0x19f   :  { %5942 = vmatprep.subr.bf16.mxu1 %v6602_v3 }
 0x1a0   :  { %5921 = vmatpush3.bf16.msra.mxu0 %v6609_v10 }
 0x1a1   :  { %5922 = vmatprep.subr.bf16.mxu0 %v6611_v12 }
 0x1a2   :  { %5943 = vmatpush3.bf16.msra.mxu1 %v6604_v5 }
 0x1a3   :  { %5944 = vmatprep.subr.bf16.mxu1 %v6606_v7 }
 0x1a4   :  { %5923 = vmatpush3.bf16.msra.mxu0 %v6613_v14 }
 0x1a5   :  { %5924 = vmatprep.subr.bf16.mxu0 %v6615_v18 }
 0x1a6   :  { %5945 = vmatpush3.bf16.msra.mxu1 %v6608_v9 }
 0x1a7   :  { %5946 = vmatprep.subr.bf16.mxu1 %v6610_v11 }
 0x1a8   :  { %5925 = vmatpush3.bf16.msra.mxu0 %v6617_v21 }
 0x1a9   :  { %5926 = vmatprep.subr.bf16.mxu0 %v6619_v23 }
 0x1aa   :  { %5947 = vmatpush3.bf16.msra.mxu1 %v6612_v13 }
 0x1ab   :  { %5948 = vmatprep.subr.bf16.mxu1 %v6614_v15 }
 0x1ac   :  { %5927 = vmatpush3.bf16.msra.mxu0 %v6621_v25 }
 0x1ad   :  { %5928 = vmatprep.subr.bf16.mxu0 %v6625_v27 }
 0x1ae   :  { %5949 = vmatpush3.bf16.msra.mxu1 %v6616_v20 }
 0x1af   :  { %5950 = vmatprep.subr.bf16.mxu1 %v6618_v22 }
 0x1b0   :  { %5929 = vmatpush3.bf16.msra.mxu0 %v6626_v28 }
 0x1b1   :  { %3090 = vmatprep.subr.bf16.mxu0 %v6632_v29 }
 0x1b2   :  { %5951 = vmatpush3.bf16.msra.mxu1 %v6620_v24 }
 0x1b3   :  { %3348 = vmatprep.subr.bf16.mxu1 %v6624_v26 }
 0x1c8   :  { %v712_v35 = vpop.xlane.xlu0 %711 }
 0x1c9   :  { %v716_v36 = vsub.f32 %v7706_v19, %v712_v35  ;;  %v1149_v35 = vpop.f32.mrf.mxu1 }
 0x1cb   :  { %v718_v37 = vmul.f32 1.442695, %v716_v36 }
 0x1cc   :  { %v715_v41 = vpop.xlane.xlu0 %714 }
 0x1cd   :  { %6848 = vpow2.f32 %v718_v37  ;;  %v717_v42 = vsub.f32 %v7710_v38, %v715_v41  ;;  %v9010_v38 = vmov 6   ;;  %v1106_v37 = vpop.f32.mrf.mxu0 }
 0x1cf   :  { %v720_v43 = vmul.f32 1.442695, %v717_v42 }
 0x1d1   :  { %6850 = vpow2.f32 %v720_v43 }
 0x1da   :  { %v6849_v44 = vpop.eup %6848 }
 0x1db   :  { %v722_v45 = vsel %vm709_vm2, %v6849_v44, 0.0 }
 0x1dc   :  { %723 = vadd.xlane.f32.xlu1 %v722_v45 }
 0x1de   :  { %v6851_v47 = vpop.eup %6850 }
 0x1df   :  { %v725_v48 = vsel %vm709_vm2, %v6851_v47, 0.0 }
 0x1e0   :  { %726 = vadd.xlane.f32.xlu1 %v725_v48 }
 0x1eb   :  { %v1525_v42 = vpop.f32.mrf.mxu0 }
 0x1ed   :  { %v1568_v36 = vpop.f32.mrf.mxu1  ;;  %v1527_v45 = vpop.f32.mrf.mxu0 }
 0x1ef   :  { %v1570_v43 = vpop.f32.mrf.mxu1  ;;  %v1529_v48 = vpop.f32.mrf.mxu0 }
 0x265   :  { %v724_v17 = vpop.xlane.xlu1 %723 }
 0x266   :  { %6852 = vrcp.f32 %v724_v17 }
 0x269   :  { %v727_v19 = vpop.xlane.xlu1 %726 }
 0x26a   :  { %6854 = vrcp.f32 %v727_v19 }
 0x273   :  { %v6853_v51 = vpop.eup %6852 }
 0x274   :  { %v8044_v52 = vmul.f32 %v6853_v51, %v6849_v44 }
 0x276   :  { %1154 = vperm.xlu0 %6174, %v8044_v52   ;;  %1167 = vperm.xlu1 %6175, %v8044_v52  }
 0x277   :  { %v6855_v54 = vpop.eup %6854 }
 0x278   :  { %v731_v55 = vmul.f32 %v6855_v54, %v6851_v47  ;;  %v1572_v47 = vpop.f32.mrf.mxu1 }
 0x27a   :  { %6180 = vset.pattern.permute.xlu0 %v9010_v38  ;;  %6176 = vset.pattern.permute.xlu1 %v6957_v53  ;;  %v1574_v19 = vpop.f32.mrf.mxu1 }
 0x27b   :  { %2440 = vperm.xlu0 %6180, %v8044_v52   ;;  %1578 = vperm.xlu1 %6176, %v8044_v52  }
 0x27c   :  { %v1999_v51 = vpop.f32.mrf.mxu1 }
 0x27e   :  { %v2001_v58 = vpop.f32.mrf.mxu1 }
 0x27f   :  { %6185 = vset.pattern.permute.xlu0 %v9016_v16  ;;  %6177 = vset.pattern.permute.xlu1 %v9020_v39 }
 0x280   :  { %1590 = vperm.xlu1 %6177, %v8044_v52   ;;  %2013 = vperm.xlu0 %6185, %v731_v55   ;;  %v2003_v61 = vpop.f32.mrf.mxu1 }
 0x282   :  { %v2005_v4 = vpop.f32.mrf.mxu1 }
 0x284   :  { %6178 = vset.pattern.permute.xlu1 %v9016_v16  ;;  %6189 = vset.pattern.permute.xlu0 %v9012_v50  ;;  %v8195_v8 = vpop.f32.mrf.mxu1 }
 0x285   :  { %2009 = vperm.xlu1 %6178, %v8044_v52   ;;  %2456 = vperm.xlu0 %6189, %v731_v55  }
 0x286   :  { %v8208_v18 = vpop.f32.mrf.mxu1 }
 0x289   :  { %6179 = vset.pattern.permute.xlu1 %v9014_v56  ;;  %6191 = vset.pattern.permute.xlu0 %v9018_v1 }
 0x28a   :  { %2021 = vperm.xlu1 %6179, %v8044_v52  }
 0x28e   :  { %6181 = vset.pattern.permute.xlu1 %v9018_v1 }
 0x28f   :  { %1159 = vperm.xlu1 %6181, %v731_v55  }
 0x293   :  { %6182 = vset.pattern.permute.xlu1 %v6955_v49 }
 0x294   :  { %1171 = vperm.xlu1 %6182, %v731_v55  }
 0x298   :  { %6183 = vset.pattern.permute.xlu1 %v6957_v53 }
 0x299   :  { %1582 = vperm.xlu1 %6183, %v731_v55  }
 0x29d   :  { %6184 = vset.pattern.permute.xlu1 %v9020_v39 }
 0x29e   :  { %1594 = vperm.xlu1 %6184, %v731_v55  }
 0x2a2   :  { %6186 = vset.pattern.permute.xlu1 %v9014_v56 }
 0x2a3   :  { %2025 = vperm.xlu1 %6186, %v731_v55  }
 0x2a7   :  { %6187 = vset.pattern.permute.xlu1 %v9010_v38 }
 0x2a8   :  { %2444 = vperm.xlu1 %6187, %v731_v55   ;;  %v784_v55 = vlaneseq }
 0x2aa   :  { %v8176_v46 = vshrl.u32 %v784_v55, 7 }
 0x2ac   :  { %6188 = vset.pattern.permute.xlu1 %v9012_v50  ;;  %v8181_v62 = vsub.s32 0, %v8176_v46  ;;  %v8184_v63 = vsub.s32 2, %v8176_v46  ;;  %v8190_v3 = vsub.s32 1, %v8176_v46  ;;  %v9009_v6 = vsub.s32 3, %v8176_v46 }
 0x2ad   :  { %2452 = vperm.xlu1 %6188, %v8044_v52   ;;  %v1531_v52 = vpop.f32.mrf.mxu0 }
 0x2ae   :  { %v787_v9 = vrot.slane %v732_v2, %v8181_v62  ;;  %v8199_v10 = vrot.slane %v732_v2, %v8184_v63  ;;  %v8202_v12 = vrot.slane %v732_v2, %v8190_v3  ;;  %v8206_v13 = vrot.slane %v732_v2, %v9009_v6 }
 0x2af   :  { %v1956_v57 = vpop.f32.mrf.mxu0 }
 0x2b0   :  { %v1101_v20 = vadd.f32 %v1100_v40, %v787_v9  ;;  %v1144_v21 = vadd.f32 %v1143_v30, %v8199_v10  ;;  %v1103_v22 = vadd.f32 %v1102_v32, %v8202_v12  ;;  %v1105_v23 = vadd.f32 %v1104_v34, %v787_v9  ;;  %v2434_v32 = vpop.f32.mrf.mxu1 }
 0x2b1   :  { %6190 = vset.pattern.permute.xlu1 %v9018_v1  ;;  %v1958_v59 = vpop.f32.mrf.mxu0  ;;  %v1526_v24 = vadd.f32 %v1525_v42, %v787_v9  ;;  %v1528_v25 = vadd.f32 %v1527_v45, %v8202_v12  ;;  %v1146_v27 = vadd.f32 %v1145_v31, %v8206_v13  ;;  %v1148_v28 = vadd.f32 %v1147_v33, %v8199_v10 }
 0x2b2   :  { %v1107_v29 = vadd.f32 %v1106_v37, %v8202_v12  ;;  %v1150_v55 = vadd.f32 %v1149_v35, %v8206_v13  ;;  %v1957_v6 = vadd.f32 %v1956_v57, %v787_v9  ;;  %v1959_v40 = vadd.f32 %v1958_v59, %v8202_v12  ;;  %v2436_v39 = vpop.f32.mrf.mxu1 }
 0x2b3   :  { %v1960_v0 = vpop.f32.mrf.mxu0  ;;  %v1569_v42 = vadd.f32 %v1568_v36, %v8199_v10  ;;  %v1571_v45 = vadd.f32 %v1570_v43, %v8206_v13  ;;  %v1530_v50 = vadd.f32 %v1529_v48, %v787_v9  ;;  %v1573_v31 = vadd.f32 %v1572_v47, %v8199_v10 }
 0x2b4   :  { %v1532_v57 = vadd.f32 %v1531_v52, %v8202_v12  ;;  %v1575_v59 = vadd.f32 %v1574_v19, %v8206_v13  ;;  %v2002_v47 = vadd.f32 %v2001_v58, %v8206_v13  ;;  %v2006_v52 = vadd.f32 %v2005_v4, %v8206_v13 }
 0x2b5   :  { %v1962_v11 = vpop.f32.mrf.mxu0  ;;  %v2435_v19 = vadd.f32 %v2434_v32, %v8199_v10 }
 0x2b7   :  { %v2387_v14 = vpop.f32.mrf.mxu0 }
 0x2b9   :  { %v2389_v2 = vpop.f32.mrf.mxu0 }
 0x2ba   :  { %v2390_v36 = vadd.f32 %v2389_v2, %v8202_v12 }
 0x2bb   :  { %v2391_v35 = vpop.f32.mrf.mxu0 }
 0x2bc   :  { %v2392_v2 = vadd.f32 %v2391_v35, %v787_v9 }
 0x2f1   :  { %v8172_v41 = vpop.permute.xlu1 %1167  ;;  %v1155_v7 = vpop.permute.xlu0 %1154 }
 0x2f2   :  { %v1162_v33 = vmul.f32 %v1155_v7, %v1101_v20  ;;  %v1163_v56 = vmul.f32 %v1155_v7, %v1103_v22  ;;  %v2393_v20 = vpop.f32.mrf.mxu0  ;;  %v2437_v22 = vadd.f32 %v2436_v39, %v8206_v13 }
 0x2f3   :  { %v2394_v32 = vadd.f32 %v2393_v20, %v8202_v12 }
 0x2f6   :  { %v1579_v44 = vpop.permute.xlu1 %1578  ;;  %v2441_v26 = vpop.permute.xlu0 %2440 }
 0x2f7   :  { %v1585_v30 = vmul.f32 %v1579_v44, %v1526_v24  ;;  %v1586_v38 = vmul.f32 %v1579_v44, %v1528_v25  ;;  %v2000_v44 = vadd.f32 %v1999_v51, %v8199_v10  ;;  %v1961_v24 = vadd.f32 %v1960_v0, %v787_v9 }
 0x2f8   :  { %v2388_v25 = vadd.f32 %v2387_v14, %v787_v9  ;;  %v2448_v58 = vmul.f32 %v2441_v26, %v2390_v36 }
 0x2f9   :  { %v1601_v1 = vadd.f32 %v1585_v30, %v1162_v33  ;;  %v1602_v43 = vadd.f32 %v1586_v38, %v1163_v56 }
 0x2fb   :  { %v8174_v17 = vpop.permute.xlu1 %1590  ;;  %v2014_v48 = vpop.permute.xlu0 %2013 }
 0x300   :  { %v2010_v54 = vpop.permute.xlu1 %2009 }
 0x301   :  { %v2016_v37 = vmul.f32 %v2010_v54, %v1957_v6  ;;  %v2017_v16 = vmul.f32 %v2010_v54, %v1959_v40  ;;  %v2004_v6 = vadd.f32 %v2003_v61, %v8199_v10  ;;  %v1963_v54 = vadd.f32 %v1962_v11, %v8202_v12 }
 0x302   :  { %v2447_v40 = vmul.f32 %v2441_v26, %v2388_v25  ;;  %v1174_v11 = vmul.f32 %v8172_v41, %v1144_v21  ;;  %v1597_v21 = vmul.f32 %v8174_v17, %v1569_v42 }
 0x303   :  { %v2032_v51 = vadd.f32 %v2016_v37, %v1601_v1  ;;  %v2033_v0 = vadd.f32 %v2017_v16, %v1602_v43  ;;  %v2019_v25 = vmul.f32 %v2014_v48, %v1963_v54 }
 0x305   :  { %v8178_v60 = vpop.permute.xlu1 %2021  ;;  %v8234_v1 = vadd.f32 %v2447_v40, %v2032_v51  ;;  %v8236_v16 = vadd.f32 %v2448_v58, %v2033_v0  ;;  %v2433_v0 = vadd.f32 %v8208_v18, %v8206_v13 }
 0x306   :  { %v2028_v36 = vmul.f32 %v8178_v60, %v2000_v44  ;;  %v2431_v44 = vadd.f32 %v8195_v8, %v8199_v10 }
 0x307   :  { %v2476_v43 = vmul.f32 0.70710677, %v8236_v16 }
 0x30a   :  { %v8192_v5 = vpop.permute.xlu1 %1159 }
 0x30b   :  { %v1164_v61 = vmul.f32 %v8192_v5, %v1105_v23  ;;  %v1165_v39 = vmul.f32 %v8192_v5, %v1107_v29  ;;  %v2475_v5 = vmul.f32 0.70710677, %v8234_v1 }
 0x30d   :  { %6856 = verf.f32 %v2475_v5 }
 0x30e   :  { %6858 = verf.f32 %v2476_v43  ;;  %v6629_v43 = vld [vmem:[%s9035_s6 + $0x164] ss:$8 sps:$4 sm:$0xff]  }
 0x30f   :  { %v1172_v15 = vpop.permute.xlu1 %1171 }
 0x310   :  { %v1176_v4 = vmul.f32 %v1172_v15, %v1148_v28  ;;  %v1177_v33 = vmul.f32 %v1172_v15, %v1150_v55  ;;  %v1598_v15 = vmul.f32 %v8174_v17, %v1571_v45  ;;  %v2018_v28 = vmul.f32 %v2014_v48, %v1961_v24 }
 0x314   :  { %v1583_v34 = vpop.permute.xlu1 %1582 }
 0x315   :  { %v1587_v14 = vmul.f32 %v1583_v34, %v1530_v50  ;;  %v1588_v30 = vmul.f32 %v1583_v34, %v1532_v57  ;;  %v2457_v50 = vpop.permute.xlu0 %2456  ;;  %v1175_v34 = vmul.f32 %v8172_v41, %v1146_v27 }
 0x316   :  { %v2461_v55 = vmul.f32 %v2457_v50, %v2435_v19  ;;  %v2462_v29 = vmul.f32 %v2457_v50, %v2437_v22 }
 0x317   :  { %v1604_v12 = vadd.f32 %v1588_v30, %v1165_v39  ;;  %v1606_v51 = vadd.f32 %v1598_v15, %v1175_v34 }
 0x319   :  { %v1595_v7 = vpop.permute.xlu1 %1594  ;;  %v2035_v17 = vadd.f32 %v2019_v25, %v1604_v12 }
 0x31a   :  { %v1599_v38 = vmul.f32 %v1595_v7, %v1573_v31  ;;  %v1600_v56 = vmul.f32 %v1595_v7, %v1575_v59  ;;  %v1603_v31 = vadd.f32 %v1587_v14, %v1164_v61  ;;  %v1605_v7 = vadd.f32 %v1597_v21, %v1174_v11  ;;  %v6857_v10 = vpop.eup %6856 }
 0x31b   :  { %v6859_v13 = vpop.eup %6858  ;;  %v2483_v30 = vadd.f32 1.0, %v6857_v10  ;;  %v6657_v10 = vld [vmem:[%s9035_s6 + $0x110] ss:$8 sps:$4 sm:$0xff]  }
 0x31c   :  { %v1607_v37 = vadd.f32 %v1599_v38, %v1176_v4  ;;  %v1608_v26 = vadd.f32 %v1600_v56, %v1177_v33  ;;  %v2034_v42 = vadd.f32 %v2018_v28, %v1603_v31  ;;  %v2484_v4 = vadd.f32 1.0, %v6859_v13  ;;  %v6660_v13 = vld [vmem:[%s9035_s6 + $0x20] ss:$8 sps:$4 sm:$0xff]  }
 0x31e   :  { %v2026_v9 = vpop.permute.xlu1 %2025 }
 0x31f   :  { %v2030_v35 = vmul.f32 %v2026_v9, %v2004_v6  ;;  %v2031_v23 = vmul.f32 %v2026_v9, %v2006_v52  ;;  %v2029_v6 = vmul.f32 %v8178_v60, %v2002_v47  ;;  %v2036_v60 = vadd.f32 %v2028_v36, %v1605_v7  ;;  %v6630_v7 = vld [vmem:[%s9035_s6 + $0x70] ss:$8 sps:$4 sm:$0xff]  }
 0x321   :  { %v2038_v57 = vadd.f32 %v2030_v35, %v1607_v37  ;;  %v2039_v59 = vadd.f32 %v2031_v23, %v1608_v26  ;;  %v2037_v47 = vadd.f32 %v2029_v6, %v1606_v51  ;;  %v2472_v37 = vmul.f32 0.5, %v8236_v16  ;;  %v6638_v51 = vld [vmem:[%s9035_s6 + $0x64] ss:$8 sps:$4 sm:$0xff]  }
 0x323   :  { %v2469_v41 = vadd.f32 %v2461_v55, %v2038_v57  ;;  %v2445_v27 = vpop.permute.xlu1 %2444  ;;  %v2470_v52 = vadd.f32 %v2462_v29, %v2039_v59  ;;  %v2488_v34 = vmul.f32 %v2484_v4, %v2472_v37  ;;  %v6622_v29 = vld [vmem:[%s9035_s6 + $0x170] ss:$8 sps:$4 sm:$0xff]   ;;  %v6675_v37 = vld [vmem:[%s9035_s6 + $0x1e0] ss:$8 sps:$4 sm:$0xff]  }
 0x324   :  { %v2449_v45 = vmul.f32 %v2445_v27, %v2392_v2  ;;  %v2450_v24 = vmul.f32 %v2445_v27, %v2394_v32  ;;  %v2471_v32 = vmul.f32 0.5, %v8234_v1  ;;  %v6666_v4 = vld [vmem:[%s9035_s6 + $0x10] ss:$8 sps:$4 sm:$0xff]  }
 0x325   :  { %v2499_v19 = vmul.f32 0.70710677, %v2469_v41  ;;  %v2500_v14 = vmul.f32 0.70710677, %v2470_v52  ;;  %v2495_v59 = vmul.f32 0.5, %v2469_v41  ;;  %v2496_v16 = vmul.f32 0.5, %v2470_v52 }
 0x326   :  { %v2465_v48 = vadd.f32 %v2449_v45, %v2034_v42  ;;  %v2466_v54 = vadd.f32 %v2450_v24, %v2035_v17  ;;  %v2487_v23 = vmul.f32 %v2483_v30, %v2471_v32  ;;  %v6627_v45 = vld [vmem:[%s9035_s6 + $0x160] ss:$8 sps:$4 sm:$0xff]   ;;  %v6668_v30 = vld [vmem:[%s9035_s6 + $0x14] ss:$8 sps:$4 sm:$0xff]   ;;  %v6674_v32 = vld [vmem:[%s9035_s6 + $0x4] ss:$8 sps:$4 sm:$0xff]  }
 0x327   :  { %6860 = verf.f32 %v2499_v19  ;;  %v6635_v19 = vld [vmem:[%s9035_s6 + $0x154] ss:$8 sps:$4 sm:$0xff]  }
 0x328   :  { %v2477_v20 = vmul.f32 0.70710677, %v2465_v48  ;;  %v2453_v22 = vpop.permute.xlu1 %2452  ;;  %v2478_v38 = vmul.f32 0.70710677, %v2466_v54  ;;  %v2473_v50 = vmul.f32 0.5, %v2465_v48  ;;  %v2474_v9 = vmul.f32 0.5, %v2466_v54 }
 0x329   :  { %v2459_v56 = vmul.f32 %v2453_v22, %v2431_v44  ;;  %v2460_v2 = vmul.f32 %v2453_v22, %v2433_v0  ;;  %v6633_v48 = vld [vmem:[%s9035_s6 + $0x150] ss:$8 sps:$4 sm:$0xff]   ;;  %v6636_v54 = vld [vmem:[%s9035_s6 + $0x60] ss:$8 sps:$4 sm:$0xff]   ;;  %v6641_v44 = vld [vmem:[%s9035_s6 + $0x144] ss:$8 sps:$4 sm:$0xff]  }
 0x32a   :  { %6862 = verf.f32 %v2477_v20  ;;  %v6644_v0 = vld [vmem:[%s9035_s6 + $0x54] ss:$8 sps:$4 sm:$0xff]   ;;  %v6650_v20 = vld [vmem:[%s9035_s6 + $0x44] ss:$8 sps:$4 sm:$0xff]   ;;  %v6645_v22 = vld [vmem:[%s9035_s6 + $0x130] ss:$8 sps:$4 sm:$0xff]  }
 0x32b   :  { %6864 = verf.f32 %v2478_v38  ;;  %v2467_v40 = vadd.f32 %v2459_v56, %v2036_v60  ;;  %v2468_v58 = vadd.f32 %v2460_v2, %v2037_v47  ;;  %v6639_v60 = vld [vmem:[%s9035_s6 + $0x140] ss:$8 sps:$4 sm:$0xff]   ;;  %v6642_v47 = vld [vmem:[%s9035_s6 + $0x50] ss:$8 sps:$4 sm:$0xff]   ;;  %v6653_v56 = vld [vmem:[%s9035_s6 + $0x124] ss:$8 sps:$4 sm:$0xff]  }
 0x32c   :  { %6866 = verf.f32 %v2500_v14  ;;  %v6647_v14 = vld [vmem:[%s9035_s6 + $0x134] ss:$8 sps:$4 sm:$0xff]   ;;  %v6648_v38 = vld [vmem:[%s9035_s6 + $0x40] ss:$8 sps:$4 sm:$0xff]  }
 0x32d   :  { %v2497_v61 = vmul.f32 0.70710677, %v2467_v40  ;;  %v2498_v8 = vmul.f32 0.70710677, %v2468_v58  ;;  %v2493_v25 = vmul.f32 0.5, %v2467_v40  ;;  %v2494_v36 = vmul.f32 0.5, %v2468_v58 }
 0x32e   :  { %v6656_v2 = vld [vmem:[%s9035_s6 + $0x34] ss:$8 sps:$4 sm:$0xff]   ;;  %v6651_v40 = vld [vmem:[%s9035_s6 + $0x120] ss:$8 sps:$4 sm:$0xff]   ;;  %v6654_v58 = vld [vmem:[%s9035_s6 + $0x30] ss:$8 sps:$4 sm:$0xff]  }
 0x32f   :  { %6868 = verf.f32 %v2497_v61  ;;  %v6659_v61 = vld [vmem:[%s9035_s6 + $0x114] ss:$8 sps:$4 sm:$0xff]  }
 0x330   :  { %6870 = verf.f32 %v2498_v8  ;;  %v6662_v8 = vld [vmem:[%s9035_s6 + $0x24] ss:$8 sps:$4 sm:$0xff]  }
 0x334   :  { %v6861_v18 = vpop.eup %6860 }
 0x335   :  { %v2507_v15 = vadd.f32 1.0, %v6861_v18  ;;  %v6665_v18 = vld [vmem:[%s9035_s6 + $0x104] ss:$8 sps:$4 sm:$0xff]  }
 0x337   :  { %v6863_v11 = vpop.eup %6862  ;;  %v2511_v42 = vmul.f32 %v2507_v15, %v2495_v59  ;;  %v6689_v15 = vld [vmem:[%s9035_s6 + $0x1c4] ss:$8 sps:$4 sm:$0xff]   ;;  %v6695_v59 = vld [vmem:[%s9035_s6 + $0x1b4] ss:$8 sps:$4 sm:$0xff]  }
 0x338   :  { %v6865_v33 = vpop.eup %6864  ;;  %v2485_v39 = vadd.f32 1.0, %v6863_v11  ;;  %v6663_v11 = vld [vmem:[%s9035_s6 + $0x100] ss:$8 sps:$4 sm:$0xff]  }
 0x339   :  { %v6867_v31 = vpop.eup %6866  ;;  %v2486_v26 = vadd.f32 1.0, %v6865_v33  ;;  %v6671_v33 = vld [vmem:[%s9035_s6 + $0x1f4] ss:$8 sps:$4 sm:$0xff]  }
 0x33a   :  { %v2489_v35 = vmul.f32 %v2485_v39, %v2473_v50  ;;  %v2508_v55 = vadd.f32 1.0, %v6867_v31  ;;  %v6669_v50 = vld [vmem:[%s9035_s6 + $0x1f0] ss:$8 sps:$4 sm:$0xff]   ;;  %v6672_v39 = vld [vmem:[%s9035_s6] ss:$8 sps:$4 sm:$0xff]  }
 0x33b   :  { %v2490_v21 = vmul.f32 %v2486_v26, %v2474_v9  ;;  %v6677_v31 = vld [vmem:[%s9035_s6 + $0x1e4] ss:$8 sps:$4 sm:$0xff]   ;;  %v6680_v9 = vld [vmem:[%s9035_s6 + $0xf4] ss:$8 sps:$4 sm:$0xff]   ;;  %v6678_v26 = vld [vmem:[%s9035_s6 + $0xf0] ss:$8 sps:$4 sm:$0xff]  }
 0x33c   :  { %v6869_v12 = vpop.eup %6868  ;;  %v8252_v28 = vpack.c.bf16 %v2489_v35, %v2487_v23  ;;  %v2512_v17 = vmul.f32 %v2508_v55, %v2496_v16  ;;  %v6683_v35 = vld [vmem:[%s9035_s6 + $0x1d4] ss:$8 sps:$4 sm:$0xff]   ;;  %v6686_v23 = vld [vmem:[%s9035_s6 + $0xe4] ss:$8 sps:$4 sm:$0xff]   ;;  %v6687_v55 = vld [vmem:[%s9035_s6 + $0x1c0] ss:$8 sps:$4 sm:$0xff]  }
 0x33d   :  { %v6871_v57 = vpop.eup %6870  ;;  %v2505_v1 = vadd.f32 1.0, %v6869_v12  ;;  %v2492_v5 = vpack.c.bf16 %v2490_v21, %v2488_v34  ;;  %v6681_v34 = vld [vmem:[%s9035_s6 + $0x1d0] ss:$8 sps:$4 sm:$0xff]   ;;  %v6684_v21 = vld [vmem:[%s9035_s6 + $0xe0] ss:$8 sps:$4 sm:$0xff]  }
 0x33e   :  { %v2506_v6 = vadd.f32 1.0, %v6871_v57  ;;  %v6692_v12 = vld [vmem:[%s9035_s6 + $0xd4] ss:$8 sps:$4 sm:$0xff]   ;;  %v6690_v57 = vld [vmem:[%s9035_s6 + $0xd0] ss:$8 sps:$4 sm:$0xff]  }
 0x33f   :  { %v2509_v27 = vmul.f32 %v2505_v1, %v2493_v25  ;;  %2845 = vmatprep.mubr.bf16.mxu1 %v2492_v5  ;;  %v6698_v25 = vld [vmem:[%s9035_s6 + $0xc4] ss:$8 sps:$4 sm:$0xff]   ;;  %v6693_v1 = vld [vmem:[%s9035_s6 + $0x1b0] ss:$8 sps:$4 sm:$0xff]   ;;  %v6704_v16 = vld [vmem:[%s9035_s6 + $0xb4] ss:$8 sps:$4 sm:$0xff]  }
 0x340   :  { %2846 = vmatmul.mubr.bf16.vlgmr.msra.gmra.mxu1 %v8252_v28  ;;  %v2510_v41 = vmul.f32 %v2506_v6, %v2494_v36  ;;  %v6699_v36 = vld [vmem:[%s9035_s6 + $0x1a0] ss:$8 sps:$4 sm:$0xff]   ;;  %v6707_v6 = vld [vmem:[%s9035_s6 + $0x194] ss:$8 sps:$4 sm:$0xff]  }
 0x341   :  { %3349 = vmatpush1.bf16.msra.mxu1 %v6622_v29  ;;  %v8264_v24 = vpack.c.bf16 %v2511_v42, %v2509_v27  ;;  %v6701_v29 = vld [vmem:[%s9035_s6 + $0x1a4] ss:$8 sps:$4 sm:$0xff]   ;;  %v6705_v42 = vld [vmem:[%s9035_s6 + $0x190] ss:$8 sps:$4 sm:$0xff]  }
 0x342   :  { %3350 = vmatprep.subr.bf16.mxu1 %v6629_v43  ;;  %v2514_v52 = vpack.c.bf16 %v2512_v17, %v2510_v41  ;;  %v6702_v43 = vld [vmem:[%s9035_s6 + $0xb0] ss:$8 sps:$4 sm:$0xff]   ;;  %v6710_v27 = vld [vmem:[%s9035_s6 + $0xa4] ss:$8 sps:$4 sm:$0xff]   ;;  %v6708_v41 = vld [vmem:[%s9035_s6 + $0xa0] ss:$8 sps:$4 sm:$0xff]  }
 0x343   :  { %v6713_v17 = vld [vmem:[%s9035_s6 + $0x184] ss:$8 sps:$4 sm:$0xff]  }
 0x344   :  { %2708 = vmatprep.mubr.bf16.mxu0 %v2514_v52  ;;  %3380 = vmatprep.mubr.bf16.mxu1 %v2514_v52  ;;  %v6711_v52 = vld [vmem:[%s9035_s6 + $0x180] ss:$8 sps:$4 sm:$0xff]  }
 0x345   :  { %3351 = vmatpush1.bf16.msra.mxu1 %v6627_v45  ;;  %2709 = vmatmul.mubr.bf16.vlgmr.msra.gmra.mxu0 %v8264_v24  ;;  %v6716_v45 = vld [vmem:[%s9035_s6 + $0x94] ss:$8 sps:$4 sm:$0xff]  }
 0x346   :  { %3091 = vmatpush1.bf16.msra.mxu0 %v6630_v7  ;;  %3122 = vmatprep.mubr.bf16.mxu0 %v2492_v5  ;;  %v6696_v5 = vld [vmem:[%s9035_s6 + $0xc0] ss:$8 sps:$4 sm:$0xff]   ;;  %v6714_v7 = vld [vmem:[%s9035_s6 + $0x90] ss:$8 sps:$4 sm:$0xff]  }
 0x347   :  { %3352 = vmatprep.subr.bf16.mxu1 %v6635_v19  ;;  %3092 = vmatprep.subr.bf16.mxu0 %v6638_v51  ;;  %v6719_v19 = vld [vmem:[%s9035_s6 + $0x84] ss:$8 sps:$4 sm:$0xff]   ;;  %v6717_v51 = vld [vmem:[%s9035_s6 + $0x80] ss:$8 sps:$4 sm:$0xff]  }
 0x349   :  { %3353 = vmatpush1.bf16.msra.mxu1 %v6633_v48 }
 0x34a   :  { %3093 = vmatpush1.bf16.msra.mxu0 %v6636_v54  ;;  %3354 = vmatprep.subr.bf16.mxu1 %v6641_v44 }
 0x34b   :  { %3094 = vmatprep.subr.bf16.mxu0 %v6644_v0 }
 0x34d   :  { %3355 = vmatpush1.bf16.msra.mxu1 %v6639_v60 }
 0x34e   :  { %3095 = vmatpush1.bf16.msra.mxu0 %v6642_v47  ;;  %3356 = vmatprep.subr.bf16.mxu1 %v6647_v14 }
 0x34f   :  { %3096 = vmatprep.subr.bf16.mxu0 %v6650_v20 }
 0x351   :  { %3357 = vmatpush1.bf16.msra.mxu1 %v6645_v22 }
 0x352   :  { %3097 = vmatpush1.bf16.msra.mxu0 %v6648_v38  ;;  %3358 = vmatprep.subr.bf16.mxu1 %v6653_v56  ;;  %v5679_v38 = vld [vmem:[%s8988_s8] ss:$0 sm:$0xff] }
 0x353   :  { %3098 = vmatprep.subr.bf16.mxu0 %v6656_v2 }
 0x355   :  { %3359 = vmatpush1.bf16.msra.mxu1 %v6651_v40 }
 0x356   :  { %3099 = vmatpush1.bf16.msra.mxu0 %v6654_v58  ;;  %3360 = vmatprep.subr.bf16.mxu1 %v6659_v61 }
 0x357   :  { %3100 = vmatprep.subr.bf16.mxu0 %v6662_v8 }
 0x359   :  { %3361 = vmatpush1.bf16.msra.mxu1 %v6657_v10 }
 0x35a   :  { %3101 = vmatpush1.bf16.msra.mxu0 %v6660_v13  ;;  %3362 = vmatprep.subr.bf16.mxu1 %v6665_v18 }
 0x35b   :  { %3102 = vmatprep.subr.bf16.mxu0 %v6668_v30 }
 0x35d   :  { %3363 = vmatpush1.bf16.msra.mxu1 %v6663_v11 }
 0x35e   :  { %3103 = vmatpush1.bf16.msra.mxu0 %v6666_v4  ;;  %3364 = vmatprep.subr.bf16.mxu1 %v6671_v33 }
 0x35f   :  { %3104 = vmatprep.subr.bf16.mxu0 %v6674_v32 }
 0x361   :  { %3365 = vmatpush2.bf16.msra.mxu1 %v6669_v50 }
 0x362   :  { %3105 = vmatpush1.bf16.msra.mxu0 %v6672_v39  ;;  %3366 = vmatprep.subr.bf16.mxu1 %v6677_v31 }
 0x363   :  { %3106 = vmatprep.subr.bf16.mxu0 %v6680_v9 }
 0x365   :  { %3367 = vmatpush2.bf16.msra.mxu1 %v6675_v37 }
 0x366   :  { %3107 = vmatpush2.bf16.msra.mxu0 %v6678_v26  ;;  %3368 = vmatprep.subr.bf16.mxu1 %v6683_v35 }
 0x367   :  { %3108 = vmatprep.subr.bf16.mxu0 %v6686_v23 }
 0x369   :  { %3369 = vmatpush2.bf16.msra.mxu1 %v6681_v34 }
 0x36a   :  { %3109 = vmatpush2.bf16.msra.mxu0 %v6684_v21  ;;  %3370 = vmatprep.subr.bf16.mxu1 %v6689_v15  ;;  %v9037_v21 = vmov 3   ;;  %v6720_v15 = vld [vmem:[%s8991_s11 + $0x38] sm:$0xff]  }
 0x36b   :  { %3110 = vmatprep.subr.bf16.mxu0 %v6692_v12  ;;  %v6962_v12 = vmov 0.0  }
 0x36d   :  { %3371 = vmatpush2.bf16.msra.mxu1 %v6687_v55  ;;  %v6721_v55 = vld [vmem:[%s8991_s11 + $0x30] sm:$0xff]  }
 0x36e   :  { %3111 = vmatpush2.bf16.msra.mxu0 %v6690_v57  ;;  %3372 = vmatprep.subr.bf16.mxu1 %v6695_v59  ;;  %v6722_v57 = vld [vmem:[%s8991_s11 + $0x78] sm:$0xff]   ;;  %v6723_v59 = vld [vmem:[%s8991_s11 + $0x28] sm:$0xff]  }
 0x36f   :  { %3112 = vmatprep.subr.bf16.mxu0 %v6698_v25  ;;  %v6724_v25 = vld [vmem:[%s8991_s11 + $0x70] sm:$0xff]  }
 0x371   :  { %3373 = vmatpush2.bf16.msra.mxu1 %v6693_v1  ;;  %v6725_v1 = vld [vmem:[%s8991_s11 + $0x20] sm:$0xff]  }
 0x372   :  { %3113 = vmatpush2.bf16.msra.mxu0 %v6696_v5  ;;  %3374 = vmatprep.subr.bf16.mxu1 %v6701_v29  ;;  %v6726_v5 = vld [vmem:[%s8991_s11 + $0x68] sm:$0xff]   ;;  %v6727_v29 = vld [vmem:[%s8991_s11 + $0x18] sm:$0xff]  }
 0x373   :  { %3114 = vmatprep.subr.bf16.mxu0 %v6704_v16  ;;  %v6728_v16 = vld [vmem:[%s8991_s11 + $0x60] sm:$0xff]  }
 0x375   :  { %3375 = vmatpush2.bf16.msra.mxu1 %v6699_v36  ;;  %v6729_v36 = vld [vmem:[%s8991_s11 + $0x10] sm:$0xff]  }
 0x376   :  { %3115 = vmatpush2.bf16.msra.mxu0 %v6702_v43  ;;  %3376 = vmatprep.subr.bf16.mxu1 %v6707_v6  ;;  %v6730_v43 = vld [vmem:[%s8991_s11 + $0x58] sm:$0xff]   ;;  %v6731_v6 = vld [vmem:[%s8991_s11 + $0x8] sm:$0xff]  }
 0x377   :  { %3116 = vmatprep.subr.bf16.mxu0 %v6710_v27  ;;  %v6732_v27 = vld [vmem:[%s8991_s11 + $0x50] sm:$0xff]  }
 0x379   :  { %3377 = vmatpush2.bf16.msra.mxu1 %v6705_v42  ;;  %v6733_v42 = vld [vmem:[%s8991_s11] sm:$0xff]  }
 0x37a   :  { %3117 = vmatpush2.bf16.msra.mxu0 %v6708_v41  ;;  %3378 = vmatprep.subr.bf16.mxu1 %v6713_v17  ;;  %v6734_v41 = vld [vmem:[%s8991_s11 + $0x48] sm:$0xff]   ;;  %v6736_v17 = vld [vmem:[%s8991_s11 + $0x40] sm:$0xff]  }
 0x37b   :  { %3118 = vmatprep.subr.bf16.mxu0 %v6716_v45 }
 0x37d   :  { %3379 = vmatpush2.bf16.msra.mxu1 %v6711_v52 }
 0x37e   :  { %3119 = vmatpush2.bf16.msra.mxu0 %v6714_v7  ;;  %6041 = vmatprep.subr.bf16.mxu1 %v6962_v12  ;;  %v2886_v7 = vld [vmem:[%s9038_s30] sm:$0x3] }
 0x37f   :  { %3120 = vmatprep.subr.bf16.mxu0 %v6719_v19  ;;  %v2923_v19 = vrot.slane %v2886_v7, %v8181_v62 }
 0x380   :  { %3381 = vmatmul.mubr.bf16.vlgmr.msra.gmra.mxu1 %v8264_v24 }
 0x381   :  { %6042 = vmatpush3.bf16.msra.mxu1 %v6720_v15  ;;  %6057 = vmatprep.mubr.msk.bf16.mxu1 %vm6963_vm4, %v6962_v12 }
 0x382   :  { %3121 = vmatpush2.bf16.msra.mxu0 %v6717_v51  ;;  %6043 = vmatprep.subr.bf16.mxu1 %v6962_v12 }
 0x383   :  { %6021 = vmatprep.subr.bf16.mxu0 %v6962_v12 }
 0x385   :  { %3123 = vmatmul.mubr.bf16.vlgmr.msra.gmra.mxu0 %v8252_v28  ;;  %6044 = vmatpush3.bf16.msra.mxu1 %v6721_v55 }
 0x386   :  { %6022 = vmatpush3.bf16.msra.mxu0 %v6722_v57  ;;  %6045 = vmatprep.subr.bf16.mxu1 %v6962_v12 }
 0x387   :  { %6023 = vmatprep.subr.bf16.mxu0 %v6962_v12  ;;  %6037 = vmatprep.mubr.msk.bf16.mxu0 %vm6963_vm4, %v6962_v12 }
 0x389   :  { %6046 = vmatpush3.bf16.msra.mxu1 %v6723_v59 }
 0x38a   :  { %6024 = vmatpush3.bf16.msra.mxu0 %v6724_v25  ;;  %6047 = vmatprep.subr.bf16.mxu1 %v6962_v12 }
 0x38b   :  { %6025 = vmatprep.subr.bf16.mxu0 %v6962_v12 }
 0x38d   :  { %6048 = vmatpush3.bf16.msra.mxu1 %v6725_v1 }
 0x38e   :  { %6026 = vmatpush3.bf16.msra.mxu0 %v6726_v5  ;;  %6049 = vmatprep.subr.bf16.mxu1 %v6962_v12 }
 0x38f   :  { %6027 = vmatprep.subr.bf16.mxu0 %v6962_v12 }
 0x391   :  { %6050 = vmatpush3.bf16.msra.mxu1 %v6727_v29 }
 0x392   :  { %6028 = vmatpush3.bf16.msra.mxu0 %v6728_v16  ;;  %6051 = vmatprep.subr.bf16.mxu1 %v6962_v12 }
 0x393   :  { %6029 = vmatprep.subr.bf16.mxu0 %v6962_v12 }
 0x395   :  { %6052 = vmatpush3.bf16.msra.mxu1 %v6729_v36 }
 0x396   :  { %6030 = vmatpush3.bf16.msra.mxu0 %v6730_v43  ;;  %6053 = vmatprep.subr.bf16.mxu1 %v6962_v12 }
 0x397   :  { %6031 = vmatprep.subr.bf16.mxu0 %v6962_v12 }
 0x399   :  { %6054 = vmatpush3.bf16.msra.mxu1 %v6731_v6 }
 0x39a   :  { %6032 = vmatpush3.bf16.msra.mxu0 %v6732_v27  ;;  %6055 = vmatprep.subr.bf16.mxu1 %v6962_v12 }
 0x39b   :  { %6033 = vmatprep.subr.bf16.mxu0 %v6962_v12 }
 0x39d   :  { %6056 = vmatpush3.bf16.msra.mxu1 %v6733_v42  ;;  %v6735_v42 = vld [vmem:[%s8989_s9 + $0x78] sm:$0xff]  }
 0x39e   :  { %6034 = vmatpush3.bf16.msra.mxu0 %v6734_v41  ;;  %6081 = vmatprep.subr.bf16.mxu1 %v6962_v12 }
 0x39f   :  { %6035 = vmatprep.subr.bf16.mxu0 %v6962_v12 }
 0x3a2   :  { %6036 = vmatpush3.bf16.msra.mxu0 %v6736_v17 }
 0x3a3   :  { %6061 = vmatprep.subr.bf16.mxu0 %v6962_v12 }
 0x400   :  { %v5952_v48 = vpop.f32.mrf.mxu1 }
 0x402   :  { %v5953_v54 = vpop.f32.mrf.mxu1 }
 0x403   :  { %v5954_v47 = vadd.f32 %v5953_v54, %v5952_v48 }
 0x404   :  { %v5955_v44 = vpop.f32.mrf.mxu1 }
 0x405   :  { %v5930_v0 = vpop.f32.mrf.mxu0 }
 0x406   :  { %v5956_v20 = vpop.f32.mrf.mxu1 }
 0x407   :  { %v5931_v60 = vpop.f32.mrf.mxu0  ;;  %v5957_v24 = vadd.f32 %v5956_v20, %v5955_v44 }
 0x408   :  { %v5932_v14 = vadd.f32 %v5931_v60, %v5930_v0  ;;  %v2927_v0 = vrot.slane %v2886_v7, %v8190_v3 }
 0x409   :  { %v5933_v22 = vpop.f32.mrf.mxu0 }
 0x40a   :  { %v2848_v56 = vadd.f32 %v5954_v47, %v5932_v14 }
 0x40b   :  { %v5934_v2 = vpop.f32.mrf.mxu0 }
 0x40c   :  { %v5935_v40 = vadd.f32 %v5934_v2, %v5933_v22  ;;  %v2861_v58 = vadd.f32 %v5679_v38, %v2848_v56 }
 0x40e   :  { %v2851_v28 = vadd.f32 %v5957_v24, %v5935_v40  ;;  %v2864_v61 = vsel %vm2863_vm3, %v2861_v58, -inf }
 0x40f   :  { %2865 = vmax.xlane.f32.xlu1 %v2864_v61 }
 0x410   :  { %v2862_v8 = vadd.f32 %v5679_v38, %v2851_v28 }
 0x412   :  { %v2867_v10 = vsel %vm2863_vm3, %v2862_v8, -inf }
 0x413   :  { %2868 = vmax.xlane.f32.xlu0 %v2867_v10 }
 0x440   :  { %v3382_v48 = vpop.f32.mrf.mxu1 }
 0x441   :  { %v3383_v44 = vadd.f32 %v3382_v48, %v2923_v19  ;;  %v6737_v48 = vld [vmem:[%s8989_s9 + $0x70] sm:$0xff]  }
 0x442   :  { %v3384_v47 = vpop.f32.mrf.mxu1 }
 0x443   :  { %v3385_v56 = vadd.f32 %v3384_v47, %v2927_v0  ;;  %v6741_v47 = vld [vmem:[%s8989_s9 + $0x60] sm:$0xff]  }
 0x444   :  { %v3386_v40 = vpop.f32.mrf.mxu1 }
 0x445   :  { %v3124_v54 = vpop.f32.mrf.mxu0 }
 0x446   :  { %v3125_v14 = vadd.f32 %v3124_v54, %v2923_v19  ;;  %v6738_v54 = vld [vmem:[%s8989_s9 + $0x38] sm:$0xff]  }
 0x447   :  { %v3126_v22 = vpop.f32.mrf.mxu0 }
 0x449   :  { %v3128_v28 = vpop.f32.mrf.mxu0 }
 0x498   :  { %v2866_v13 = vpop.xlane.xlu1 %2865 }
 0x499   :  { %v2870_v18 = vsub.f32 %v2861_v58, %v2866_v13  ;;  %v3127_v58 = vadd.f32 %v3126_v22, %v2927_v0  ;;  %v3387_v13 = vadd.f32 %v3386_v40, %v2923_v19  ;;  %v6744_v22 = vld [vmem:[%s8989_s9 + $0x20] sm:$0xff]  }
 0x49a   :  { %v6749_v40 = vld [vmem:[%s8989_s9 + $0x40] sm:$0xff]  }
 0x49b   :  { %v2872_v30 = vmul.f32 1.442695, %v2870_v18  ;;  %v3129_v18 = vadd.f32 %v3128_v28, %v2923_v19  ;;  %v6751_v28 = vld [vmem:[%s8989_s9] sm:$0xff]  }
 0x49c   :  { %v2869_v11 = vpop.xlane.xlu0 %2868 }
 0x49d   :  { %6872 = vpow2.f32 %v2872_v30  ;;  %v2871_v4 = vsub.f32 %v2862_v8, %v2869_v11 }
 0x49f   :  { %v2874_v33 = vmul.f32 1.442695, %v2871_v4 }
 0x4a1   :  { %6874 = vpow2.f32 %v2874_v33  ;;  %v3388_v33 = vpop.f32.mrf.mxu1 }
 0x4aa   :  { %v6873_v32 = vpop.eup %6872 }
 0x4ab   :  { %v2876_v50 = vsel %vm2863_vm3, %v6873_v32, 0.0 }
 0x4ac   :  { %2877 = vadd.xlane.f32.xlu1 %v2876_v50 }
 0x4ae   :  { %v6875_v39 = vpop.eup %6874 }
 0x4af   :  { %v2879_v31 = vsel %vm2863_vm3, %v6875_v39, 0.0 }
 0x4b0   :  { %2880 = vadd.xlane.f32.xlu0 %v2879_v31 }
 0x535   :  { %v2878_v9 = vpop.xlane.xlu1 %2877 }
 0x536   :  { %6876 = vrcp.f32 %v2878_v9  ;;  %v3389_v9 = vadd.f32 %v3388_v33, %v2927_v0 }
 0x539   :  { %v2881_v37 = vpop.xlane.xlu0 %2880 }
 0x53a   :  { %6878 = vrcp.f32 %v2881_v37 }
 0x543   :  { %v6877_v26 = vpop.eup %6876 }
 0x544   :  { %v2883_v35 = vmul.f32 %v6877_v26, %v6873_v32  ;;  %v3130_v32 = vpop.f32.mrf.mxu0 }
 0x545   :  { %v3131_v37 = vadd.f32 %v3130_v32, %v2927_v0  ;;  %v6739_v0 = vld [vmem:[%s8989_s9 + $0x68] sm:$0xff]  }
 0x546   :  { %3135 = vperm.xlu1 %6190, %v2883_v35  }
 0x547   :  { %v6879_v23 = vpop.eup %6878 }
 0x548   :  { %v2885_v34 = vmul.f32 %v6879_v23, %v6875_v39 }
 0x54a   :  { %3140 = vperm.xlu0 %6191, %v2885_v34   ;;  %6192 = vset.pattern.permute.xlu1 %v6955_v49 }
 0x54b   :  { %3146 = vperm.xlu1 %6192, %v2883_v35  }
 0x54f   :  { %6193 = vset.pattern.permute.xlu1 %v6957_v53 }
 0x550   :  { %3392 = vperm.xlu1 %6193, %v2883_v35  }
 0x554   :  { %6194 = vset.pattern.permute.xlu1 %v9037_v21 }
 0x555   :  { %3402 = vperm.xlu1 %6194, %v2883_v35  }
 0x559   :  { %6195 = vset.pattern.permute.xlu1 %v6955_v49 }
 0x55a   :  { %3150 = vperm.xlu1 %6195, %v2885_v34  }
 0x55e   :  { %6196 = vset.pattern.permute.xlu1 %v6957_v53 }
 0x55f   :  { %3396 = vperm.xlu1 %6196, %v2885_v34  }
 0x563   :  { %6197 = vset.pattern.permute.xlu1 %v9037_v21 }
 0x564   :  { %3406 = vperm.xlu1 %6197, %v2885_v34  }
 0x568   :  { %6198 = vset.pattern.permute.xlu1 %v6955_v49 }
 0x5c1   :  { %v3136_v45 = vpop.permute.xlu1 %3135 }
 0x5c2   :  { %v3143_v38 = vmul.f32 %v3136_v45, %v3125_v14  ;;  %v6742_v14 = vld [vmem:[%s8989_s9 + $0x28] sm:$0xff]  }
 0x5c5   :  { %v3141_v8 = vpop.permute.xlu0 %3140 }
 0x5c6   :  { %v3147_v52 = vpop.permute.xlu1 %3146  ;;  %v3144_v50 = vmul.f32 %v3141_v8, %v3129_v18 }
 0x5c7   :  { %v3153_v10 = vmul.f32 %v3147_v52, %v3127_v58  ;;  %v6750_v58 = vld [vmem:[%s8989_s9 + $0x8] sm:$0xff]  }
 0x5cb   :  { %v3393_v51 = vpop.permute.xlu1 %3392 }
 0x5cc   :  { %v3399_v20 = vmul.f32 %v3393_v51, %v3383_v44 }
 0x5ce   :  { %v3411_v2 = vadd.f32 %v3399_v20, %v3143_v38  ;;  %v6743_v20 = vld [vmem:[%s8989_s9 + $0x58] sm:$0xff]   ;;  %v6745_v38 = vld [vmem:[%s8989_s9 + $0x50] sm:$0xff]  }
 0x5d0   :  { %v3403_v60 = vpop.permute.xlu1 %3402  ;;  %v3417_v30 = vmul.f32 0.70710677, %v3411_v2  ;;  %v3415_v29 = vmul.f32 0.5, %v3411_v2  ;;  %v6747_v2 = vld [vmem:[%s8989_s9 + $0x48] sm:$0xff]  }
 0x5d1   :  { %v3409_v61 = vmul.f32 %v3403_v60, %v3385_v56  ;;  %v6740_v60 = vld [vmem:[%s8989_s9 + $0x30] sm:$0xff]   ;;  %v6746_v56 = vld [vmem:[%s8989_s9 + $0x18] sm:$0xff]  }
 0x5d2   :  { %6880 = verf.f32 %v3417_v30  ;;  %v5808_v30 = vld [vmem:[%s8992_s12] ss:$0 sm:$0xff] }
 0x5d3   :  { %v3413_v11 = vadd.f32 %v3409_v61, %v3153_v10  ;;  %v9039_v61 = vmov 0  }
 0x5d5   :  { %v3151_v24 = vpop.permute.xlu1 %3150  ;;  %v3428_v26 = vmul.f32 0.70710677, %v3413_v11  ;;  %v3426_v45 = vmul.f32 0.5, %v3413_v11 }
 0x5d6   :  { %v3154_v34 = vmul.f32 %v3151_v24, %v3131_v37  ;;  %v6748_v24 = vld [vmem:[%s8989_s9 + $0x10] sm:$0xff]  }
 0x5da   :  { %v3397_v4 = vpop.permute.xlu1 %3396 }
 0x5db   :  { %v3400_v39 = vmul.f32 %v3397_v4, %v3387_v13 }
 0x5dd   :  { %v3412_v31 = vadd.f32 %v3400_v39, %v3144_v50 }
 0x5df   :  { %v3418_v35 = vmul.f32 0.70710677, %v3412_v31  ;;  %v3407_v23 = vpop.permute.xlu1 %3406  ;;  %v6881_v59 = vpop.eup %6880  ;;  %v3416_v16 = vmul.f32 0.5, %v3412_v31 }
 0x5e0   :  { %v3410_v15 = vmul.f32 %v3407_v23, %v3389_v9  ;;  %v3421_v25 = vadd.f32 1.0, %v6881_v59 }
 0x5e1   :  { %6882 = verf.f32 %v3418_v35 }
 0x5e2   :  { %6884 = verf.f32 %v3428_v26  ;;  %v3414_v55 = vadd.f32 %v3410_v15, %v3154_v34  ;;  %v3423_v43 = vmul.f32 %v3421_v25, %v3415_v29 }
 0x5e4   :  { %v3429_v57 = vmul.f32 0.70710677, %v3414_v55  ;;  %v3427_v52 = vmul.f32 0.5, %v3414_v55 }
 0x5e6   :  { %6886 = verf.f32 %v3429_v57 }
 0x5ee   :  { %v6883_v1 = vpop.eup %6882 }
 0x5ef   :  { %v6885_v5 = vpop.eup %6884  ;;  %v3422_v36 = vadd.f32 1.0, %v6883_v1 }
 0x5f0   :  { %v3432_v27 = vadd.f32 1.0, %v6885_v5 }
 0x5f1   :  { %v3424_v6 = vmul.f32 %v3422_v36, %v3416_v16 }
 0x5f2   :  { %v3434_v19 = vmul.f32 %v3432_v27, %v3426_v45 }
 0x5f3   :  { %v6887_v41 = vpop.eup %6886  ;;  %v3425_v17 = vpack.c.bf16 %v3424_v6, %v3423_v43 }
 0x5f4   :  { %v3433_v7 = vadd.f32 1.0, %v6887_v41 }
 0x5f5   :  { %6058 = vmatmul.mubr.bf16.vlgmr.msra.gmra.mxu1 %v3425_v17 }
 0x5f6   :  { %v3435_v51 = vmul.f32 %v3433_v7, %v3427_v52  ;;  %6082 = vmatpush3.bf16.msra.mxu1 %v6735_v42  ;;  %6097 = vmatprep.mubr.msk.bf16.mxu1 %vm6963_vm4, %v6962_v12 }
 0x5f7   :  { %6083 = vmatprep.subr.bf16.mxu1 %v6962_v12 }
 0x5f8   :  { %v3436_v44 = vpack.c.bf16 %v3435_v51, %v3434_v19 }
 0x5fa   :  { %6084 = vmatpush3.bf16.msra.mxu1 %v6737_v48  ;;  %6038 = vmatmul.mubr.bf16.vlgmr.msra.gmra.mxu0 %v3436_v44  ;;  %v6754_v48 = vld [vmem:[%s8994_s14 + $0xac] ss:$12 sps:$4 sm:$0xff]  }
 0x5fb   :  { %6062 = vmatpush3.bf16.msra.mxu0 %v6738_v54  ;;  %6085 = vmatprep.subr.bf16.mxu1 %v6962_v12  ;;  %v6752_v54 = vld [vmem:[%s8994_s14 + $0xa8] ss:$12 sps:$4 sm:$0xff]  }
 0x5fc   :  { %6063 = vmatprep.subr.bf16.mxu0 %v6962_v12  ;;  %6077 = vmatprep.mubr.msk.bf16.mxu0 %vm6963_vm4, %v6962_v12 }
 0x5fe   :  { %6086 = vmatpush3.bf16.msra.mxu1 %v6739_v0  ;;  %v6758_v0 = vld [vmem:[%s8994_s14 + $0x94] ss:$12 sps:$4 sm:$0xff]  }
 0x5ff   :  { %6064 = vmatpush3.bf16.msra.mxu0 %v6740_v60  ;;  %6087 = vmatprep.subr.bf16.mxu1 %v6962_v12  ;;  %v6756_v60 = vld [vmem:[%s8994_s14 + $0x90] ss:$12 sps:$4 sm:$0xff]  }
 0x600   :  { %6065 = vmatprep.subr.bf16.mxu0 %v6962_v12 }
 0x602   :  { %6088 = vmatpush3.bf16.msra.mxu1 %v6741_v47  ;;  %v6759_v47 = vld [vmem:[%s8994_s14 + $0x98] ss:$12 sps:$4 sm:$0xff]  }
 0x603   :  { %6066 = vmatpush3.bf16.msra.mxu0 %v6742_v14  ;;  %6089 = vmatprep.subr.bf16.mxu1 %v6962_v12  ;;  %v6762_v14 = vld [vmem:[%s8994_s14 + $0x7c] ss:$12 sps:$4 sm:$0xff]  }
 0x604   :  { %6067 = vmatprep.subr.bf16.mxu0 %v6962_v12 }
 0x606   :  { %6090 = vmatpush3.bf16.msra.mxu1 %v6743_v20  ;;  %v6760_v20 = vld [vmem:[%s8994_s14 + $0x78] ss:$12 sps:$4 sm:$0xff]  }
 0x607   :  { %6068 = vmatpush3.bf16.msra.mxu0 %v6744_v22  ;;  %6091 = vmatprep.subr.bf16.mxu1 %v6962_v12  ;;  %v6763_v22 = vld [vmem:[%s8994_s14 + $0x80] ss:$12 sps:$4 sm:$0xff]  }
 0x608   :  { %6069 = vmatprep.subr.bf16.mxu0 %v6962_v12 }
 0x60a   :  { %6092 = vmatpush3.bf16.msra.mxu1 %v6745_v38  ;;  %v6766_v38 = vld [vmem:[%s8994_s14 + $0x64] ss:$12 sps:$4 sm:$0xff]  }
 0x60b   :  { %6070 = vmatpush3.bf16.msra.mxu0 %v6746_v56  ;;  %6093 = vmatprep.subr.bf16.mxu1 %v6962_v12  ;;  %v6764_v56 = vld [vmem:[%s8994_s14 + $0x60] ss:$12 sps:$4 sm:$0xff]  }
 0x60c   :  { %6071 = vmatprep.subr.bf16.mxu0 %v6962_v12 }
 0x60e   :  { %6094 = vmatpush3.bf16.msra.mxu1 %v6747_v2  ;;  %v6767_v2 = vld [vmem:[%s8994_s14 + $0x68] ss:$12 sps:$4 sm:$0xff]  }
 0x60f   :  { %6072 = vmatpush3.bf16.msra.mxu0 %v6748_v24  ;;  %6095 = vmatprep.subr.bf16.mxu1 %v6962_v12  ;;  %v6770_v24 = vld [vmem:[%s8994_s14 + $0x4c] ss:$12 sps:$4 sm:$0xff]  }
 0x610   :  { %6073 = vmatprep.subr.bf16.mxu0 %v6962_v12 }
 0x612   :  { %6096 = vmatpush3.bf16.msra.mxu1 %v6749_v40  ;;  %v6768_v40 = vld [vmem:[%s8994_s14 + $0x48] ss:$12 sps:$4 sm:$0xff]  }
 0x613   :  { %6074 = vmatpush3.bf16.msra.mxu0 %v6750_v58  ;;  %6101 = vmatprep.subr.bf16.mxu1 %v6962_v12  ;;  %v6771_v58 = vld [vmem:[%s8994_s14 + $0x50] ss:$12 sps:$4 sm:$0xff]  }
 0x614   :  { %6075 = vmatprep.subr.bf16.mxu0 %v6962_v12 }
 0x615   :  { %6098 = vmatmul.mubr.bf16.vlgmr.msra.gmra.mxu1 %v3436_v44  ;;  %v6755_v44 = vld [vmem:[%s8994_s14 + $0xb0] ss:$12 sps:$4 sm:$0xff]  }
 0x616   :  { %6117 = vmatprep.mubr.msk.bf16.mxu1 %vm6963_vm4, %v6962_v12  ;;  %6102 = vmatpush3.bf16.msra.mxu1 %v6755_v44 }
 0x617   :  { %6076 = vmatpush3.bf16.msra.mxu0 %v6751_v28  ;;  %6103 = vmatprep.subr.bf16.mxu1 %v6962_v12  ;;  %v6774_v28 = vld [vmem:[%s8994_s14 + $0x34] ss:$12 sps:$4 sm:$0xff]  }
 0x618   :  { %4146 = vmatprep.subr.bf16.mxu0 %v6754_v48 }
 0x61a   :  { %6078 = vmatmul.mubr.bf16.vlgmr.msra.gmra.mxu0 %v3425_v17  ;;  %6104 = vmatpush3.bf16.msra.mxu1 %v6759_v47 }
 0x61b   :  { %4178 = vmatprep.mubr.bf16.mxu0 %v9039_v61  ;;  %4147 = vmatpush1.bf16.msra.mxu0 %v6752_v54 }
 0x61c   :  { %4148 = vmatprep.subr.bf16.mxu0 %v6758_v0  ;;  %6105 = vmatprep.subr.bf16.mxu1 %v6962_v12 }
 0x61e   :  { %6106 = vmatpush3.bf16.msra.mxu1 %v6763_v22 }
 0x61f   :  { %4149 = vmatpush1.bf16.msra.mxu0 %v6756_v60  ;;  %6107 = vmatprep.subr.bf16.mxu1 %v6962_v12 }
 0x620   :  { %4150 = vmatprep.subr.bf16.mxu0 %v6762_v14 }
 0x622   :  { %6108 = vmatpush3.bf16.msra.mxu1 %v6767_v2 }
 0x623   :  { %4151 = vmatpush1.bf16.msra.mxu0 %v6760_v20  ;;  %6109 = vmatprep.subr.bf16.mxu1 %v6962_v12 }
 0x624   :  { %4152 = vmatprep.subr.bf16.mxu0 %v6766_v38 }
 0x626   :  { %6110 = vmatpush3.bf16.msra.mxu1 %v6771_v58 }
 0x627   :  { %4153 = vmatpush1.bf16.msra.mxu0 %v6764_v56  ;;  %6111 = vmatprep.subr.bf16.mxu1 %v6962_v12 }
 0x628   :  { %4154 = vmatprep.subr.bf16.mxu0 %v6770_v24 }
 0x62b   :  { %4155 = vmatpush1.bf16.msra.mxu0 %v6768_v40 }
 0x62c   :  { %4156 = vmatprep.subr.bf16.mxu0 %v6774_v28 }
 0x6b5   :  { %v3641_v8 = vpop.f32.mrf.mxu1 }
 0x6b7   :  { %v6059_v10 = vpop.f32.mrf.mxu1 }
 0x6b8   :  { %v6775_v10 = vld [vmem:[%s8994_s14 + $0x38] ss:$12 sps:$4 sm:$0xff]  }
 0x6b9   :  { %v3644_v13 = vpop.f32.mrf.mxu1  ;;  %6112 = vmatpush3.bf16.msra.mxu1 %v6775_v10 }
 0x6ba   :  { %v3552_v18 = vpop.f32.mrf.mxu0  ;;  %6113 = vmatprep.subr.bf16.mxu1 %v6962_v12 }
 0x6bb   :  { %v3642_v11 = vadd.f32 %v3641_v8, %v3552_v18  ;;  %v6060_v4 = vpop.f32.mrf.mxu1  ;;  %v6772_v8 = vld [vmem:[%s8994_s14 + $0x30] ss:$12 sps:$4 sm:$0xff]   ;;  %v6776_v18 = vld [vmem:[%s8994_s14 + $0x18] ss:$12 sps:$4 sm:$0xff]  }
 0x6bc   :  { %v6039_v33 = vpop.f32.mrf.mxu0  ;;  %4157 = vmatpush1.bf16.msra.mxu0 %v6772_v8  ;;  %v6780_v4 = vld [vmem:[%s8994_s14] ss:$12 sps:$4 sm:$0xff]  }
 0x6bd   :  { %v3655_v32 = vadd.f32 %v5808_v30, %v3642_v11  ;;  %v6782_v11 = vld [vmem:[%s8994_s14 + $0x4] ss:$12 sps:$4 sm:$0xff]   ;;  %v6783_v33 = vld [vmem:[%s8994_s14 + $0x8] ss:$12 sps:$4 sm:$0xff]  }
 0x6be   :  { %v3555_v50 = vpop.f32.mrf.mxu0 }
 0x6bf   :  { %v3645_v39 = vadd.f32 %v3644_v13, %v3555_v50  ;;  %v3657_v31 = vsel %vm2863_vm3, %v3655_v32, -inf  ;;  %v6778_v13 = vld [vmem:[%s8994_s14 + $0x1c] ss:$12 sps:$4 sm:$0xff]  }
 0x6c0   :  { %3658 = vmax.xlane.f32.xlu1 %v3657_v31  ;;  %v6040_v9 = vpop.f32.mrf.mxu0  ;;  %4158 = vmatprep.subr.bf16.mxu0 %v6778_v13  ;;  %v3680_v31 = vld [vmem:[%s8993_s13] sm:$0x3] }
 0x6c1   :  { %v3656_v37 = vadd.f32 %v5808_v30, %v3645_v39  ;;  %v6779_v30 = vld [vmem:[%s8994_s14 + $0x20] ss:$12 sps:$4 sm:$0xff]   ;;  %4159 = vmatpush1.bf16.msra.mxu0 %v6776_v18 }
 0x6c2   :  { %6114 = vmatpush3.bf16.msra.mxu1 %v6779_v30  ;;  %4160 = vmatprep.subr.bf16.mxu0 %v6782_v11 }
 0x6c3   :  { %v3660_v26 = vsel %vm2863_vm3, %v3656_v37, -inf  ;;  %6115 = vmatprep.subr.bf16.mxu1 %v6962_v12 }
 0x6c4   :  { %3661 = vmax.xlane.f32.xlu0 %v3660_v26 }
 0x6c5   :  { %4161 = vmatpush1.bf16.msra.mxu0 %v6780_v4 }
 0x6c6   :  { %6116 = vmatpush3.bf16.msra.mxu1 %v6783_v33 }
 0x6c7   :  { %6121 = vmatprep.subr.bf16.mxu1 %v6962_v12 }
 0x6d5   :  { %v8610_v35 = vpop.f32.mrf.mxu1 }
 0x6d7   :  { %v6099_v23 = vpop.f32.mrf.mxu1 }
 0x6d8   :  { %v3795_v23 = vrot.slane %v3680_v31, %v8181_v62 }
 0x6d9   :  { %v8612_v34 = vpop.f32.mrf.mxu1 }
 0x6da   :  { %v8614_v15 = vpop.f32.mrf.mxu0 }
 0x6db   :  { %v6100_v55 = vpop.f32.mrf.mxu1 }
 0x6dc   :  { %v6079_v57 = vpop.f32.mrf.mxu0 }
 0x6de   :  { %v8616_v59 = vpop.f32.mrf.mxu0 }
 0x6e0   :  { %v6080_v25 = vpop.f32.mrf.mxu0 }
 0x749   :  { %v3659_v1 = vpop.xlane.xlu1 %3658 }
 0x74a   :  { %v3663_v5 = vsub.f32 %v3655_v32, %v3659_v1 }
 0x74c   :  { %v3665_v29 = vmul.f32 1.442695, %v3663_v5 }
 0x74d   :  { %v3662_v16 = vpop.xlane.xlu0 %3661 }
 0x74e   :  { %6888 = vpow2.f32 %v3665_v29  ;;  %v3664_v36 = vsub.f32 %v3656_v37, %v3662_v16  ;;  %v3811_v37 = vrot.slane %v3680_v31, %v8190_v3 }
 0x750   :  { %v3667_v43 = vmul.f32 1.442695, %v3664_v36  ;;  %v5809_v36 = vld [vmem:[%s8990_s10] ss:$0 sm:$0xff] }
 0x751   :  { %v3926_v54 = vadd.f32 %v5809_v36, %v8610_v35  ;;  %v3786_v44 = vadd.f32 %v5809_v36, %v8614_v15  ;;  %v8726_v35 = vld [vmem:[%s8995_s15] sm:$0x7] }
 0x752   :  { %6890 = vpow2.f32 %v3667_v43  ;;  %v4014_v15 = vrot.slane %v8726_v35, %v8184_v63 }
 0x75b   :  { %v6889_v6 = vpop.eup %6888 }
 0x75c   :  { %v3669_v27 = vsel %vm2863_vm3, %v6889_v6, 0.0 }
 0x75d   :  { %3670 = vadd.xlane.f32.xlu0 %v3669_v27  ;;  %v3929_v27 = vadd.f32 %v5809_v36, %v8612_v34 }
 0x75f   :  { %v6891_v42 = vpop.eup %6890 }
 0x760   :  { %v3672_v41 = vsel %vm2863_vm3, %v6891_v42, 0.0 }
 0x761   :  { %3673 = vadd.xlane.f32.xlu1 %v3672_v41 }
 0x7e6   :  { %v3671_v17 = vpop.xlane.xlu0 %3670 }
 0x7e7   :  { %6892 = vrcp.f32 %v3671_v17 }
 0x7ea   :  { %v3674_v45 = vpop.xlane.xlu1 %3673 }
 0x7eb   :  { %6894 = vrcp.f32 %v3674_v45 }
 0x7f4   :  { %v6893_v52 = vpop.eup %6892 }
 0x7f5   :  { %v3676_v7 = vmul.f32 %v6893_v52, %v6889_v6 }
 0x7f7   :  { %3813 = vperm.xlu1 %6198, %v3676_v7   ;;  %3798 = vperm.xlu0 %6191, %v3676_v7  }
 0x7f8   :  { %v6895_v19 = vpop.eup %6894 }
 0x7f9   :  { %v3678_v51 = vmul.f32 %v6895_v19, %v6891_v42  ;;  %v3789_v42 = vadd.f32 %v5809_v36, %v8616_v59 }
 0x7fb   :  { %6200 = vset.pattern.permute.xlu1 %v9039_v61  ;;  %6199 = vset.pattern.permute.xlu0 %v6957_v53 }
 0x7fc   :  { %3803 = vperm.xlu1 %6200, %v3678_v51   ;;  %3933 = vperm.xlu0 %6199, %v3676_v7  }
 0x800   :  { %6201 = vset.pattern.permute.xlu1 %v6955_v49  ;;  %6204 = vset.pattern.permute.xlu0 %v9037_v21 }
 0x801   :  { %3817 = vperm.xlu1 %6201, %v3678_v51   ;;  %3947 = vperm.xlu0 %6204, %v3678_v51  }
 0x805   :  { %6202 = vset.pattern.permute.xlu1 %v6957_v53  ;;  %6205 = vset.pattern.permute.xlu0 %v9039_v61 }
 0x806   :  { %3937 = vperm.xlu1 %6202, %v3678_v51  }
 0x80a   :  { %6203 = vset.pattern.permute.xlu1 %v9037_v21 }
 0x80b   :  { %3943 = vperm.xlu1 %6203, %v3676_v7  }
 0x80f   :  { %6206 = vset.pattern.permute.xlu1 %v6955_v49 }
 0x872   :  { %v3814_v32 = vpop.permute.xlu1 %3813  ;;  %v3799_v50 = vpop.permute.xlu0 %3798 }
 0x873   :  { %v3820_v43 = vmul.f32 %v3814_v32, %v3811_v37  ;;  %v3806_v6 = vmul.f32 %v3799_v50, %v3795_v23 }
 0x875   :  { %v3822_v7 = vadd.f32 %v3820_v43, %v3806_v6  ;;  %v6784_v43 = vld [vmem:[%s8997_s17 + $0xa8] ss:$12 sps:$4 sm:$0xff]   ;;  %v6786_v6 = vld [vmem:[%s8997_s17 + $0xac] ss:$12 sps:$4 sm:$0xff]  }
 0x876   :  { %4501 = vmatprep.subr.bf16.mxu0 %v6786_v6 }
 0x877   :  { %v3804_v39 = vpop.permute.xlu1 %3803  ;;  %v3934_v9 = vpop.permute.xlu0 %3933  ;;  %v3824_v47 = vmul.f32 %v3822_v7, %v3786_v44  ;;  %v6795_v7 = vld [vmem:[%s8997_s17 + $0x80] ss:$12 sps:$4 sm:$0xff]   ;;  %v6800_v44 = vld [vmem:[%s8997_s17 + $0x48] ss:$12 sps:$4 sm:$0xff]  }
 0x878   :  { %v3807_v25 = vmul.f32 %v3804_v39, %v3795_v23  ;;  %v3940_v19 = vmul.f32 %v3934_v9, %v3795_v23 }
 0x87c   :  { %v3818_v26 = vpop.permute.xlu1 %3817  ;;  %v3948_v57 = vpop.permute.xlu0 %3947 }
 0x87d   :  { %v3821_v55 = vmul.f32 %v3818_v26, %v3811_v37  ;;  %v3951_v29 = vmul.f32 %v3948_v57, %v3811_v37 }
 0x87f   :  { %v3823_v5 = vadd.f32 %v3821_v55, %v3807_v25 }
 0x881   :  { %v3938_v1 = vpop.permute.xlu1 %3937  ;;  %v3825_v17 = vmul.f32 %v3823_v5, %v3789_v42  ;;  %v6790_v42 = vld [vmem:[%s8997_s17 + $0x94] ss:$12 sps:$4 sm:$0xff]  }
 0x882   :  { %v3941_v16 = vmul.f32 %v3938_v1, %v3795_v23 }
 0x884   :  { %v3953_v41 = vadd.f32 %v3951_v29, %v3941_v16 }
 0x886   :  { %v3955_v45 = vmul.f32 %v3953_v41, %v3929_v27  ;;  %v3944_v52 = vpop.permute.xlu1 %3943  ;;  %v6787_v27 = vld [vmem:[%s8997_s17 + $0xb0] ss:$12 sps:$4 sm:$0xff]  }
 0x887   :  { %v3950_v51 = vmul.f32 %v3944_v52, %v3811_v37  ;;  %v6788_v41 = vld [vmem:[%s8997_s17 + $0x90] ss:$12 sps:$4 sm:$0xff]   ;;  %v6792_v52 = vld [vmem:[%s8997_s17 + $0x78] ss:$12 sps:$4 sm:$0xff]  }
 0x888   :  { %v3957_v48 = vadd.f32 %v3955_v45, %v3825_v17  ;;  %v6791_v17 = vld [vmem:[%s8997_s17 + $0x98] ss:$12 sps:$4 sm:$0xff]   ;;  %v6794_v45 = vld [vmem:[%s8997_s17 + $0x7c] ss:$12 sps:$4 sm:$0xff]  }
 0x889   :  { %v3952_v0 = vadd.f32 %v3950_v51, %v3940_v19  ;;  %v6798_v19 = vld [vmem:[%s8997_s17 + $0x64] ss:$12 sps:$4 sm:$0xff]   ;;  %v6796_v51 = vld [vmem:[%s8997_s17 + $0x60] ss:$12 sps:$4 sm:$0xff]  }
 0x88a   :  { %v3961_v60 = vmul.f32 0.70710677, %v3957_v48  ;;  %v3959_v56 = vmul.f32 0.5, %v3957_v48  ;;  %v6799_v48 = vld [vmem:[%s8997_s17 + $0x68] ss:$12 sps:$4 sm:$0xff]  }
 0x88b   :  { %v3954_v14 = vmul.f32 %v3952_v0, %v3926_v54  ;;  %v6802_v54 = vld [vmem:[%s8997_s17 + $0x4c] ss:$12 sps:$4 sm:$0xff]   ;;  %v6803_v0 = vld [vmem:[%s8997_s17 + $0x50] ss:$12 sps:$4 sm:$0xff]  }
 0x88c   :  { %6896 = verf.f32 %v3961_v60  ;;  %v6806_v60 = vld [vmem:[%s8997_s17 + $0x34] ss:$12 sps:$4 sm:$0xff]  }
 0x88d   :  { %v3956_v34 = vadd.f32 %v3954_v14, %v3824_v47  ;;  %v6804_v47 = vld [vmem:[%s8997_s17 + $0x30] ss:$12 sps:$4 sm:$0xff]   ;;  %v6807_v14 = vld [vmem:[%s8997_s17 + $0x38] ss:$12 sps:$4 sm:$0xff]  }
 0x88f   :  { %v3960_v20 = vmul.f32 0.70710677, %v3956_v34  ;;  %v3958_v2 = vmul.f32 0.5, %v3956_v34  ;;  %v6810_v34 = vld [vmem:[%s8997_s17 + $0x1c] ss:$12 sps:$4 sm:$0xff]  }
 0x891   :  { %6898 = verf.f32 %v3960_v20  ;;  %v6808_v20 = vld [vmem:[%s8997_s17 + $0x18] ss:$12 sps:$4 sm:$0xff]  }
 0x899   :  { %v6897_v59 = vpop.eup %6896 }
 0x89a   :  { %v3965_v22 = vadd.f32 1.0, %v6897_v59  ;;  %v6811_v59 = vld [vmem:[%s8997_s17 + $0x20] ss:$12 sps:$4 sm:$0xff]  }
 0x89c   :  { %v3967_v58 = vmul.f32 %v3965_v22, %v3959_v56  ;;  %v6814_v22 = vld [vmem:[%s8997_s17 + $0x4] ss:$12 sps:$4 sm:$0xff]   ;;  %v6815_v56 = vld [vmem:[%s8997_s17 + $0x8] ss:$12 sps:$4 sm:$0xff]  }
 0x89e   :  { %v6899_v38 = vpop.eup %6898 }
 0x89f   :  { %v3964_v24 = vadd.f32 1.0, %v6899_v38  ;;  %v6812_v38 = vld [vmem:[%s8997_s17] ss:$12 sps:$4 sm:$0xff]  }
 0x8a1   :  { %v3966_v40 = vmul.f32 %v3964_v24, %v3958_v2 }
 0x8a3   :  { %v3968_v28 = vpack.c.bf16 %v3967_v58, %v3966_v40  ;;  %v4252_v58 = vld [vmem:[%s8996_s16] sm:$0x3] }
 0x8a5   :  { %4179 = vmatmul.mubr.bf16.vlgmr.msra.gmra.mxu0 %v3968_v28  ;;  %6118 = vmatmul.mubr.bf16.vlgmr.msra.gmra.mxu1 %v3968_v28  ;;  %v4272_v28 = vrot.slane %v4252_v58, %v8190_v3 }
 0x8a6   :  { %4533 = vmatprep.mubr.bf16.mxu0 %v9039_v61  ;;  %6137 = vmatprep.mubr.msk.bf16.mxu1 %vm6963_vm4, %v6962_v12 }
 0x8a7   :  { %6122 = vmatpush3.bf16.msra.mxu1 %v6787_v27  ;;  %4502 = vmatpush1.bf16.msra.mxu0 %v6784_v43 }
 0x8a8   :  { %6123 = vmatprep.subr.bf16.mxu1 %v6962_v12  ;;  %4503 = vmatprep.subr.bf16.mxu0 %v6790_v42 }
 0x8ab   :  { %4504 = vmatpush1.bf16.msra.mxu0 %v6788_v41  ;;  %6124 = vmatpush3.bf16.msra.mxu1 %v6791_v17 }
 0x8ac   :  { %6125 = vmatprep.subr.bf16.mxu1 %v6962_v12  ;;  %4505 = vmatprep.subr.bf16.mxu0 %v6794_v45 }
 0x8af   :  { %4506 = vmatpush1.bf16.msra.mxu0 %v6792_v52  ;;  %6126 = vmatpush3.bf16.msra.mxu1 %v6795_v7 }
 0x8b0   :  { %6127 = vmatprep.subr.bf16.mxu1 %v6962_v12  ;;  %4507 = vmatprep.subr.bf16.mxu0 %v6798_v19 }
 0x8b3   :  { %4508 = vmatpush1.bf16.msra.mxu0 %v6796_v51  ;;  %6128 = vmatpush3.bf16.msra.mxu1 %v6799_v48 }
 0x8b4   :  { %4509 = vmatprep.subr.bf16.mxu0 %v6802_v54  ;;  %6129 = vmatprep.subr.bf16.mxu1 %v6962_v12 }
 0x8b7   :  { %4510 = vmatpush1.bf16.msra.mxu0 %v6800_v44  ;;  %6130 = vmatpush3.bf16.msra.mxu1 %v6803_v0 }
 0x8b8   :  { %4511 = vmatprep.subr.bf16.mxu0 %v6806_v60  ;;  %6131 = vmatprep.subr.bf16.mxu1 %v6962_v12 }
 0x8bb   :  { %4512 = vmatpush1.bf16.msra.mxu0 %v6804_v47  ;;  %6132 = vmatpush3.bf16.msra.mxu1 %v6807_v14 }
 0x8bc   :  { %4513 = vmatprep.subr.bf16.mxu0 %v6810_v34  ;;  %6133 = vmatprep.subr.bf16.mxu1 %v6962_v12 }
 0x8bf   :  { %4514 = vmatpush1.bf16.msra.mxu0 %v6808_v20  ;;  %6134 = vmatpush3.bf16.msra.mxu1 %v6811_v59  ;;  %v8836_v20 = vld [vmem:[%s8998_s18] sm:$0x7] }
 0x8c0   :  { %4515 = vmatprep.subr.bf16.mxu0 %v6814_v22  ;;  %6135 = vmatprep.subr.bf16.mxu1 %v6962_v12  ;;  %v4369_v59 = vrot.slane %v8836_v20, %v8184_v63 }
 0x8c3   :  { %4516 = vmatpush1.bf16.msra.mxu0 %v6812_v38  ;;  %6136 = vmatpush3.bf16.msra.mxu1 %v6815_v56 }
 0x8c4   :  { %6141 = vmatprep.subr.bf16.mxu1 %v6962_v12 }
 0x965   :  { %v4223_v8 = vpop.f32.mrf.mxu1 }
 0x966   :  { %v4224_v10 = vadd.f32 %v4223_v8, %v4014_v15 }
 0x967   :  { %v6119_v13 = vpop.f32.mrf.mxu1 }
 0x968   :  { %v4230_v18 = vsel %vm2863_vm3, %v4224_v10, -inf }
 0x969   :  { %4231 = vmax.xlane.f32.xlu1 %v4230_v18  ;;  %v4226_v30 = vpop.f32.mrf.mxu1 }
 0x96a   :  { %v4227_v11 = vadd.f32 %v4226_v30, %v4014_v15  ;;  %v4256_v15 = vrot.slane %v4252_v58, %v8181_v62  ;;  %v4010_v30 = vrot.slane %v8726_v35, %v8190_v3 }
 0x96b   :  { %v6120_v4 = vpop.f32.mrf.mxu1 }
 0x96c   :  { %v4233_v33 = vsel %vm2863_vm3, %v4227_v11, -inf }
 0x96d   :  { %4234 = vmax.xlane.f32.xlu0 %v4233_v33 }
 0x9f2   :  { %v4232_v32 = vpop.xlane.xlu1 %4231 }
 0x9f3   :  { %v4236_v50 = vsub.f32 %v4224_v10, %v4232_v32  ;;  %v4180_v10 = vpop.f32.mrf.mxu0 }
 0x9f5   :  { %v4238_v39 = vmul.f32 1.442695, %v4236_v50  ;;  %v4182_v32 = vpop.f32.mrf.mxu0 }
 0x9f6   :  { %v4235_v31 = vpop.xlane.xlu0 %4234 }
 0x9f7   :  { %6900 = vpow2.f32 %v4238_v39  ;;  %v4237_v9 = vsub.f32 %v4227_v11, %v4235_v31  ;;  %v4006_v39 = vrot.slane %v8726_v35, %v8181_v62 }
 0x9f9   :  { %v4240_v37 = vmul.f32 1.442695, %v4237_v9  ;;  %v4183_v9 = vadd.f32 %v4182_v32, %v4010_v30 }
 0x9fb   :  { %6902 = vpow2.f32 %v4240_v37 }
 0xa04   :  { %v6901_v26 = vpop.eup %6900 }
 0xa05   :  { %v4242_v23 = vsel %vm2863_vm3, %v6901_v26, 0.0 }
 0xa06   :  { %4243 = vadd.xlane.f32.xlu0 %v4242_v23 }
 0xa08   :  { %v6903_v55 = vpop.eup %6902 }
 0xa09   :  { %v4245_v57 = vsel %vm2863_vm3, %v6903_v55, 0.0 }
 0xa0a   :  { %4246 = vadd.xlane.f32.xlu1 %v4245_v57  ;;  %v4184_v57 = vpop.f32.mrf.mxu0 }
 0xa0b   :  { %v4185_v42 = vadd.f32 %v4184_v57, %v4006_v39  ;;  %v6819_v57 = vld [vmem:[%s9000_s20 + $0xb0] ss:$12 sps:$4 sm:$0xff]  }
 0xa8f   :  { %v4244_v25 = vpop.xlane.xlu0 %4243 }
 0xa90   :  { %6904 = vrcp.f32 %v4244_v25 }
 0xa93   :  { %v4247_v1 = vpop.xlane.xlu1 %4246 }
 0xa94   :  { %6906 = vrcp.f32 %v4247_v1 }
 0xa9d   :  { %v6905_v5 = vpop.eup %6904 }
 0xa9e   :  { %v4249_v29 = vmul.f32 %v6905_v5, %v6901_v26  ;;  %v4181_v26 = vadd.f32 %v4180_v10, %v4006_v39 }
 0xaa0   :  { %4274 = vperm.xlu1 %6206, %v4249_v29   ;;  %4259 = vperm.xlu0 %6205, %v4249_v29  }
 0xaa1   :  { %v6907_v16 = vpop.eup %6906 }
 0xaa2   :  { %v4251_v36 = vmul.f32 %v6907_v16, %v6903_v55  ;;  %v4186_v16 = vpop.f32.mrf.mxu0 }
 0xaa3   :  { %v4187_v41 = vadd.f32 %v4186_v16, %v4010_v30  ;;  %v6824_v16 = vld [vmem:[%s9000_s20 + $0x78] ss:$12 sps:$4 sm:$0xff]  }
 0xaa4   :  { %6207 = vset.pattern.permute.xlu1 %v6957_v53 }
 0xaa5   :  { %4288 = vperm.xlu1 %6207, %v4249_v29  }
 0xaa9   :  { %6208 = vset.pattern.permute.xlu1 %v9037_v21 }
 0xaaa   :  { %4298 = vperm.xlu1 %6208, %v4249_v29  }
 0xaae   :  { %6209 = vset.pattern.permute.xlu1 %v9039_v61 }
 0xaaf   :  { %4264 = vperm.xlu1 %6209, %v4251_v36  }
 0xab3   :  { %6210 = vset.pattern.permute.xlu1 %v6955_v49 }
 0xab4   :  { %4278 = vperm.xlu1 %6210, %v4251_v36  }
 0xab8   :  { %6211 = vset.pattern.permute.xlu1 %v6957_v53 }
 0xab9   :  { %4292 = vperm.xlu1 %6211, %v4251_v36  }
 0xabd   :  { %6212 = vset.pattern.permute.xlu1 %v9037_v21 }
 0xabe   :  { %4302 = vperm.xlu1 %6212, %v4251_v36  }
 0xac2   :  { %6213 = vset.pattern.permute.xlu1 %v6955_v49 }
 0xb1b   :  { %v4275_v2 = vpop.permute.xlu1 %4274  ;;  %v4260_v13 = vpop.permute.xlu0 %4259 }
 0xb1c   :  { %v4281_v11 = vmul.f32 %v4275_v2, %v4272_v28  ;;  %v4267_v4 = vmul.f32 %v4260_v13, %v4256_v15 }
 0xb1e   :  { %v4283_v37 = vadd.f32 %v4281_v11, %v4267_v4 }
 0xb20   :  { %v4289_v24 = vpop.permute.xlu1 %4288  ;;  %v4285_v25 = vmul.f32 %v4283_v37, %v4181_v26 }
 0xb21   :  { %v4295_v33 = vmul.f32 %v4289_v24, %v4256_v15 }
 0xb25   :  { %v4299_v40 = vpop.permute.xlu1 %4298 }
 0xb26   :  { %v4305_v18 = vmul.f32 %v4299_v40, %v4272_v28 }
 0xb28   :  { %v4307_v31 = vadd.f32 %v4305_v18, %v4295_v33 }
 0xb2a   :  { %v4265_v8 = vpop.permute.xlu1 %4264  ;;  %v4309_v23 = vmul.f32 %v4307_v31, %v4183_v9 }
 0xb2b   :  { %v4268_v29 = vmul.f32 %v4265_v8, %v4256_v15 }
 0xb2c   :  { %v4311_v5 = vadd.f32 %v4309_v23, %v4285_v25  ;;  %v6818_v23 = vld [vmem:[%s9000_s20 + $0xac] ss:$12 sps:$4 sm:$0xff]   ;;  %v6822_v25 = vld [vmem:[%s9000_s20 + $0x94] ss:$12 sps:$4 sm:$0xff]  }
 0xb2d   :  { %4856 = vmatprep.subr.bf16.mxu0 %v6818_v23 }
 0xb2e   :  { %v4315_v17 = vmul.f32 0.70710677, %v4311_v5  ;;  %v4313_v44 = vmul.f32 0.5, %v4311_v5  ;;  %v6823_v5 = vld [vmem:[%s9000_s20 + $0x98] ss:$12 sps:$4 sm:$0xff]  }
 0xb2f   :  { %v4279_v50 = vpop.permute.xlu1 %4278 }
 0xb30   :  { %v4282_v1 = vmul.f32 %v4279_v50, %v4272_v28  ;;  %6908 = verf.f32 %v4315_v17  ;;  %v6835_v17 = vld [vmem:[%s9000_s20 + $0x50] ss:$12 sps:$4 sm:$0xff]  }
 0xb32   :  { %v4284_v43 = vadd.f32 %v4282_v1, %v4268_v29  ;;  %v6820_v1 = vld [vmem:[%s9000_s20 + $0x90] ss:$12 sps:$4 sm:$0xff]  }
 0xb33   :  { %v6826_v29 = vld [vmem:[%s9000_s20 + $0x7c] ss:$12 sps:$4 sm:$0xff]  }
 0xb34   :  { %v4293_v55 = vpop.permute.xlu1 %4292  ;;  %v4286_v45 = vmul.f32 %v4284_v43, %v4185_v42  ;;  %v6830_v43 = vld [vmem:[%s9000_s20 + $0x64] ss:$12 sps:$4 sm:$0xff]   ;;  %v6834_v42 = vld [vmem:[%s9000_s20 + $0x4c] ss:$12 sps:$4 sm:$0xff]  }
 0xb35   :  { %v4296_v6 = vmul.f32 %v4293_v55, %v4256_v15  ;;  %v6816_v55 = vld [vmem:[%s9000_s20 + $0xa8] ss:$12 sps:$4 sm:$0xff]  }
 0xb39   :  { %v4303_v36 = vpop.permute.xlu1 %4302 }
 0xb3a   :  { %v4306_v27 = vmul.f32 %v4303_v36, %v4272_v28  ;;  %v6827_v36 = vld [vmem:[%s9000_s20 + $0x80] ss:$12 sps:$4 sm:$0xff]  }
 0xb3c   :  { %v4308_v35 = vadd.f32 %v4306_v27, %v4296_v6  ;;  %v6828_v6 = vld [vmem:[%s9000_s20 + $0x60] ss:$12 sps:$4 sm:$0xff]   ;;  %v6831_v27 = vld [vmem:[%s9000_s20 + $0x68] ss:$12 sps:$4 sm:$0xff]  }
 0xb3d   :  { %v6909_v51 = vpop.eup %6908 }
 0xb3e   :  { %v4310_v52 = vmul.f32 %v4308_v35, %v4187_v41  ;;  %v4319_v48 = vadd.f32 1.0, %v6909_v51  ;;  %v6832_v41 = vld [vmem:[%s9000_s20 + $0x48] ss:$12 sps:$4 sm:$0xff]   ;;  %v6843_v51 = vld [vmem:[%s9000_s20 + $0x20] ss:$12 sps:$4 sm:$0xff]  }
 0xb3f   :  { %v6838_v35 = vld [vmem:[%s9000_s20 + $0x34] ss:$12 sps:$4 sm:$0xff]  }
 0xb40   :  { %v4312_v7 = vadd.f32 %v4310_v52, %v4286_v45  ;;  %v4321_v47 = vmul.f32 %v4319_v48, %v4313_v44  ;;  %v6836_v45 = vld [vmem:[%s9000_s20 + $0x30] ss:$12 sps:$4 sm:$0xff]   ;;  %v6839_v52 = vld [vmem:[%s9000_s20 + $0x38] ss:$12 sps:$4 sm:$0xff]   ;;  %v6847_v44 = vld [vmem:[%s9000_s20 + $0x8] ss:$12 sps:$4 sm:$0xff]  }
 0xb41   :  { %v6846_v48 = vld [vmem:[%s9000_s20 + $0x4] ss:$12 sps:$4 sm:$0xff]  }
 0xb42   :  { %v4316_v19 = vmul.f32 0.70710677, %v4312_v7  ;;  %v4314_v0 = vmul.f32 0.5, %v4312_v7  ;;  %v6842_v7 = vld [vmem:[%s9000_s20 + $0x1c] ss:$12 sps:$4 sm:$0xff]  }
 0xb44   :  { %6910 = verf.f32 %v4316_v19  ;;  %v6840_v19 = vld [vmem:[%s9000_s20 + $0x18] ss:$12 sps:$4 sm:$0xff]  }
 0xb51   :  { %v6911_v54 = vpop.eup %6910 }
 0xb52   :  { %v4320_v60 = vadd.f32 1.0, %v6911_v54  ;;  %v6844_v54 = vld [vmem:[%s9000_s20] ss:$12 sps:$4 sm:$0xff]  }
 0xb54   :  { %v4322_v14 = vmul.f32 %v4320_v60, %v4314_v0 }
 0xb56   :  { %v4323_v34 = vpack.c.bf16 %v4322_v14, %v4321_v47  ;;  %v4607_v47 = vld [vmem:[%s8999_s19] sm:$0x3] }
 0xb58   :  { %4534 = vmatmul.mubr.bf16.vlgmr.msra.gmra.mxu0 %v4323_v34  ;;  %6138 = vmatmul.mubr.bf16.vlgmr.msra.gmra.mxu1 %v4323_v34  ;;  %v4627_v34 = vrot.slane %v4607_v47, %v8190_v3 }
 0xb59   :  { %4888 = vmatprep.mubr.bf16.mxu0 %v9039_v61  ;;  %6157 = vmatprep.mubr.msk.bf16.mxu1 %vm6963_vm4, %v6962_v12 }
 0xb5a   :  { %6142 = vmatpush3.bf16.msra.mxu1 %v6819_v57  ;;  %4857 = vmatpush1.bf16.msra.mxu0 %v6816_v55 }
 0xb5b   :  { %6143 = vmatprep.subr.bf16.mxu1 %v6962_v12  ;;  %4858 = vmatprep.subr.bf16.mxu0 %v6822_v25 }
 0xb5e   :  { %4859 = vmatpush1.bf16.msra.mxu0 %v6820_v1  ;;  %6144 = vmatpush3.bf16.msra.mxu1 %v6823_v5 }
 0xb5f   :  { %6145 = vmatprep.subr.bf16.mxu1 %v6962_v12  ;;  %4860 = vmatprep.subr.bf16.mxu0 %v6826_v29 }
 0xb62   :  { %4861 = vmatpush1.bf16.msra.mxu0 %v6824_v16  ;;  %6146 = vmatpush3.bf16.msra.mxu1 %v6827_v36 }
 0xb63   :  { %6147 = vmatprep.subr.bf16.mxu1 %v6962_v12  ;;  %4862 = vmatprep.subr.bf16.mxu0 %v6830_v43 }
 0xb66   :  { %4863 = vmatpush1.bf16.msra.mxu0 %v6828_v6  ;;  %6148 = vmatpush3.bf16.msra.mxu1 %v6831_v27 }
 0xb67   :  { %4864 = vmatprep.subr.bf16.mxu0 %v6834_v42  ;;  %6149 = vmatprep.subr.bf16.mxu1 %v6962_v12 }
 0xb6a   :  { %4865 = vmatpush1.bf16.msra.mxu0 %v6832_v41  ;;  %6150 = vmatpush3.bf16.msra.mxu1 %v6835_v17 }
 0xb6b   :  { %4866 = vmatprep.subr.bf16.mxu0 %v6838_v35  ;;  %6151 = vmatprep.subr.bf16.mxu1 %v6962_v12 }
 0xb6e   :  { %4867 = vmatpush1.bf16.msra.mxu0 %v6836_v45  ;;  %6152 = vmatpush3.bf16.msra.mxu1 %v6839_v52 }
 0xb6f   :  { %4868 = vmatprep.subr.bf16.mxu0 %v6842_v7  ;;  %6153 = vmatprep.subr.bf16.mxu1 %v6962_v12  ;;  %v8943_v7 = vld [vmem:[%s9001_s21] sm:$0x7] }
 0xb72   :  { %4869 = vmatpush1.bf16.msra.mxu0 %v6840_v19  ;;  %6154 = vmatpush3.bf16.msra.mxu1 %v6843_v51  ;;  %v4724_v19 = vrot.slane %v8943_v7, %v8184_v63 }
 0xb73   :  { %4870 = vmatprep.subr.bf16.mxu0 %v6846_v48  ;;  %6155 = vmatprep.subr.bf16.mxu1 %v6962_v12 }
 0xb76   :  { %4871 = vmatpush1.bf16.msra.mxu0 %v6844_v54  ;;  %6156 = vmatpush3.bf16.msra.mxu1 %v6847_v44 }
 0xc18   :  { %v4578_v22 = vpop.f32.mrf.mxu1  ;;  %v4535_v14 = vpop.f32.mrf.mxu0 }
 0xc19   :  { %v4579_v38 = vadd.f32 %v4578_v22, %v4369_v59 }
 0xc1a   :  { %v6139_v56 = vpop.f32.mrf.mxu1 }
 0xc1b   :  { %v4585_v2 = vsel %vm2863_vm3, %v4579_v38, -inf  ;;  %v4365_v56 = vrot.slane %v8836_v20, %v8190_v3 }
 0xc1c   :  { %4586 = vmax.xlane.f32.xlu1 %v4585_v2  ;;  %v4581_v24 = vpop.f32.mrf.mxu1  ;;  %v4537_v2 = vpop.f32.mrf.mxu0 }
 0xc1d   :  { %v4582_v40 = vadd.f32 %v4581_v24, %v4369_v59  ;;  %v4611_v59 = vrot.slane %v4607_v47, %v8181_v62 }
 0xc1e   :  { %v6140_v58 = vpop.f32.mrf.mxu1 }
 0xc1f   :  { %v4588_v28 = vsel %vm2863_vm3, %v4582_v40, -inf }
 0xc20   :  { %4589 = vmax.xlane.f32.xlu0 %v4588_v28  ;;  %v4361_v28 = vrot.slane %v8836_v20, %v8181_v62 }
 0xca5   :  { %v4587_v15 = vpop.xlane.xlu1 %4586 }
 0xca6   :  { %v4591_v8 = vsub.f32 %v4579_v38, %v4587_v15 }
 0xca8   :  { %v4593_v10 = vmul.f32 1.442695, %v4591_v8 }
 0xca9   :  { %v4590_v13 = vpop.xlane.xlu0 %4589 }
 0xcaa   :  { %6912 = vpow2.f32 %v4593_v10  ;;  %v4592_v18 = vsub.f32 %v4582_v40, %v4590_v13  ;;  %v4538_v10 = vadd.f32 %v4537_v2, %v4365_v56 }
 0xcac   :  { %v4595_v30 = vmul.f32 1.442695, %v4592_v18 }
 0xcae   :  { %6914 = vpow2.f32 %v4595_v30  ;;  %v4536_v30 = vadd.f32 %v4535_v14, %v4361_v28 }
 0xcb7   :  { %v6913_v11 = vpop.eup %6912 }
 0xcb8   :  { %v4597_v4 = vsel %vm2863_vm3, %v6913_v11, 0.0 }
 0xcb9   :  { %4598 = vadd.xlane.f32.xlu0 %v4597_v4 }
 0xcbb   :  { %v6915_v33 = vpop.eup %6914 }
 0xcbc   :  { %v4600_v32 = vsel %vm2863_vm3, %v6915_v33, 0.0 }
 0xcbd   :  { %4601 = vadd.xlane.f32.xlu1 %v4600_v32 }
 0xd42   :  { %v4599_v50 = vpop.xlane.xlu0 %4598 }
 0xd43   :  { %6916 = vrcp.f32 %v4599_v50 }
 0xd46   :  { %v4602_v39 = vpop.xlane.xlu1 %4601 }
 0xd47   :  { %6918 = vrcp.f32 %v4602_v39 }
 0xd50   :  { %v6917_v31 = vpop.eup %6916 }
 0xd51   :  { %v4604_v9 = vmul.f32 %v6917_v31, %v6913_v11 }
 0xd53   :  { %4629 = vperm.xlu1 %6213, %v4604_v9   ;;  %4614 = vperm.xlu0 %6205, %v4604_v9  }
 0xd54   :  { %v6919_v37 = vpop.eup %6918 }
 0xd55   :  { %v4606_v26 = vmul.f32 %v6919_v37, %v6915_v33  ;;  %v4539_v33 = vpop.f32.mrf.mxu0 }
 0xd56   :  { %v4540_v57 = vadd.f32 %v4539_v33, %v4361_v28  ;;  %v9043_v33 = vmov 6  }
 0xd57   :  { %6214 = vset.pattern.permute.xlu1 %v6957_v53  ;;  %6216 = vset.pattern.permute.xlu0 %v6955_v49 }
 0xd58   :  { %4643 = vperm.xlu1 %6214, %v4604_v9   ;;  %4633 = vperm.xlu0 %6216, %v4606_v26  }
 0xd5c   :  { %6215 = vset.pattern.permute.xlu1 %v9039_v61  ;;  %6217 = vset.pattern.permute.xlu0 %v9037_v21 }
 0xd5d   :  { %4619 = vperm.xlu1 %6215, %v4606_v26   ;;  %4653 = vperm.xlu0 %6217, %v4604_v9   ;;  %v4541_v9 = vpop.f32.mrf.mxu0 }
 0xd5e   :  { %v4542_v20 = vadd.f32 %v4541_v9, %v4365_v56 }
 0xd61   :  { %6218 = vset.pattern.permute.xlu1 %v6957_v53  ;;  %6220 = vset.pattern.permute.xlu0 %v9039_v61 }
 0xd62   :  { %4647 = vperm.xlu1 %6218, %v4606_v26  }
 0xd66   :  { %6219 = vset.pattern.permute.xlu1 %v9037_v21 }
 0xd67   :  { %4657 = vperm.xlu1 %6219, %v4606_v26  }
 0xd6b   :  { %6221 = vset.pattern.permute.xlu1 %v6955_v49 }
 0xdce   :  { %v4630_v0 = vpop.permute.xlu1 %4629  ;;  %v4615_v60 = vpop.permute.xlu0 %4614 }
 0xdcf   :  { %v4636_v12 = vmul.f32 %v4630_v0, %v4627_v34  ;;  %v4622_v24 = vmul.f32 %v4615_v60, %v4611_v59 }
 0xdd1   :  { %v4638_v13 = vadd.f32 %v4636_v12, %v4622_v24 }
 0xdd3   :  { %v4644_v22 = vpop.permute.xlu1 %4643  ;;  %v4634_v38 = vpop.permute.xlu0 %4633  ;;  %v4640_v32 = vmul.f32 %v4638_v13, %v4536_v30  ;;  %v9040_v13 = vmov 4  }
 0xdd4   :  { %v4650_v15 = vmul.f32 %v4644_v22, %v4611_v59  ;;  %v4637_v39 = vmul.f32 %v4634_v38, %v4627_v34 }
 0xdd8   :  { %v4620_v40 = vpop.permute.xlu1 %4619  ;;  %v4654_v58 = vpop.permute.xlu0 %4653 }
 0xdd9   :  { %v4660_v8 = vmul.f32 %v4654_v58, %v4627_v34  ;;  %v4623_v50 = vmul.f32 %v4620_v40, %v4611_v59 }
 0xddb   :  { %v4662_v18 = vadd.f32 %v4660_v8, %v4650_v15  ;;  %v4639_v26 = vadd.f32 %v4637_v39, %v4623_v50 }
 0xddd   :  { %v4664_v11 = vmul.f32 %v4662_v18, %v4538_v10  ;;  %v4648_v4 = vpop.permute.xlu1 %4647  ;;  %v4641_v5 = vmul.f32 %v4639_v26, %v4540_v57 }
 0xdde   :  { %v4651_v23 = vmul.f32 %v4648_v4, %v4611_v59  ;;  %v9042_v4 = vmov 7  }
 0xddf   :  { %v4666_v31 = vadd.f32 %v4664_v11, %v4640_v32  ;;  %v9041_v11 = vmov 5  }
 0xde1   :  { %v4670_v25 = vmul.f32 0.70710677, %v4666_v31  ;;  %v4668_v42 = vmul.f32 0.5, %v4666_v31 }
 0xde2   :  { %v4658_v37 = vpop.permute.xlu1 %4657 }
 0xde3   :  { %v4661_v55 = vmul.f32 %v4658_v37, %v4627_v34  ;;  %6920 = verf.f32 %v4670_v25 }
 0xde5   :  { %v4663_v1 = vadd.f32 %v4661_v55, %v4651_v23  ;;  %v4962_v23 = vld [vmem:[%s9002_s22] sm:$0xf]  ;;  %s6964_s22 = smov [#allocation2]  }
 0xde6   :  { %s5086_s17 = sshll.u32 %s6964_s22, 4  ;;  %s5087_s17 = int_to_ptr.vmem [resolvable:$true] %s5086_s17 }
 0xde7   :  { %v4665_v29 = vmul.f32 %v4663_v1, %v4542_v20  ;;  %v4966_v1 = vrot.slane %v4962_v23, %v8181_v62  ;;  %s6932_s18 = scalar_lea.vmem %s5087_s17, 256  ;;  %p6937_p1 = scmp.lt.s32.totalorder %s5087_s17, %s5087_s17 }
 0xde8   :  { %p6933_p0 = scmp.ne.s32.totalorder %s5087_s17, %s6932_s18  ;;  %p6938_p2 = scmp.lt.s32.totalorder %s6932_s18, %s6932_s18 }
 0xde9   :  { %v4667_v16 = vadd.f32 %v4665_v29, %v4641_v5 }
 0xdea   :  { %p6939_p3 = por %p6938_p2, %p6937_p1 }
 0xdeb   :  { %v4671_v36 = vmul.f32 0.70710677, %v4667_v16  ;;  %v4669_v41 = vmul.f32 0.5, %v4667_v16  ;;  %v4998_v16 = vrot.slane %v4962_v23, %v8184_v63  ;;  %v4716_v63 = vrot.slane %v8943_v7, %v8181_v62 }
 0xdec   :  { %p6940_p4 = pnand %p6939_p3, %p6933_p0 }
 0xded   :  { %6922 = verf.f32 %v4671_v36 }
 0xdf0   :  { %v6921_v43 = vpop.eup %6920 }
 0xdf1   :  { %v4674_v6 = vadd.f32 1.0, %v6921_v43 }
 0xdf3   :  { %v4676_v35 = vmul.f32 %v4674_v6, %v4668_v42 }
 0xdfa   :  { %v6923_v27 = vpop.eup %6922 }
 0xdfb   :  { %v4675_v17 = vadd.f32 1.0, %v6923_v27 }
 0xdfd   :  { %v4677_v45 = vmul.f32 %v4675_v17, %v4669_v41 }
 0xdff   :  { %v4678_v52 = vpack.c.bf16 %v4677_v45, %v4676_v35 }
 0xe01   :  { %4889 = vmatmul.mubr.bf16.vlgmr.msra.gmra.mxu0 %v4678_v52  ;;  %6158 = vmatmul.mubr.bf16.vlgmr.msra.gmra.mxu1 %v4678_v52  ;;  %v9044_v52 = vsub.s32 3, %v8176_v46 }
 0xec1   :  { %v4933_v51 = vpop.f32.mrf.mxu1  ;;  %v4890_v55 = vpop.f32.mrf.mxu0 }
 0xec2   :  { %v4934_v48 = vadd.f32 %v4933_v51, %v4724_v19 }
 0xec3   :  { %v6159_v54 = vpop.f32.mrf.mxu1  ;;  %v4892_v25 = vpop.f32.mrf.mxu0 }
 0xec4   :  { %v4940_v44 = vsel %vm709_vm2, %v4934_v48, -inf }
 0xec5   :  { %4941 = vmax.xlane.f32.xlu1 %v4940_v44  ;;  %v4936_v0 = vpop.f32.mrf.mxu1  ;;  %v4894_v27 = vpop.f32.mrf.mxu0 }
 0xec6   :  { %v4937_v60 = vadd.f32 %v4936_v0, %v4724_v19  ;;  %v5014_v19 = vrot.slane %v4962_v23, %v9044_v52 }
 0xec7   :  { %v6160_v47 = vpop.f32.mrf.mxu1 }
 0xec8   :  { %v4943_v14 = vsel %vm709_vm2, %v4937_v60, -inf }
 0xec9   :  { %4944 = vmax.xlane.f32.xlu0 %v4943_v14 }
 0xf4e   :  { %v4942_v34 = vpop.xlane.xlu1 %4941 }
 0xf4f   :  { %v4946_v59 = vsub.f32 %v4934_v48, %v4942_v34 }
 0xf51   :  { %v4948_v22 = vmul.f32 1.442695, %v4946_v59  ;;  %v4720_v59 = vrot.slane %v8943_v7, %v8190_v3 }
 0xf52   :  { %v4945_v38 = vpop.xlane.xlu0 %4944 }
 0xf53   :  { %6924 = vpow2.f32 %v4948_v22  ;;  %v4947_v56 = vsub.f32 %v4937_v60, %v4945_v38  ;;  %v4896_v60 = vpop.f32.mrf.mxu0 }
 0xf55   :  { %v4950_v2 = vmul.f32 1.442695, %v4947_v56 }
 0xf57   :  { %6926 = vpow2.f32 %v4950_v2 }
 0xf60   :  { %v6925_v12 = vpop.eup %6924 }
 0xf61   :  { %v4952_v24 = vsel %vm709_vm2, %v6925_v12, 0.0 }
 0xf62   :  { %4953 = vadd.xlane.f32.xlu0 %v4952_v24  ;;  %v4895_v24 = vadd.f32 %v4894_v27, %v4716_v63 }
 0xf64   :  { %v6927_v40 = vpop.eup %6926 }
 0xf65   :  { %v4955_v58 = vsel %vm709_vm2, %v6927_v40, 0.0 }
 0xf66   :  { %4956 = vadd.xlane.f32.xlu1 %v4955_v58 }
 0xfeb   :  { %v4954_v28 = vpop.xlane.xlu0 %4953 }
 0xfec   :  { %6928 = vrcp.f32 %v4954_v28 }
 0xfef   :  { %v4957_v15 = vpop.xlane.xlu1 %4956 }
 0xff0   :  { %6930 = vrcp.f32 %v4957_v15 }
 0xff9   :  { %v6929_v8 = vpop.eup %6928 }
 0xffa   :  { %v4959_v10 = vmul.f32 %v6929_v8, %v6925_v12 }
 0xffc   :  { %4984 = vperm.xlu1 %6221, %v4959_v10   ;;  %4969 = vperm.xlu0 %6220, %v4959_v10  }
 0xffd   :  { %v6931_v18 = vpop.eup %6930 }
 0xffe   :  { %v4961_v30 = vmul.f32 %v6931_v18, %v6927_v40  ;;  %v4897_v40 = vadd.f32 %v4896_v60, %v4720_v59 }
0x1000   :  { %6222 = vset.pattern.permute.xlu1 %v9040_v13  ;;  %6226 = vset.pattern.permute.xlu0 %v9037_v21 }
0x1001   :  { %5030 = vperm.xlu1 %6222, %v4959_v10   ;;  %5016 = vperm.xlu0 %6226, %v4959_v10  }
0x1005   :  { %6223 = vset.pattern.permute.xlu1 %v9041_v11  ;;  %6231 = vset.pattern.permute.xlu0 %v6957_v53 }
0x1006   :  { %5040 = vperm.xlu1 %6223, %v4959_v10   ;;  %5004 = vperm.xlu0 %6231, %v4961_v30  }
0x100a   :  { %6224 = vset.pattern.permute.xlu1 %v6957_v53  ;;  %6235 = vset.pattern.permute.xlu0 %v9042_v4 }
0x100b   :  { %5000 = vperm.xlu1 %6224, %v4959_v10   ;;  %5068 = vperm.xlu0 %6235, %v4961_v30  }
0x100f   :  { %6225 = vset.pattern.permute.xlu1 %v9043_v33 }
0x1010   :  { %5052 = vperm.xlu1 %6225, %v4959_v10  }
0x1014   :  { %6227 = vset.pattern.permute.xlu1 %v9039_v61 }
0x1015   :  { %4974 = vperm.xlu1 %6227, %v4961_v30  }
0x1019   :  { %6228 = vset.pattern.permute.xlu1 %v6955_v49 }
0x101a   :  { %4988 = vperm.xlu1 %6228, %v4961_v30  }
0x101e   :  { %6229 = vset.pattern.permute.xlu1 %v9040_v13 }
0x101f   :  { %5034 = vperm.xlu1 %6229, %v4961_v30  }
0x1023   :  { %6230 = vset.pattern.permute.xlu1 %v9041_v11 }
0x1024   :  { %5044 = vperm.xlu1 %6230, %v4961_v30  }
0x1028   :  { %6232 = vset.pattern.permute.xlu1 %v9043_v33 }
0x1029   :  { %5056 = vperm.xlu1 %6232, %v4961_v30  }
0x102d   :  { %6233 = vset.pattern.permute.xlu1 %v9037_v21  ;;  %v4982_v21 = vrot.slane %v4962_v23, %v8190_v3  ;;  %v4893_v3 = vadd.f32 %v4892_v25, %v4720_v59 }
0x102e   :  { %5020 = vperm.xlu1 %6233, %v4961_v30  }
0x1032   :  { %6234 = vset.pattern.permute.xlu1 %v9042_v4  ;;  %v4891_v4 = vadd.f32 %v4890_v55, %v4716_v63 }
0x1033   :  { %5064 = vperm.xlu1 %6234, %v4959_v10  }
0x1077   :  { %v4985_v53 = vpop.permute.xlu1 %4984  ;;  %v4970_v31 = vpop.permute.xlu0 %4969 }
0x1078   :  { %v4991_v42 = vmul.f32 %v4985_v53, %v4982_v21  ;;  %v4977_v41 = vmul.f32 %v4970_v31, %v4966_v1 }
0x107a   :  { %v4993_v47 = vadd.f32 %v4991_v42, %v4977_v41 }
0x107c   :  { %v5031_v61 = vpop.permute.xlu1 %5030  ;;  %v5017_v37 = vpop.permute.xlu0 %5016 }
0x107d   :  { %v5037_v46 = vmul.f32 %v5031_v61, %v4966_v1  ;;  %v5023_v28 = vmul.f32 %v5017_v37, %v5014_v19 }
0x1081   :  { %v5041_v32 = vpop.permute.xlu1 %5040  ;;  %v5005_v57 = vpop.permute.xlu0 %5004 }
0x1082   :  { %v5008_v44 = vmul.f32 %v5005_v57, %v4998_v16  ;;  %v5047_v14 = vmul.f32 %v5041_v32, %v4982_v21 }
0x1084   :  { %v5049_v15 = vadd.f32 %v5047_v14, %v5037_v46 }
0x1086   :  { %v5001_v49 = vpop.permute.xlu1 %5000  ;;  %v5069_v17 = vpop.permute.xlu0 %5068 }
0x1087   :  { %v5007_v48 = vmul.f32 %v5001_v49, %v4998_v16  ;;  %v5072_v0 = vmul.f32 %v5069_v17, %v5014_v19 }
0x1089   :  { %v5009_v2 = vadd.f32 %v5007_v48, %v4993_v47 }
0x108b   :  { %v5053_v50 = vpop.permute.xlu1 %5052  ;;  %v5025_v13 = vadd.f32 %v5023_v28, %v5009_v2 }
0x108c   :  { %v5059_v12 = vmul.f32 %v5053_v50, %v4998_v16 }
0x108d   :  { %v5027_v33 = vmul.f32 %v5025_v13, %v4891_v4 }
0x108e   :  { %v5061_v18 = vadd.f32 %v5059_v12, %v5049_v15 }
0x1090   :  { %v4975_v39 = vpop.permute.xlu1 %4974 }
0x1091   :  { %v4978_v43 = vmul.f32 %v4975_v39, %v4966_v1 }
0x1095   :  { %v4989_v9 = vpop.permute.xlu1 %4988 }
0x1096   :  { %v4992_v29 = vmul.f32 %v4989_v9, %v4982_v21 }
0x1098   :  { %v4994_v51 = vadd.f32 %v4992_v29, %v4978_v43 }
0x109a   :  { %v5035_v26 = vpop.permute.xlu1 %5034  ;;  %v5010_v38 = vadd.f32 %v5008_v44, %v4994_v51 }
0x109b   :  { %v5038_v36 = vmul.f32 %v5035_v26, %v4966_v1 }
0x109f   :  { %v5045_v20 = vpop.permute.xlu1 %5044 }
0x10a0   :  { %v5048_v5 = vmul.f32 %v5045_v20, %v4982_v21 }
0x10a2   :  { %v5050_v35 = vadd.f32 %v5048_v5, %v5038_v36 }
0x10a4   :  { %v5057_v6 = vpop.permute.xlu1 %5056 }
0x10a5   :  { %v5060_v45 = vmul.f32 %v5057_v6, %v4998_v16 }
0x10a7   :  { %v5062_v54 = vadd.f32 %v5060_v45, %v5050_v35 }
0x10a9   :  { %v5021_v34 = vpop.permute.xlu1 %5020  ;;  %v5074_v22 = vadd.f32 %v5072_v0, %v5062_v54 }
0x10aa   :  { %v5024_v56 = vmul.f32 %v5021_v34, %v5014_v19 }
0x10ab   :  { %v5076_v8 = vmul.f32 %v5074_v22, %v4897_v40 }
0x10ac   :  { %v5026_v58 = vadd.f32 %v5024_v56, %v5010_v38 }
0x10ae   :  { %v5028_v62 = vmul.f32 %v5026_v58, %v4895_v24  ;;  %v5065_v10 = vpop.permute.xlu1 %5064 }
0x10af   :  { %v5071_v30 = vmul.f32 %v5065_v10, %v5014_v19 }
0x10b0   :  { %v5078_v11 = vadd.f32 %v5076_v8, %v5028_v62 }
0x10b1   :  { %v5073_v7 = vadd.f32 %v5071_v30, %v5061_v18 }
0x10b2   :  { %5080 = vst [vmem:[#allocation2 + $0x8] sm:$0xff] %v5078_v11 }
0x10b3   :  { %v5075_v53 = vmul.f32 %v5073_v7, %v4893_v3 }
0x10b5   :  { %v5077_v61 = vadd.f32 %v5075_v53, %v5027_v33 }
0x10b7   :  { %5079 = vst [vmem:[#allocation2] sm:$0xff] %v5077_v61 }
0x10b8   :  { %6943 = shalt.err (!%p6940_p4)
}
0x10b9   :  { %s6965_s8 = smov 128   ;;  %s6966_s6 = smov 8  }
0x10ba   :  { %5092 = dma.vmem_to_hbm [thread:$0]  %s5087_s17, 256, %s9003_s23, [#allocation3], %s6965_s8, %s6965_s8, %s6966_s6  }
0x10bb   :  { %6952 = dma.done.wait [#allocation3], 256  }
0x10bc   :  { %6953 = vsyncadd [#allocation3], 4294967040 }
0x10bd   :  { %5096 = vsyncpa [#allocation3], 1 }

</bundles_post_ra>
